<compile_context>
chip_gen: v7x
topology: tpu7x:2x2x1
jax: 0.10.0
libtpu: 0.0.40
codegen_flags: <defaults>
</compile_context>

<pallas_src>
import functools

import jax
import jax.numpy as jnp
from jax.experimental import pallas as pl
from jax.experimental.pallas import tpu as pltpu

NEG_BIG = -9.0e15  # matches the -9e15 masking constant in the reference


def _elu(x):
    # TODO(synk): jnp.expm1 would be slightly more precise for tiny negative inputs,
    # but exp(x)-1 is kept since it is the previously-validated lowering.
    return jnp.where(x > 0, x, jnp.exp(x) - 1.0)


# ----------------------------------------------------------------------------
# Fused Pallas kernel: whole GAT.forward in one invocation (grid=())
# ----------------------------------------------------------------------------
def _fused_gat_kernel(
    xrow_ref, xcol_ref, adj_ref,
    w1_ref, a1b1_ref, a2b1_ref, mask1_ref,
    w2_ref, a1b2_ref, a2b2_ref, mask2_ref,
    p1w_ref, p1b_ref, p2w_ref, p2b_ref,
    fc1w_ref, fc1b_ref, fc2w_ref, fc2b_ref, fc3w_ref, fc3b_ref,
    fc4w_ref, fc4b_ref, fc5w_ref, fc5b_ref,
    out1_ref, out2_ref,
    *, alpha,
):
    bs, n = xrow_ref.shape

    # Additive adjacency bias (0 where edge, -9e15 elsewhere), computed once.
    adj_bias = jnp.where(adj_ref[...] > 0, 0.0, NEG_BIG)                 # [N, N]

    def attention_layer(h_all, a1b_ref, a2b_ref, mask_ref):
        """Multi-head graph attention.  h_all: [bs*N, H*O] (heads lane-stacked)."""
        mask = mask_ref[...]                                             # [H, 1, H*O]
        nheads = mask.shape[0]
        # f1/f2 for ALL heads & batches: two block-diagonal MXU matmuls instead of
        # 2*H VPU multiply + lane-reduce per (batch, head).
        f1 = jnp.dot(h_all, a1b_ref[...], preferred_element_type=jnp.float32)  # [bs*N, H]
        f2 = jnp.dot(h_all, a2b_ref[...], preferred_element_type=jnp.float32)  # [bs*N, H]
        outs = []
        for b in range(bs):                                              # bs tiny -> unrolled
            hb = h_all[b * n:(b + 1) * n, :]                             # [N, H*O] (sublane slice)
            f1b = f1[b * n:(b + 1) * n, :]                               # [N, H]
            f2t = f2[b * n:(b + 1) * n, :].T                             # [H, N]  one transpose / (layer, batch)
            acc = jnp.zeros_like(hb)
            for hd in range(nheads):                                     # unrolled, H <= 4
                # e[i, j] = LeakyReLU(h_i . a1 + h_j . a2)
                e = f1b[:, hd:hd + 1] + f2t[hd:hd + 1, :]                # [N, N]
                e = jnp.where(e > 0, e, alpha * e)                       # LeakyReLU(alpha)
                e = e + adj_bias                                         # adjacency mask
                # Row-wise softmax (fully masked rows degrade to uniform like torch);
                # denominator reciprocal on the EUP (approx=True -> free slot).
                p = jnp.exp(e - jnp.max(e, axis=-1, keepdims=True))
                attn = p * pl.reciprocal(jnp.sum(p, axis=-1, keepdims=True), approx=True)
                # TODO(synk): attention dropout skipped (eval mode).
                # Assemble the lane-concatenated multi-head output WITHOUT misaligned
                # lane slices or a final concat: matmul the full h block and keep only
                # this head's lanes via a precomputed 0/1 mask, accumulating blocks.
                acc = acc + jnp.dot(attn, hb, preferred_element_type=jnp.float32) * mask[hd]
            outs.append(_elu(acc))                                       # ELU on the assembled block
        return jnp.concatenate(outs, axis=0)                             # [bs*N, H*O] (sublane concat)

    # --- attention layer 1: F_in == 1 -> projection is a pure VPU broadcast multiply ---
    h1 = xcol_ref[...] * w1_ref[...]                                     # [bs*N, 32]
    h1 = attention_layer(h1, a1b1_ref, a2b1_ref, mask1_ref)              # [bs*N, 32]
    x1c = jnp.dot(h1, p1w_ref[...], preferred_element_type=jnp.float32) + p1b_ref[...]   # [bs*N, 1]

    # --- attention layer 2: one wide 32x48 projection, batched over bs on sublanes ---
    h2 = jnp.dot(h1, w2_ref[...], preferred_element_type=jnp.float32)    # [bs*N, 48]
    h2 = attention_layer(h2, a1b2_ref, a2b2_ref, mask2_ref)              # [bs*N, 48]
    x2c = jnp.dot(h2, p2w_ref[...], preferred_element_type=jnp.float32) + p2b_ref[...]   # [bs*N, 1]

    # --- feat -> fc1 with split weight blocks ---
    # fc1(cat([x0, x1, x2], -1)) == x0 @ W0 + x1 @ W1 + x2 @ W2 (W* = fc1 row blocks),
    # so the [bs, 3N] concat and its relayouts are never materialised.  x0 rows come
    # pre-laid-out from the host; x1/x2 need one tiny [N,1]->[1,N] transpose each per batch.
    def rows_from_col(col):                                              # [bs*N, 1] -> [bs, N]
        return jnp.concatenate([col[b * n:(b + 1) * n, :].T for b in range(bs)], axis=0)

    x0r = xrow_ref[...]                                                  # [bs, N]
    x1r = rows_from_col(x1c)                                             # [bs, N]
    x2r = rows_from_col(x2c)                                             # [bs, N]

    bf16 = jnp.bfloat16
    fc1w = fc1w_ref[...]                                                 # [3, N, 600] bf16
    y = (jnp.dot(x0r.astype(bf16), fc1w[0], preferred_element_type=jnp.float32)
         + jnp.dot(x1r.astype(bf16), fc1w[1], preferred_element_type=jnp.float32)
         + jnp.dot(x2r.astype(bf16), fc1w[2], preferred_element_type=jnp.float32)
         + fc1b_ref[...])
    f = _elu(y)                                                          # [bs, 600]
    f = _elu(jnp.dot(f.astype(bf16), fc2w_ref[...],
                     preferred_element_type=jnp.float32) + fc2b_ref[...])        # [bs, 256]
    o1 = _elu(jnp.dot(f, fc3w_ref[...], preferred_element_type=jnp.float32)
              + fc3b_ref[...])                                           # [bs, 64]  -> `output`
    f = _elu(jnp.dot(o1, fc4w_ref[...], preferred_element_type=jnp.float32)
             + fc4b_ref[...])                                            # [bs, 32]
    o2 = jnp.dot(f, fc5w_ref[...], preferred_element_type=jnp.float32) + fc5b_ref[...]   # [bs, 2]

    out1_ref[...] = o1
    out2_ref[...] = o2


def gat_forward(params, x, adj, *, alpha):
    """Fused forward: returns (output [bs,64], gat_output [bs,2])."""
    bs, N, F = x.shape
    x_row = jnp.mean(x, axis=-1)           # [bs, N]  (== x0; identity for F == 1)
    x_col = x.reshape(bs * N, F)            # [bs*N, 1] column layout for layer 1
    d1 = params["fc3_w"].shape[1]
    d2 = params["fc5_w"].shape[1]
    kernel = functools.partial(_fused_gat_kernel, alpha=alpha)
    return pl.pallas_call(
        kernel,
        out_shape=(
            jax.ShapeDtypeStruct((bs, d1), jnp.float32),
            jax.ShapeDtypeStruct((bs, d2), jnp.float32),
        ),
        compiler_params=pltpu.CompilerParams(vmem_limit_bytes=32 * 1024 * 1024),
    )(
        x_row, x_col, adj,
        params["w1"], params["a1blk_1"], params["a2blk_1"], params["mask_1"],
        params["w2"], params["a1blk_2"], params["a2blk_2"], params["mask_2"],
        params["pool1_w"], params["pool1_b"], params["pool2_w"], params["pool2_b"],
        params["fc1_w"], params["fc1_b"],
        params["fc2_w"], params["fc2_b"],
        params["fc3_w"], params["fc3_b"],
        params["fc4_w"], params["fc4_b"],
        params["fc5_w"], params["fc5_b"],
    )


# ----------------------------------------------------------------------------
# Parameter construction (deterministic; shapes match the PyTorch __init__)
# ----------------------------------------------------------------------------
def _xavier_uniform(key, shape, gain=1.0):
    fan_in, fan_out = shape[-2], shape[-1]
    limit = gain * (6.0 / (fan_in + fan_out)) ** 0.5
    return jax.random.uniform(key, shape, jnp.float32, -limit, limit)


def _xavier_normal(key, shape):
    fan_in, fan_out = shape
    std = (2.0 / (fan_in + fan_out)) ** 0.5
    return std * jax.random.normal(key, shape, jnp.float32)


def _default_linear(key, fan_in, fan_out):
    k1, k2 = jax.random.split(key)
    bound = 1.0 / (fan_in ** 0.5)
    w = jax.random.uniform(k1, (fan_in, fan_out), jnp.float32, -bound, bound)
    b = jax.random.uniform(k2, (fan_out,), jnp.float32, -bound, bound)
    return w, b


def _block_diag_cols(a):
    """a: [H, O] per-head vectors -> block-diagonal [H*O, H] (column hd = head hd)."""
    H, O = a.shape
    eye = jnp.eye(H, dtype=a.dtype)
    return (a[:, :, None] * eye[:, None, :]).reshape(H * O, H)


def _head_mask(H, O):
    """[H, 1, H*O] 0/1 masks selecting head hd's lane block."""
    return jnp.repeat(jnp.eye(H, dtype=jnp.float32), O, axis=1).reshape(H, 1, H * O)


def init_gat_params(key, dim):
    nhids = [8, 16, 12]
    nheads = [4, 3, 4]
    fc_dim = [600, 256, 64, 32]
    gain = 1.414

    keys = jax.random.split(key, 16)
    p = {}

    # --- attention layer 1: 4 heads, in=1 -> out=8 (heads stacked on lanes) ---
    H1, F1, O1 = nheads[0], 1, nhids[0]
    W1 = _xavier_uniform(keys[0], (H1, F1, O1), gain)
    p["w1"] = jnp.transpose(W1, (1, 0, 2)).reshape(F1, H1 * O1)          # [1, 32]
    a_full = _xavier_uniform(keys[1], (H1, 2 * O1, 1), gain)
    p["a1_1"], p["a2_1"] = a_full[:, :O1, 0], a_full[:, O1:, 0]          # [4, 8] each
    p["a1blk_1"] = _block_diag_cols(p["a1_1"])                           # [32, 4]
    p["a2blk_1"] = _block_diag_cols(p["a2_1"])                           # [32, 4]
    p["mask_1"] = _head_mask(H1, O1)                                     # [4, 1, 32]

    # --- attention layer 2: 3 heads, in=32 -> out=16 ---
    H2, F2, O2 = nheads[1], nhids[0] * nheads[0], nhids[1]
    W2 = _xavier_uniform(keys[2], (H2, F2, O2), gain)
    p["w2"] = jnp.transpose(W2, (1, 0, 2)).reshape(F2, H2 * O2)          # [32, 48]
    a_full = _xavier_uniform(keys[3], (H2, 2 * O2, 1), gain)
    p["a1_2"], p["a2_2"] = a_full[:, :O2, 0], a_full[:, O2:, 0]          # [3, 16] each
    p["a1blk_2"] = _block_diag_cols(p["a1_2"])                           # [48, 3]
    p["a2blk_2"] = _block_diag_cols(p["a2_2"])                           # [48, 3]
    p["mask_2"] = _head_mask(H2, O2)                                     # [3, 1, 48]

    # --- pooling linears (default torch Linear init), stored as columns ---
    w, b = _default_linear(keys[4], H1 * O1, 1)
    p["pool1_w"], p["pool1_b"] = w, b.reshape(1, 1)                      # [32,1],[1,1]
    w, b = _default_linear(keys[5], H2 * O2, 1)
    p["pool2_w"], p["pool2_b"] = w, b.reshape(1, 1)                      # [48,1],[1,1]

    # --- FC stack (xavier_normal weights, zero bias) ---
    dims = [3 * dim] + fc_dim + [2]
    for i in range(5):
        p[f"fc{i+1}_w"] = _xavier_normal(keys[6 + i], (dims[i], dims[i + 1]))
        p[f"fc{i+1}_b"] = jnp.zeros((1, dims[i + 1]), jnp.float32)
    # bf16 for the two big FC weights (halves the dominant weight DMA); fc1 split
    # into its x0/x1/x2 row blocks so the kernel never forms the [bs, 3N] concat.
    p["fc1_w"] = p["fc1_w"].astype(jnp.bfloat16).reshape(3, dim, fc_dim[0])  # [3, N, 600]
    p["fc2_w"] = p["fc2_w"].astype(jnp.bfloat16)                             # [600, 256]
    return p


# ----------------------------------------------------------------------------
# Pure-JAX reference (mirrors the PyTorch forward) for validation
# ----------------------------------------------------------------------------
def reference_forward(params, x, adj, *, alpha):
    prec = jax.lax.Precision.HIGHEST

    def gat_layer(h_in, w_stk, a1, a2):
        nheads, o = a1.shape
        h_all = jnp.einsum("bnf,fo->bno", h_in, w_stk, precision=prec)
        outs = []
        for hd in range(nheads):
            hh = h_all[:, :, hd * o:(hd + 1) * o]
            f1 = jnp.einsum("bno,o->bn", hh, a1[hd], precision=prec)
            f2 = jnp.einsum("bno,o->bn", hh, a2[hd], precision=prec)
            e = f1[:, :, None] + f2[:, None, :]
            e = jnp.where(e > 0, e, alpha * e)
            e = jnp.where(adj[None, :, :] > 0, e, NEG_BIG)
            attn = jax.nn.softmax(e, axis=-1)
            outs.append(jnp.einsum("bij,bjo->bio", attn, hh, precision=prec))
        hp = jnp.concatenate(outs, axis=-1)
        return jnp.where(hp > 0, hp, jnp.exp(hp) - 1.0)

    x0 = jnp.mean(x, axis=-1)
    h = gat_layer(x, params["w1"], params["a1_1"], params["a2_1"])
    x1 = jnp.einsum("bno,o->bn", h, params["pool1_w"][:, 0], precision=prec) \
        + params["pool1_b"][0, 0]
    h = gat_layer(h, params["w2"], params["a1_2"], params["a2_2"])
    x2 = jnp.einsum("bno,o->bn", h, params["pool2_w"][:, 0], precision=prec) \
        + params["pool2_b"][0, 0]
    feat = jnp.concatenate([x0, x1, x2], axis=1)

    def dense(v, w, b, act):
        y = jnp.dot(v, w.astype(jnp.float32), precision=prec) + b
        return jnp.where(y > 0, y, jnp.exp(y) - 1.0) if act else y

    fc1_w = params["fc1_w"].reshape(-1, params["fc1_w"].shape[-1])
    f = dense(feat, fc1_w, params["fc1_b"], True)
    f = dense(f, params["fc2_w"], params["fc2_b"], True)
    o1 = dense(f, params["fc3_w"], params["fc3_b"], True)
    f = dense(o1, params["fc4_w"], params["fc4_b"], True)
    o2 = dense(f, params["fc5_w"], params["fc5_b"], False)
    return o1, o2


# ----------------------------------------------------------------------------
if __name__ == "__main__":
    key = jax.random.PRNGKey(0)
    k_param, k_x, k_adj = jax.random.split(key, 3)

    dim = 16          # num_nodes (self.dim in the PyTorch module)
    bs = 2
    alpha = 0.2       # LeakyReLU slope

    params = init_gat_params(k_param, dim)

    x = jax.random.normal(k_x, (bs, dim, 1), jnp.float32)             # [bs, N, 1]
    adj = jax.random.bernoulli(k_adj, 0.5, (dim, dim)).astype(jnp.float32)
    adj = jnp.maximum(adj, jnp.eye(dim, dtype=jnp.float32))           # self-loops

    fwd = jax.jit(functools.partial(gat_forward, alpha=alpha))
    output, gat_output = fwd(params, x, adj)
    jax.block_until_ready((output, gat_output))

    assert output.shape == (bs, 64)
    assert gat_output.shape == (bs, 2)

    ref_out1, ref_out2 = jax.jit(functools.partial(reference_forward, alpha=alpha))(
        params, x, adj)
    jax.block_until_ready((ref_out1, ref_out2))
    assert bool(jnp.all(jnp.isfinite(output))) and bool(jnp.all(jnp.isfinite(gat_output)))
    assert jnp.allclose(output, ref_out1, atol=1e-2, rtol=1e-2)
    assert jnp.allclose(gat_output, ref_out2, atol=1e-2, rtol=1e-2)

    print("KERNEL_OK")
</pallas_src>

<mosaic_0001>
module attributes {stable_mosaic.version = 11 : i64} {
  func.func @_fused_gat_kernel(%arg0: memref<2x16xf32, #tpu.memory_space<vmem>>, %arg1: memref<32x1xf32, #tpu.memory_space<vmem>>, %arg2: memref<16x16xf32, #tpu.memory_space<vmem>>, %arg3: memref<1x32xf32, #tpu.memory_space<vmem>>, %arg4: memref<32x4xf32, #tpu.memory_space<vmem>>, %arg5: memref<32x4xf32, #tpu.memory_space<vmem>>, %arg6: memref<4x1x32xf32, #tpu.memory_space<vmem>>, %arg7: memref<32x48xf32, #tpu.memory_space<vmem>>, %arg8: memref<48x3xf32, #tpu.memory_space<vmem>>, %arg9: memref<48x3xf32, #tpu.memory_space<vmem>>, %arg10: memref<3x1x48xf32, #tpu.memory_space<vmem>>, %arg11: memref<32x1xf32, #tpu.memory_space<vmem>>, %arg12: memref<1x1xf32, #tpu.memory_space<vmem>>, %arg13: memref<48x1xf32, #tpu.memory_space<vmem>>, %arg14: memref<1x1xf32, #tpu.memory_space<vmem>>, %arg15: memref<3x16x600xbf16, #tpu.memory_space<vmem>>, %arg16: memref<1x600xf32, #tpu.memory_space<vmem>>, %arg17: memref<600x256xbf16, #tpu.memory_space<vmem>>, %arg18: memref<1x256xf32, #tpu.memory_space<vmem>>, %arg19: memref<256x64xf32, #tpu.memory_space<vmem>>, %arg20: memref<1x64xf32, #tpu.memory_space<vmem>>, %arg21: memref<64x32xf32, #tpu.memory_space<vmem>>, %arg22: memref<1x32xf32, #tpu.memory_space<vmem>>, %arg23: memref<32x2xf32, #tpu.memory_space<vmem>>, %arg24: memref<1x2xf32, #tpu.memory_space<vmem>>, %arg25: memref<2x64xf32, #tpu.memory_space<vmem>>, %arg26: memref<2x2xf32, #tpu.memory_space<vmem>>) attributes {dimension_semantics = [], scalar_prefetch = 0 : i64, scratch_operands = 0 : i64, tpu.core_type = #tpu.core_type<tc>} {
    %c0 = arith.constant 0 : index
    %c0_0 = arith.constant 0 : index
    %0 = vector.load %arg2[%c0, %c0_0] : memref<16x16xf32, #tpu.memory_space<vmem>>, vector<16x16xf32>
    %cst = arith.constant 0.000000e+00 : f32
    %1 = vector.broadcast %cst : f32 to vector<16x16xf32>
    %2 = arith.cmpf ogt, %0, %1 : vector<16x16xf32>
    %cst_1 = arith.constant 0.000000e+00 : f32
    %cst_2 = arith.constant -9.000000e+15 : f32
    %3 = vector.broadcast %cst_1 : f32 to vector<16x16xf32>
    %4 = vector.broadcast %cst_2 : f32 to vector<16x16xf32>
    %5 = arith.select %2, %3, %4 : vector<16x16xi1>, vector<16x16xf32>
    %c0_3 = arith.constant 0 : index
    %c0_4 = arith.constant 0 : index
    %6 = vector.load %arg1[%c0_3, %c0_4] : memref<32x1xf32, #tpu.memory_space<vmem>>, vector<32x1xf32>
    %c0_5 = arith.constant 0 : index
    %c0_6 = arith.constant 0 : index
    %7 = vector.load %arg3[%c0_5, %c0_6] : memref<1x32xf32, #tpu.memory_space<vmem>>, vector<1x32xf32>
    %8 = vector.broadcast %6 : vector<32x1xf32> to vector<32x32xf32>
    %9 = vector.broadcast %7 : vector<1x32xf32> to vector<32x32xf32>
    %10 = arith.mulf %8, %9 : vector<32x32xf32>
    %c0_7 = arith.constant 0 : index
    %c0_8 = arith.constant 0 : index
    %c0_9 = arith.constant 0 : index
    %11 = vector.load %arg6[%c0_7, %c0_8, %c0_9] : memref<4x1x32xf32, #tpu.memory_space<vmem>>, vector<4x1x32xf32>
    %c0_10 = arith.constant 0 : index
    %c0_11 = arith.constant 0 : index
    %12 = vector.load %arg4[%c0_10, %c0_11] : memref<32x4xf32, #tpu.memory_space<vmem>>, vector<32x4xf32>
    %cst_12 = arith.constant dense<0.000000e+00> : vector<32x4xf32>
    %13 = tpu.matmul %10, %12, %cst_12 {dimension_numbers = #tpu.dot_dimension_numbers<[1], [0], [0], [1], [0, 0, 1, 1], [], []>} : vector<32x32xf32>, vector<32x4xf32>, vector<32x4xf32> -> vector<32x4xf32>
    %c0_13 = arith.constant 0 : index
    %c0_14 = arith.constant 0 : index
    %14 = vector.load %arg5[%c0_13, %c0_14] : memref<32x4xf32, #tpu.memory_space<vmem>>, vector<32x4xf32>
    %cst_15 = arith.constant dense<0.000000e+00> : vector<32x4xf32>
    %15 = tpu.matmul %10, %14, %cst_15 {dimension_numbers = #tpu.dot_dimension_numbers<[1], [0], [0], [1], [0, 0, 1, 1], [], []>} : vector<32x32xf32>, vector<32x4xf32>, vector<32x4xf32> -> vector<32x4xf32>
    %16 = vector.extract_strided_slice %10 {offsets = [0, 0], sizes = [16, 32], strides = [1, 1]} : vector<32x32xf32> to vector<16x32xf32>
    %17 = vector.extract_strided_slice %13 {offsets = [0, 0], sizes = [16, 4], strides = [1, 1]} : vector<32x4xf32> to vector<16x4xf32>
    %18 = vector.extract_strided_slice %15 {offsets = [0, 0], sizes = [16, 4], strides = [1, 1]} : vector<32x4xf32> to vector<16x4xf32>
    %19 = tpu.transpose %18, [1, 0] : vector<16x4xf32> -> vector<4x16xf32>
    %cst_16 = arith.constant 0.000000e+00 : f32
    %20 = vector.broadcast %cst_16 : f32 to vector<16x32xf32>
    %21 = vector.extract_strided_slice %17 {offsets = [0, 0], sizes = [16, 1], strides = [1, 1]} : vector<16x4xf32> to vector<16x1xf32>
    %22 = vector.extract_strided_slice %19 {offsets = [0, 0], sizes = [1, 16], strides = [1, 1]} : vector<4x16xf32> to vector<1x16xf32>
    %23 = vector.broadcast %21 : vector<16x1xf32> to vector<16x16xf32>
    %24 = vector.broadcast %22 : vector<1x16xf32> to vector<16x16xf32>
    %25 = arith.addf %23, %24 : vector<16x16xf32>
    %cst_17 = arith.constant 0.000000e+00 : f32
    %26 = vector.broadcast %cst_17 : f32 to vector<16x16xf32>
    %27 = arith.cmpf ogt, %25, %26 : vector<16x16xf32>
    %cst_18 = arith.constant 2.000000e-01 : f32
    %28 = vector.broadcast %cst_18 : f32 to vector<16x16xf32>
    %29 = arith.mulf %28, %25 : vector<16x16xf32>
    %30 = arith.select %27, %25, %29 : vector<16x16xi1>, vector<16x16xf32>
    %31 = arith.addf %30, %5 : vector<16x16xf32>
    %cst_19 = arith.constant dense<0xFF800000> : vector<16xf32>
    %32 = vector.multi_reduction <maximumf>, %31, %cst_19 [1] : vector<16x16xf32> to vector<16xf32>
    %33 = vector.shape_cast %32 : vector<16xf32> to vector<16x1xf32>
    %34 = vector.broadcast %33 : vector<16x1xf32> to vector<16x16xf32>
    %35 = arith.subf %31, %34 : vector<16x16xf32>
    %36 = math.exp %35 : vector<16x16xf32>
    %cst_20 = arith.constant dense<0.000000e+00> : vector<16xf32>
    %37 = vector.multi_reduction <add>, %36, %cst_20 [1] : vector<16x16xf32> to vector<16xf32>
    %38 = vector.shape_cast %37 : vector<16xf32> to vector<16x1xf32>
    %39 = tpu.reciprocal %38 {approx = true} : vector<16x1xf32> -> vector<16x1xf32>
    %40 = vector.broadcast %39 : vector<16x1xf32> to vector<16x16xf32>
    %41 = arith.mulf %36, %40 : vector<16x16xf32>
    %cst_21 = arith.constant dense<0.000000e+00> : vector<16x32xf32>
    %42 = tpu.matmul %41, %16, %cst_21 {dimension_numbers = #tpu.dot_dimension_numbers<[1], [0], [0], [1], [0, 0, 1, 1], [], []>} : vector<16x16xf32>, vector<16x32xf32>, vector<16x32xf32> -> vector<16x32xf32>
    %43 = vector.extract_strided_slice %11 {offsets = [0, 0, 0], sizes = [1, 1, 32], strides = [1, 1, 1]} : vector<4x1x32xf32> to vector<1x1x32xf32>
    %44 = vector.shape_cast %43 : vector<1x1x32xf32> to vector<1x32xf32>
    %45 = vector.broadcast %44 : vector<1x32xf32> to vector<16x32xf32>
    %46 = arith.mulf %42, %45 : vector<16x32xf32>
    %47 = arith.addf %20, %46 : vector<16x32xf32>
    %48 = vector.extract_strided_slice %17 {offsets = [0, 1], sizes = [16, 1], strides = [1, 1]} : vector<16x4xf32> to vector<16x1xf32>
    %49 = vector.extract_strided_slice %19 {offsets = [1, 0], sizes = [1, 16], strides = [1, 1]} : vector<4x16xf32> to vector<1x16xf32>
    %50 = vector.broadcast %48 : vector<16x1xf32> to vector<16x16xf32>
    %51 = vector.broadcast %49 : vector<1x16xf32> to vector<16x16xf32>
    %52 = arith.addf %50, %51 : vector<16x16xf32>
    %cst_22 = arith.constant 0.000000e+00 : f32
    %53 = vector.broadcast %cst_22 : f32 to vector<16x16xf32>
    %54 = arith.cmpf ogt, %52, %53 : vector<16x16xf32>
    %cst_23 = arith.constant 2.000000e-01 : f32
    %55 = vector.broadcast %cst_23 : f32 to vector<16x16xf32>
    %56 = arith.mulf %55, %52 : vector<16x16xf32>
    %57 = arith.select %54, %52, %56 : vector<16x16xi1>, vector<16x16xf32>
    %58 = arith.addf %57, %5 : vector<16x16xf32>
    %cst_24 = arith.constant dense<0xFF800000> : vector<16xf32>
    %59 = vector.multi_reduction <maximumf>, %58, %cst_24 [1] : vector<16x16xf32> to vector<16xf32>
    %60 = vector.shape_cast %59 : vector<16xf32> to vector<16x1xf32>
    %61 = vector.broadcast %60 : vector<16x1xf32> to vector<16x16xf32>
    %62 = arith.subf %58, %61 : vector<16x16xf32>
    %63 = math.exp %62 : vector<16x16xf32>
    %cst_25 = arith.constant dense<0.000000e+00> : vector<16xf32>
    %64 = vector.multi_reduction <add>, %63, %cst_25 [1] : vector<16x16xf32> to vector<16xf32>
    %65 = vector.shape_cast %64 : vector<16xf32> to vector<16x1xf32>
    %66 = tpu.reciprocal %65 {approx = true} : vector<16x1xf32> -> vector<16x1xf32>
    %67 = vector.broadcast %66 : vector<16x1xf32> to vector<16x16xf32>
    %68 = arith.mulf %63, %67 : vector<16x16xf32>
    %cst_26 = arith.constant dense<0.000000e+00> : vector<16x32xf32>
    %69 = tpu.matmul %68, %16, %cst_26 {dimension_numbers = #tpu.dot_dimension_numbers<[1], [0], [0], [1], [0, 0, 1, 1], [], []>} : vector<16x16xf32>, vector<16x32xf32>, vector<16x32xf32> -> vector<16x32xf32>
    %70 = vector.extract_strided_slice %11 {offsets = [1, 0, 0], sizes = [1, 1, 32], strides = [1, 1, 1]} : vector<4x1x32xf32> to vector<1x1x32xf32>
    %71 = vector.shape_cast %70 : vector<1x1x32xf32> to vector<1x32xf32>
    %72 = vector.broadcast %71 : vector<1x32xf32> to vector<16x32xf32>
    %73 = arith.mulf %69, %72 : vector<16x32xf32>
    %74 = arith.addf %47, %73 : vector<16x32xf32>
    %75 = vector.extract_strided_slice %17 {offsets = [0, 2], sizes = [16, 1], strides = [1, 1]} : vector<16x4xf32> to vector<16x1xf32>
    %76 = vector.extract_strided_slice %19 {offsets = [2, 0], sizes = [1, 16], strides = [1, 1]} : vector<4x16xf32> to vector<1x16xf32>
    %77 = vector.broadcast %75 : vector<16x1xf32> to vector<16x16xf32>
    %78 = vector.broadcast %76 : vector<1x16xf32> to vector<16x16xf32>
    %79 = arith.addf %77, %78 : vector<16x16xf32>
    %cst_27 = arith.constant 0.000000e+00 : f32
    %80 = vector.broadcast %cst_27 : f32 to vector<16x16xf32>
    %81 = arith.cmpf ogt, %79, %80 : vector<16x16xf32>
    %cst_28 = arith.constant 2.000000e-01 : f32
    %82 = vector.broadcast %cst_28 : f32 to vector<16x16xf32>
    %83 = arith.mulf %82, %79 : vector<16x16xf32>
    %84 = arith.select %81, %79, %83 : vector<16x16xi1>, vector<16x16xf32>
    %85 = arith.addf %84, %5 : vector<16x16xf32>
    %cst_29 = arith.constant dense<0xFF800000> : vector<16xf32>
    %86 = vector.multi_reduction <maximumf>, %85, %cst_29 [1] : vector<16x16xf32> to vector<16xf32>
    %87 = vector.shape_cast %86 : vector<16xf32> to vector<16x1xf32>
    %88 = vector.broadcast %87 : vector<16x1xf32> to vector<16x16xf32>
    %89 = arith.subf %85, %88 : vector<16x16xf32>
    %90 = math.exp %89 : vector<16x16xf32>
    %cst_30 = arith.constant dense<0.000000e+00> : vector<16xf32>
    %91 = vector.multi_reduction <add>, %90, %cst_30 [1] : vector<16x16xf32> to vector<16xf32>
    %92 = vector.shape_cast %91 : vector<16xf32> to vector<16x1xf32>
    %93 = tpu.reciprocal %92 {approx = true} : vector<16x1xf32> -> vector<16x1xf32>
    %94 = vector.broadcast %93 : vector<16x1xf32> to vector<16x16xf32>
    %95 = arith.mulf %90, %94 : vector<16x16xf32>
    %cst_31 = arith.constant dense<0.000000e+00> : vector<16x32xf32>
    %96 = tpu.matmul %95, %16, %cst_31 {dimension_numbers = #tpu.dot_dimension_numbers<[1], [0], [0], [1], [0, 0, 1, 1], [], []>} : vector<16x16xf32>, vector<16x32xf32>, vector<16x32xf32> -> vector<16x32xf32>
    %97 = vector.extract_strided_slice %11 {offsets = [2, 0, 0], sizes = [1, 1, 32], strides = [1, 1, 1]} : vector<4x1x32xf32> to vector<1x1x32xf32>
    %98 = vector.shape_cast %97 : vector<1x1x32xf32> to vector<1x32xf32>
    %99 = vector.broadcast %98 : vector<1x32xf32> to vector<16x32xf32>
    %100 = arith.mulf %96, %99 : vector<16x32xf32>
    %101 = arith.addf %74, %100 : vector<16x32xf32>
    %102 = vector.extract_strided_slice %17 {offsets = [0, 3], sizes = [16, 1], strides = [1, 1]} : vector<16x4xf32> to vector<16x1xf32>
    %103 = vector.extract_strided_slice %19 {offsets = [3, 0], sizes = [1, 16], strides = [1, 1]} : vector<4x16xf32> to vector<1x16xf32>
    %104 = vector.broadcast %102 : vector<16x1xf32> to vector<16x16xf32>
    %105 = vector.broadcast %103 : vector<1x16xf32> to vector<16x16xf32>
    %106 = arith.addf %104, %105 : vector<16x16xf32>
    %cst_32 = arith.constant 0.000000e+00 : f32
    %107 = vector.broadcast %cst_32 : f32 to vector<16x16xf32>
    %108 = arith.cmpf ogt, %106, %107 : vector<16x16xf32>
    %cst_33 = arith.constant 2.000000e-01 : f32
    %109 = vector.broadcast %cst_33 : f32 to vector<16x16xf32>
    %110 = arith.mulf %109, %106 : vector<16x16xf32>
    %111 = arith.select %108, %106, %110 : vector<16x16xi1>, vector<16x16xf32>
    %112 = arith.addf %111, %5 : vector<16x16xf32>
    %cst_34 = arith.constant dense<0xFF800000> : vector<16xf32>
    %113 = vector.multi_reduction <maximumf>, %112, %cst_34 [1] : vector<16x16xf32> to vector<16xf32>
    %114 = vector.shape_cast %113 : vector<16xf32> to vector<16x1xf32>
    %115 = vector.broadcast %114 : vector<16x1xf32> to vector<16x16xf32>
    %116 = arith.subf %112, %115 : vector<16x16xf32>
    %117 = math.exp %116 : vector<16x16xf32>
    %cst_35 = arith.constant dense<0.000000e+00> : vector<16xf32>
    %118 = vector.multi_reduction <add>, %117, %cst_35 [1] : vector<16x16xf32> to vector<16xf32>
    %119 = vector.shape_cast %118 : vector<16xf32> to vector<16x1xf32>
    %120 = tpu.reciprocal %119 {approx = true} : vector<16x1xf32> -> vector<16x1xf32>
    %121 = vector.broadcast %120 : vector<16x1xf32> to vector<16x16xf32>
    %122 = arith.mulf %117, %121 : vector<16x16xf32>
    %cst_36 = arith.constant dense<0.000000e+00> : vector<16x32xf32>
    %123 = tpu.matmul %122, %16, %cst_36 {dimension_numbers = #tpu.dot_dimension_numbers<[1], [0], [0], [1], [0, 0, 1, 1], [], []>} : vector<16x16xf32>, vector<16x32xf32>, vector<16x32xf32> -> vector<16x32xf32>
    %124 = vector.extract_strided_slice %11 {offsets = [3, 0, 0], sizes = [1, 1, 32], strides = [1, 1, 1]} : vector<4x1x32xf32> to vector<1x1x32xf32>
    %125 = vector.shape_cast %124 : vector<1x1x32xf32> to vector<1x32xf32>
    %126 = vector.broadcast %125 : vector<1x32xf32> to vector<16x32xf32>
    %127 = arith.mulf %123, %126 : vector<16x32xf32>
    %128 = arith.addf %101, %127 : vector<16x32xf32>
    %cst_37 = arith.constant 0.000000e+00 : f32
    %129 = vector.broadcast %cst_37 : f32 to vector<16x32xf32>
    %130 = arith.cmpf ogt, %128, %129 : vector<16x32xf32>
    %131 = math.exp %128 : vector<16x32xf32>
    %cst_38 = arith.constant 1.000000e+00 : f32
    %132 = vector.broadcast %cst_38 : f32 to vector<16x32xf32>
    %133 = arith.subf %131, %132 : vector<16x32xf32>
    %134 = arith.select %130, %128, %133 : vector<16x32xi1>, vector<16x32xf32>
    %135 = vector.extract_strided_slice %10 {offsets = [16, 0], sizes = [16, 32], strides = [1, 1]} : vector<32x32xf32> to vector<16x32xf32>
    %136 = vector.extract_strided_slice %13 {offsets = [16, 0], sizes = [16, 4], strides = [1, 1]} : vector<32x4xf32> to vector<16x4xf32>
    %137 = vector.extract_strided_slice %15 {offsets = [16, 0], sizes = [16, 4], strides = [1, 1]} : vector<32x4xf32> to vector<16x4xf32>
    %138 = tpu.transpose %137, [1, 0] : vector<16x4xf32> -> vector<4x16xf32>
    %cst_39 = arith.constant 0.000000e+00 : f32
    %139 = vector.broadcast %cst_39 : f32 to vector<16x32xf32>
    %140 = vector.extract_strided_slice %136 {offsets = [0, 0], sizes = [16, 1], strides = [1, 1]} : vector<16x4xf32> to vector<16x1xf32>
    %141 = vector.extract_strided_slice %138 {offsets = [0, 0], sizes = [1, 16], strides = [1, 1]} : vector<4x16xf32> to vector<1x16xf32>
    %142 = vector.broadcast %140 : vector<16x1xf32> to vector<16x16xf32>
    %143 = vector.broadcast %141 : vector<1x16xf32> to vector<16x16xf32>
    %144 = arith.addf %142, %143 : vector<16x16xf32>
    %cst_40 = arith.constant 0.000000e+00 : f32
    %145 = vector.broadcast %cst_40 : f32 to vector<16x16xf32>
    %146 = arith.cmpf ogt, %144, %145 : vector<16x16xf32>
    %cst_41 = arith.constant 2.000000e-01 : f32
    %147 = vector.broadcast %cst_41 : f32 to vector<16x16xf32>
    %148 = arith.mulf %147, %144 : vector<16x16xf32>
    %149 = arith.select %146, %144, %148 : vector<16x16xi1>, vector<16x16xf32>
    %150 = arith.addf %149, %5 : vector<16x16xf32>
    %cst_42 = arith.constant dense<0xFF800000> : vector<16xf32>
    %151 = vector.multi_reduction <maximumf>, %150, %cst_42 [1] : vector<16x16xf32> to vector<16xf32>
    %152 = vector.shape_cast %151 : vector<16xf32> to vector<16x1xf32>
    %153 = vector.broadcast %152 : vector<16x1xf32> to vector<16x16xf32>
    %154 = arith.subf %150, %153 : vector<16x16xf32>
    %155 = math.exp %154 : vector<16x16xf32>
    %cst_43 = arith.constant dense<0.000000e+00> : vector<16xf32>
    %156 = vector.multi_reduction <add>, %155, %cst_43 [1] : vector<16x16xf32> to vector<16xf32>
    %157 = vector.shape_cast %156 : vector<16xf32> to vector<16x1xf32>
    %158 = tpu.reciprocal %157 {approx = true} : vector<16x1xf32> -> vector<16x1xf32>
    %159 = vector.broadcast %158 : vector<16x1xf32> to vector<16x16xf32>
    %160 = arith.mulf %155, %159 : vector<16x16xf32>
    %cst_44 = arith.constant dense<0.000000e+00> : vector<16x32xf32>
    %161 = tpu.matmul %160, %135, %cst_44 {dimension_numbers = #tpu.dot_dimension_numbers<[1], [0], [0], [1], [0, 0, 1, 1], [], []>} : vector<16x16xf32>, vector<16x32xf32>, vector<16x32xf32> -> vector<16x32xf32>
    %162 = vector.extract_strided_slice %11 {offsets = [0, 0, 0], sizes = [1, 1, 32], strides = [1, 1, 1]} : vector<4x1x32xf32> to vector<1x1x32xf32>
    %163 = vector.shape_cast %162 : vector<1x1x32xf32> to vector<1x32xf32>
    %164 = vector.broadcast %163 : vector<1x32xf32> to vector<16x32xf32>
    %165 = arith.mulf %161, %164 : vector<16x32xf32>
    %166 = arith.addf %139, %165 : vector<16x32xf32>
    %167 = vector.extract_strided_slice %136 {offsets = [0, 1], sizes = [16, 1], strides = [1, 1]} : vector<16x4xf32> to vector<16x1xf32>
    %168 = vector.extract_strided_slice %138 {offsets = [1, 0], sizes = [1, 16], strides = [1, 1]} : vector<4x16xf32> to vector<1x16xf32>
    %169 = vector.broadcast %167 : vector<16x1xf32> to vector<16x16xf32>
    %170 = vector.broadcast %168 : vector<1x16xf32> to vector<16x16xf32>
    %171 = arith.addf %169, %170 : vector<16x16xf32>
    %cst_45 = arith.constant 0.000000e+00 : f32
    %172 = vector.broadcast %cst_45 : f32 to vector<16x16xf32>
    %173 = arith.cmpf ogt, %171, %172 : vector<16x16xf32>
    %cst_46 = arith.constant 2.000000e-01 : f32
    %174 = vector.broadcast %cst_46 : f32 to vector<16x16xf32>
    %175 = arith.mulf %174, %171 : vector<16x16xf32>
    %176 = arith.select %173, %171, %175 : vector<16x16xi1>, vector<16x16xf32>
    %177 = arith.addf %176, %5 : vector<16x16xf32>
    %cst_47 = arith.constant dense<0xFF800000> : vector<16xf32>
    %178 = vector.multi_reduction <maximumf>, %177, %cst_47 [1] : vector<16x16xf32> to vector<16xf32>
    %179 = vector.shape_cast %178 : vector<16xf32> to vector<16x1xf32>
    %180 = vector.broadcast %179 : vector<16x1xf32> to vector<16x16xf32>
    %181 = arith.subf %177, %180 : vector<16x16xf32>
    %182 = math.exp %181 : vector<16x16xf32>
    %cst_48 = arith.constant dense<0.000000e+00> : vector<16xf32>
    %183 = vector.multi_reduction <add>, %182, %cst_48 [1] : vector<16x16xf32> to vector<16xf32>
    %184 = vector.shape_cast %183 : vector<16xf32> to vector<16x1xf32>
    %185 = tpu.reciprocal %184 {approx = true} : vector<16x1xf32> -> vector<16x1xf32>
    %186 = vector.broadcast %185 : vector<16x1xf32> to vector<16x16xf32>
    %187 = arith.mulf %182, %186 : vector<16x16xf32>
    %cst_49 = arith.constant dense<0.000000e+00> : vector<16x32xf32>
    %188 = tpu.matmul %187, %135, %cst_49 {dimension_numbers = #tpu.dot_dimension_numbers<[1], [0], [0], [1], [0, 0, 1, 1], [], []>} : vector<16x16xf32>, vector<16x32xf32>, vector<16x32xf32> -> vector<16x32xf32>
    %189 = vector.extract_strided_slice %11 {offsets = [1, 0, 0], sizes = [1, 1, 32], strides = [1, 1, 1]} : vector<4x1x32xf32> to vector<1x1x32xf32>
    %190 = vector.shape_cast %189 : vector<1x1x32xf32> to vector<1x32xf32>
    %191 = vector.broadcast %190 : vector<1x32xf32> to vector<16x32xf32>
    %192 = arith.mulf %188, %191 : vector<16x32xf32>
    %193 = arith.addf %166, %192 : vector<16x32xf32>
    %194 = vector.extract_strided_slice %136 {offsets = [0, 2], sizes = [16, 1], strides = [1, 1]} : vector<16x4xf32> to vector<16x1xf32>
    %195 = vector.extract_strided_slice %138 {offsets = [2, 0], sizes = [1, 16], strides = [1, 1]} : vector<4x16xf32> to vector<1x16xf32>
    %196 = vector.broadcast %194 : vector<16x1xf32> to vector<16x16xf32>
    %197 = vector.broadcast %195 : vector<1x16xf32> to vector<16x16xf32>
    %198 = arith.addf %196, %197 : vector<16x16xf32>
    %cst_50 = arith.constant 0.000000e+00 : f32
    %199 = vector.broadcast %cst_50 : f32 to vector<16x16xf32>
    %200 = arith.cmpf ogt, %198, %199 : vector<16x16xf32>
    %cst_51 = arith.constant 2.000000e-01 : f32
    %201 = vector.broadcast %cst_51 : f32 to vector<16x16xf32>
    %202 = arith.mulf %201, %198 : vector<16x16xf32>
    %203 = arith.select %200, %198, %202 : vector<16x16xi1>, vector<16x16xf32>
    %204 = arith.addf %203, %5 : vector<16x16xf32>
    %cst_52 = arith.constant dense<0xFF800000> : vector<16xf32>
    %205 = vector.multi_reduction <maximumf>, %204, %cst_52 [1] : vector<16x16xf32> to vector<16xf32>
    %206 = vector.shape_cast %205 : vector<16xf32> to vector<16x1xf32>
    %207 = vector.broadcast %206 : vector<16x1xf32> to vector<16x16xf32>
    %208 = arith.subf %204, %207 : vector<16x16xf32>
    %209 = math.exp %208 : vector<16x16xf32>
    %cst_53 = arith.constant dense<0.000000e+00> : vector<16xf32>
    %210 = vector.multi_reduction <add>, %209, %cst_53 [1] : vector<16x16xf32> to vector<16xf32>
    %211 = vector.shape_cast %210 : vector<16xf32> to vector<16x1xf32>
    %212 = tpu.reciprocal %211 {approx = true} : vector<16x1xf32> -> vector<16x1xf32>
    %213 = vector.broadcast %212 : vector<16x1xf32> to vector<16x16xf32>
    %214 = arith.mulf %209, %213 : vector<16x16xf32>
    %cst_54 = arith.constant dense<0.000000e+00> : vector<16x32xf32>
    %215 = tpu.matmul %214, %135, %cst_54 {dimension_numbers = #tpu.dot_dimension_numbers<[1], [0], [0], [1], [0, 0, 1, 1], [], []>} : vector<16x16xf32>, vector<16x32xf32>, vector<16x32xf32> -> vector<16x32xf32>
    %216 = vector.extract_strided_slice %11 {offsets = [2, 0, 0], sizes = [1, 1, 32], strides = [1, 1, 1]} : vector<4x1x32xf32> to vector<1x1x32xf32>
    %217 = vector.shape_cast %216 : vector<1x1x32xf32> to vector<1x32xf32>
    %218 = vector.broadcast %217 : vector<1x32xf32> to vector<16x32xf32>
    %219 = arith.mulf %215, %218 : vector<16x32xf32>
    %220 = arith.addf %193, %219 : vector<16x32xf32>
    %221 = vector.extract_strided_slice %136 {offsets = [0, 3], sizes = [16, 1], strides = [1, 1]} : vector<16x4xf32> to vector<16x1xf32>
    %222 = vector.extract_strided_slice %138 {offsets = [3, 0], sizes = [1, 16], strides = [1, 1]} : vector<4x16xf32> to vector<1x16xf32>
    %223 = vector.broadcast %221 : vector<16x1xf32> to vector<16x16xf32>
    %224 = vector.broadcast %222 : vector<1x16xf32> to vector<16x16xf32>
    %225 = arith.addf %223, %224 : vector<16x16xf32>
    %cst_55 = arith.constant 0.000000e+00 : f32
    %226 = vector.broadcast %cst_55 : f32 to vector<16x16xf32>
    %227 = arith.cmpf ogt, %225, %226 : vector<16x16xf32>
    %cst_56 = arith.constant 2.000000e-01 : f32
    %228 = vector.broadcast %cst_56 : f32 to vector<16x16xf32>
    %229 = arith.mulf %228, %225 : vector<16x16xf32>
    %230 = arith.select %227, %225, %229 : vector<16x16xi1>, vector<16x16xf32>
    %231 = arith.addf %230, %5 : vector<16x16xf32>
    %cst_57 = arith.constant dense<0xFF800000> : vector<16xf32>
    %232 = vector.multi_reduction <maximumf>, %231, %cst_57 [1] : vector<16x16xf32> to vector<16xf32>
    %233 = vector.shape_cast %232 : vector<16xf32> to vector<16x1xf32>
    %234 = vector.broadcast %233 : vector<16x1xf32> to vector<16x16xf32>
    %235 = arith.subf %231, %234 : vector<16x16xf32>
    %236 = math.exp %235 : vector<16x16xf32>
    %cst_58 = arith.constant dense<0.000000e+00> : vector<16xf32>
    %237 = vector.multi_reduction <add>, %236, %cst_58 [1] : vector<16x16xf32> to vector<16xf32>
    %238 = vector.shape_cast %237 : vector<16xf32> to vector<16x1xf32>
    %239 = tpu.reciprocal %238 {approx = true} : vector<16x1xf32> -> vector<16x1xf32>
    %240 = vector.broadcast %239 : vector<16x1xf32> to vector<16x16xf32>
    %241 = arith.mulf %236, %240 : vector<16x16xf32>
    %cst_59 = arith.constant dense<0.000000e+00> : vector<16x32xf32>
    %242 = tpu.matmul %241, %135, %cst_59 {dimension_numbers = #tpu.dot_dimension_numbers<[1], [0], [0], [1], [0, 0, 1, 1], [], []>} : vector<16x16xf32>, vector<16x32xf32>, vector<16x32xf32> -> vector<16x32xf32>
    %243 = vector.extract_strided_slice %11 {offsets = [3, 0, 0], sizes = [1, 1, 32], strides = [1, 1, 1]} : vector<4x1x32xf32> to vector<1x1x32xf32>
    %244 = vector.shape_cast %243 : vector<1x1x32xf32> to vector<1x32xf32>
    %245 = vector.broadcast %244 : vector<1x32xf32> to vector<16x32xf32>
    %246 = arith.mulf %242, %245 : vector<16x32xf32>
    %247 = arith.addf %220, %246 : vector<16x32xf32>
    %cst_60 = arith.constant 0.000000e+00 : f32
    %248 = vector.broadcast %cst_60 : f32 to vector<16x32xf32>
    %249 = arith.cmpf ogt, %247, %248 : vector<16x32xf32>
    %250 = math.exp %247 : vector<16x32xf32>
    %cst_61 = arith.constant 1.000000e+00 : f32
    %251 = vector.broadcast %cst_61 : f32 to vector<16x32xf32>
    %252 = arith.subf %250, %251 : vector<16x32xf32>
    %253 = arith.select %249, %247, %252 : vector<16x32xi1>, vector<16x32xf32>
    %254 = tpu.concatenate %134, %253 in 0 : vector<16x32xf32>, vector<16x32xf32> -> vector<32x32xf32>
    %c0_62 = arith.constant 0 : index
    %c0_63 = arith.constant 0 : index
    %255 = vector.load %arg11[%c0_62, %c0_63] : memref<32x1xf32, #tpu.memory_space<vmem>>, vector<32x1xf32>
    %cst_64 = arith.constant dense<0.000000e+00> : vector<32x1xf32>
    %256 = tpu.matmul %254, %255, %cst_64 {dimension_numbers = #tpu.dot_dimension_numbers<[1], [0], [0], [1], [0, 0, 1, 1], [], []>} : vector<32x32xf32>, vector<32x1xf32>, vector<32x1xf32> -> vector<32x1xf32>
    %c0_65 = arith.constant 0 : index
    %c0_66 = arith.constant 0 : index
    %257 = vector.load %arg12[%c0_65, %c0_66] : memref<1x1xf32, #tpu.memory_space<vmem>>, vector<1x1xf32>
    %258 = vector.broadcast %257 : vector<1x1xf32> to vector<32x1xf32>
    %259 = arith.addf %256, %258 : vector<32x1xf32>
    %c0_67 = arith.constant 0 : index
    %c0_68 = arith.constant 0 : index
    %260 = vector.load %arg7[%c0_67, %c0_68] : memref<32x48xf32, #tpu.memory_space<vmem>>, vector<32x48xf32>
    %cst_69 = arith.constant dense<0.000000e+00> : vector<32x48xf32>
    %261 = tpu.matmul %254, %260, %cst_69 {dimension_numbers = #tpu.dot_dimension_numbers<[1], [0], [0], [1], [0, 0, 1, 1], [], []>} : vector<32x32xf32>, vector<32x48xf32>, vector<32x48xf32> -> vector<32x48xf32>
    %c0_70 = arith.constant 0 : index
    %c0_71 = arith.constant 0 : index
    %c0_72 = arith.constant 0 : index
    %262 = vector.load %arg10[%c0_70, %c0_71, %c0_72] : memref<3x1x48xf32, #tpu.memory_space<vmem>>, vector<3x1x48xf32>
    %c0_73 = arith.constant 0 : index
    %c0_74 = arith.constant 0 : index
    %263 = vector.load %arg8[%c0_73, %c0_74] : memref<48x3xf32, #tpu.memory_space<vmem>>, vector<48x3xf32>
    %cst_75 = arith.constant dense<0.000000e+00> : vector<32x3xf32>
    %264 = tpu.matmul %261, %263, %cst_75 {dimension_numbers = #tpu.dot_dimension_numbers<[1], [0], [0], [1], [0, 0, 1, 1], [], []>} : vector<32x48xf32>, vector<48x3xf32>, vector<32x3xf32> -> vector<32x3xf32>
    %c0_76 = arith.constant 0 : index
    %c0_77 = arith.constant 0 : index
    %265 = vector.load %arg9[%c0_76, %c0_77] : memref<48x3xf32, #tpu.memory_space<vmem>>, vector<48x3xf32>
    %cst_78 = arith.constant dense<0.000000e+00> : vector<32x3xf32>
    %266 = tpu.matmul %261, %265, %cst_78 {dimension_numbers = #tpu.dot_dimension_numbers<[1], [0], [0], [1], [0, 0, 1, 1], [], []>} : vector<32x48xf32>, vector<48x3xf32>, vector<32x3xf32> -> vector<32x3xf32>
    %267 = vector.extract_strided_slice %261 {offsets = [0, 0], sizes = [16, 48], strides = [1, 1]} : vector<32x48xf32> to vector<16x48xf32>
    %268 = vector.extract_strided_slice %264 {offsets = [0, 0], sizes = [16, 3], strides = [1, 1]} : vector<32x3xf32> to vector<16x3xf32>
    %269 = vector.extract_strided_slice %266 {offsets = [0, 0], sizes = [16, 3], strides = [1, 1]} : vector<32x3xf32> to vector<16x3xf32>
    %270 = tpu.transpose %269, [1, 0] : vector<16x3xf32> -> vector<3x16xf32>
    %cst_79 = arith.constant 0.000000e+00 : f32
    %271 = vector.broadcast %cst_79 : f32 to vector<16x48xf32>
    %272 = vector.extract_strided_slice %268 {offsets = [0, 0], sizes = [16, 1], strides = [1, 1]} : vector<16x3xf32> to vector<16x1xf32>
    %273 = vector.extract_strided_slice %270 {offsets = [0, 0], sizes = [1, 16], strides = [1, 1]} : vector<3x16xf32> to vector<1x16xf32>
    %274 = vector.broadcast %272 : vector<16x1xf32> to vector<16x16xf32>
    %275 = vector.broadcast %273 : vector<1x16xf32> to vector<16x16xf32>
    %276 = arith.addf %274, %275 : vector<16x16xf32>
    %cst_80 = arith.constant 0.000000e+00 : f32
    %277 = vector.broadcast %cst_80 : f32 to vector<16x16xf32>
    %278 = arith.cmpf ogt, %276, %277 : vector<16x16xf32>
    %cst_81 = arith.constant 2.000000e-01 : f32
    %279 = vector.broadcast %cst_81 : f32 to vector<16x16xf32>
    %280 = arith.mulf %279, %276 : vector<16x16xf32>
    %281 = arith.select %278, %276, %280 : vector<16x16xi1>, vector<16x16xf32>
    %282 = arith.addf %281, %5 : vector<16x16xf32>
    %cst_82 = arith.constant dense<0xFF800000> : vector<16xf32>
    %283 = vector.multi_reduction <maximumf>, %282, %cst_82 [1] : vector<16x16xf32> to vector<16xf32>
    %284 = vector.shape_cast %283 : vector<16xf32> to vector<16x1xf32>
    %285 = vector.broadcast %284 : vector<16x1xf32> to vector<16x16xf32>
    %286 = arith.subf %282, %285 : vector<16x16xf32>
    %287 = math.exp %286 : vector<16x16xf32>
    %cst_83 = arith.constant dense<0.000000e+00> : vector<16xf32>
    %288 = vector.multi_reduction <add>, %287, %cst_83 [1] : vector<16x16xf32> to vector<16xf32>
    %289 = vector.shape_cast %288 : vector<16xf32> to vector<16x1xf32>
    %290 = tpu.reciprocal %289 {approx = true} : vector<16x1xf32> -> vector<16x1xf32>
    %291 = vector.broadcast %290 : vector<16x1xf32> to vector<16x16xf32>
    %292 = arith.mulf %287, %291 : vector<16x16xf32>
    %cst_84 = arith.constant dense<0.000000e+00> : vector<16x48xf32>
    %293 = tpu.matmul %292, %267, %cst_84 {dimension_numbers = #tpu.dot_dimension_numbers<[1], [0], [0], [1], [0, 0, 1, 1], [], []>} : vector<16x16xf32>, vector<16x48xf32>, vector<16x48xf32> -> vector<16x48xf32>
    %294 = vector.extract_strided_slice %262 {offsets = [0, 0, 0], sizes = [1, 1, 48], strides = [1, 1, 1]} : vector<3x1x48xf32> to vector<1x1x48xf32>
    %295 = vector.shape_cast %294 : vector<1x1x48xf32> to vector<1x48xf32>
    %296 = vector.broadcast %295 : vector<1x48xf32> to vector<16x48xf32>
    %297 = arith.mulf %293, %296 : vector<16x48xf32>
    %298 = arith.addf %271, %297 : vector<16x48xf32>
    %299 = vector.extract_strided_slice %268 {offsets = [0, 1], sizes = [16, 1], strides = [1, 1]} : vector<16x3xf32> to vector<16x1xf32>
    %300 = vector.extract_strided_slice %270 {offsets = [1, 0], sizes = [1, 16], strides = [1, 1]} : vector<3x16xf32> to vector<1x16xf32>
    %301 = vector.broadcast %299 : vector<16x1xf32> to vector<16x16xf32>
    %302 = vector.broadcast %300 : vector<1x16xf32> to vector<16x16xf32>
    %303 = arith.addf %301, %302 : vector<16x16xf32>
    %cst_85 = arith.constant 0.000000e+00 : f32
    %304 = vector.broadcast %cst_85 : f32 to vector<16x16xf32>
    %305 = arith.cmpf ogt, %303, %304 : vector<16x16xf32>
    %cst_86 = arith.constant 2.000000e-01 : f32
    %306 = vector.broadcast %cst_86 : f32 to vector<16x16xf32>
    %307 = arith.mulf %306, %303 : vector<16x16xf32>
    %308 = arith.select %305, %303, %307 : vector<16x16xi1>, vector<16x16xf32>
    %309 = arith.addf %308, %5 : vector<16x16xf32>
    %cst_87 = arith.constant dense<0xFF800000> : vector<16xf32>
    %310 = vector.multi_reduction <maximumf>, %309, %cst_87 [1] : vector<16x16xf32> to vector<16xf32>
    %311 = vector.shape_cast %310 : vector<16xf32> to vector<16x1xf32>
    %312 = vector.broadcast %311 : vector<16x1xf32> to vector<16x16xf32>
    %313 = arith.subf %309, %312 : vector<16x16xf32>
    %314 = math.exp %313 : vector<16x16xf32>
    %cst_88 = arith.constant dense<0.000000e+00> : vector<16xf32>
    %315 = vector.multi_reduction <add>, %314, %cst_88 [1] : vector<16x16xf32> to vector<16xf32>
    %316 = vector.shape_cast %315 : vector<16xf32> to vector<16x1xf32>
    %317 = tpu.reciprocal %316 {approx = true} : vector<16x1xf32> -> vector<16x1xf32>
    %318 = vector.broadcast %317 : vector<16x1xf32> to vector<16x16xf32>
    %319 = arith.mulf %314, %318 : vector<16x16xf32>
    %cst_89 = arith.constant dense<0.000000e+00> : vector<16x48xf32>
    %320 = tpu.matmul %319, %267, %cst_89 {dimension_numbers = #tpu.dot_dimension_numbers<[1], [0], [0], [1], [0, 0, 1, 1], [], []>} : vector<16x16xf32>, vector<16x48xf32>, vector<16x48xf32> -> vector<16x48xf32>
    %321 = vector.extract_strided_slice %262 {offsets = [1, 0, 0], sizes = [1, 1, 48], strides = [1, 1, 1]} : vector<3x1x48xf32> to vector<1x1x48xf32>
    %322 = vector.shape_cast %321 : vector<1x1x48xf32> to vector<1x48xf32>
    %323 = vector.broadcast %322 : vector<1x48xf32> to vector<16x48xf32>
    %324 = arith.mulf %320, %323 : vector<16x48xf32>
    %325 = arith.addf %298, %324 : vector<16x48xf32>
    %326 = vector.extract_strided_slice %268 {offsets = [0, 2], sizes = [16, 1], strides = [1, 1]} : vector<16x3xf32> to vector<16x1xf32>
    %327 = vector.extract_strided_slice %270 {offsets = [2, 0], sizes = [1, 16], strides = [1, 1]} : vector<3x16xf32> to vector<1x16xf32>
    %328 = vector.broadcast %326 : vector<16x1xf32> to vector<16x16xf32>
    %329 = vector.broadcast %327 : vector<1x16xf32> to vector<16x16xf32>
    %330 = arith.addf %328, %329 : vector<16x16xf32>
    %cst_90 = arith.constant 0.000000e+00 : f32
    %331 = vector.broadcast %cst_90 : f32 to vector<16x16xf32>
    %332 = arith.cmpf ogt, %330, %331 : vector<16x16xf32>
    %cst_91 = arith.constant 2.000000e-01 : f32
    %333 = vector.broadcast %cst_91 : f32 to vector<16x16xf32>
    %334 = arith.mulf %333, %330 : vector<16x16xf32>
    %335 = arith.select %332, %330, %334 : vector<16x16xi1>, vector<16x16xf32>
    %336 = arith.addf %335, %5 : vector<16x16xf32>
    %cst_92 = arith.constant dense<0xFF800000> : vector<16xf32>
    %337 = vector.multi_reduction <maximumf>, %336, %cst_92 [1] : vector<16x16xf32> to vector<16xf32>
    %338 = vector.shape_cast %337 : vector<16xf32> to vector<16x1xf32>
    %339 = vector.broadcast %338 : vector<16x1xf32> to vector<16x16xf32>
    %340 = arith.subf %336, %339 : vector<16x16xf32>
    %341 = math.exp %340 : vector<16x16xf32>
    %cst_93 = arith.constant dense<0.000000e+00> : vector<16xf32>
    %342 = vector.multi_reduction <add>, %341, %cst_93 [1] : vector<16x16xf32> to vector<16xf32>
    %343 = vector.shape_cast %342 : vector<16xf32> to vector<16x1xf32>
    %344 = tpu.reciprocal %343 {approx = true} : vector<16x1xf32> -> vector<16x1xf32>
    %345 = vector.broadcast %344 : vector<16x1xf32> to vector<16x16xf32>
    %346 = arith.mulf %341, %345 : vector<16x16xf32>
    %cst_94 = arith.constant dense<0.000000e+00> : vector<16x48xf32>
    %347 = tpu.matmul %346, %267, %cst_94 {dimension_numbers = #tpu.dot_dimension_numbers<[1], [0], [0], [1], [0, 0, 1, 1], [], []>} : vector<16x16xf32>, vector<16x48xf32>, vector<16x48xf32> -> vector<16x48xf32>
    %348 = vector.extract_strided_slice %262 {offsets = [2, 0, 0], sizes = [1, 1, 48], strides = [1, 1, 1]} : vector<3x1x48xf32> to vector<1x1x48xf32>
    %349 = vector.shape_cast %348 : vector<1x1x48xf32> to vector<1x48xf32>
    %350 = vector.broadcast %349 : vector<1x48xf32> to vector<16x48xf32>
    %351 = arith.mulf %347, %350 : vector<16x48xf32>
    %352 = arith.addf %325, %351 : vector<16x48xf32>
    %cst_95 = arith.constant 0.000000e+00 : f32
    %353 = vector.broadcast %cst_95 : f32 to vector<16x48xf32>
    %354 = arith.cmpf ogt, %352, %353 : vector<16x48xf32>
    %355 = math.exp %352 : vector<16x48xf32>
    %cst_96 = arith.constant 1.000000e+00 : f32
    %356 = vector.broadcast %cst_96 : f32 to vector<16x48xf32>
    %357 = arith.subf %355, %356 : vector<16x48xf32>
    %358 = arith.select %354, %352, %357 : vector<16x48xi1>, vector<16x48xf32>
    %359 = vector.extract_strided_slice %261 {offsets = [16, 0], sizes = [16, 48], strides = [1, 1]} : vector<32x48xf32> to vector<16x48xf32>
    %360 = vector.extract_strided_slice %264 {offsets = [16, 0], sizes = [16, 3], strides = [1, 1]} : vector<32x3xf32> to vector<16x3xf32>
    %361 = vector.extract_strided_slice %266 {offsets = [16, 0], sizes = [16, 3], strides = [1, 1]} : vector<32x3xf32> to vector<16x3xf32>
    %362 = tpu.transpose %361, [1, 0] : vector<16x3xf32> -> vector<3x16xf32>
    %cst_97 = arith.constant 0.000000e+00 : f32
    %363 = vector.broadcast %cst_97 : f32 to vector<16x48xf32>
    %364 = vector.extract_strided_slice %360 {offsets = [0, 0], sizes = [16, 1], strides = [1, 1]} : vector<16x3xf32> to vector<16x1xf32>
    %365 = vector.extract_strided_slice %362 {offsets = [0, 0], sizes = [1, 16], strides = [1, 1]} : vector<3x16xf32> to vector<1x16xf32>
    %366 = vector.broadcast %364 : vector<16x1xf32> to vector<16x16xf32>
    %367 = vector.broadcast %365 : vector<1x16xf32> to vector<16x16xf32>
    %368 = arith.addf %366, %367 : vector<16x16xf32>
    %cst_98 = arith.constant 0.000000e+00 : f32
    %369 = vector.broadcast %cst_98 : f32 to vector<16x16xf32>
    %370 = arith.cmpf ogt, %368, %369 : vector<16x16xf32>
    %cst_99 = arith.constant 2.000000e-01 : f32
    %371 = vector.broadcast %cst_99 : f32 to vector<16x16xf32>
    %372 = arith.mulf %371, %368 : vector<16x16xf32>
    %373 = arith.select %370, %368, %372 : vector<16x16xi1>, vector<16x16xf32>
    %374 = arith.addf %373, %5 : vector<16x16xf32>
    %cst_100 = arith.constant dense<0xFF800000> : vector<16xf32>
    %375 = vector.multi_reduction <maximumf>, %374, %cst_100 [1] : vector<16x16xf32> to vector<16xf32>
    %376 = vector.shape_cast %375 : vector<16xf32> to vector<16x1xf32>
    %377 = vector.broadcast %376 : vector<16x1xf32> to vector<16x16xf32>
    %378 = arith.subf %374, %377 : vector<16x16xf32>
    %379 = math.exp %378 : vector<16x16xf32>
    %cst_101 = arith.constant dense<0.000000e+00> : vector<16xf32>
    %380 = vector.multi_reduction <add>, %379, %cst_101 [1] : vector<16x16xf32> to vector<16xf32>
    %381 = vector.shape_cast %380 : vector<16xf32> to vector<16x1xf32>
    %382 = tpu.reciprocal %381 {approx = true} : vector<16x1xf32> -> vector<16x1xf32>
    %383 = vector.broadcast %382 : vector<16x1xf32> to vector<16x16xf32>
    %384 = arith.mulf %379, %383 : vector<16x16xf32>
    %cst_102 = arith.constant dense<0.000000e+00> : vector<16x48xf32>
    %385 = tpu.matmul %384, %359, %cst_102 {dimension_numbers = #tpu.dot_dimension_numbers<[1], [0], [0], [1], [0, 0, 1, 1], [], []>} : vector<16x16xf32>, vector<16x48xf32>, vector<16x48xf32> -> vector<16x48xf32>
    %386 = vector.extract_strided_slice %262 {offsets = [0, 0, 0], sizes = [1, 1, 48], strides = [1, 1, 1]} : vector<3x1x48xf32> to vector<1x1x48xf32>
    %387 = vector.shape_cast %386 : vector<1x1x48xf32> to vector<1x48xf32>
    %388 = vector.broadcast %387 : vector<1x48xf32> to vector<16x48xf32>
    %389 = arith.mulf %385, %388 : vector<16x48xf32>
    %390 = arith.addf %363, %389 : vector<16x48xf32>
    %391 = vector.extract_strided_slice %360 {offsets = [0, 1], sizes = [16, 1], strides = [1, 1]} : vector<16x3xf32> to vector<16x1xf32>
    %392 = vector.extract_strided_slice %362 {offsets = [1, 0], sizes = [1, 16], strides = [1, 1]} : vector<3x16xf32> to vector<1x16xf32>
    %393 = vector.broadcast %391 : vector<16x1xf32> to vector<16x16xf32>
    %394 = vector.broadcast %392 : vector<1x16xf32> to vector<16x16xf32>
    %395 = arith.addf %393, %394 : vector<16x16xf32>
    %cst_103 = arith.constant 0.000000e+00 : f32
    %396 = vector.broadcast %cst_103 : f32 to vector<16x16xf32>
    %397 = arith.cmpf ogt, %395, %396 : vector<16x16xf32>
    %cst_104 = arith.constant 2.000000e-01 : f32
    %398 = vector.broadcast %cst_104 : f32 to vector<16x16xf32>
    %399 = arith.mulf %398, %395 : vector<16x16xf32>
    %400 = arith.select %397, %395, %399 : vector<16x16xi1>, vector<16x16xf32>
    %401 = arith.addf %400, %5 : vector<16x16xf32>
    %cst_105 = arith.constant dense<0xFF800000> : vector<16xf32>
    %402 = vector.multi_reduction <maximumf>, %401, %cst_105 [1] : vector<16x16xf32> to vector<16xf32>
    %403 = vector.shape_cast %402 : vector<16xf32> to vector<16x1xf32>
    %404 = vector.broadcast %403 : vector<16x1xf32> to vector<16x16xf32>
    %405 = arith.subf %401, %404 : vector<16x16xf32>
    %406 = math.exp %405 : vector<16x16xf32>
    %cst_106 = arith.constant dense<0.000000e+00> : vector<16xf32>
    %407 = vector.multi_reduction <add>, %406, %cst_106 [1] : vector<16x16xf32> to vector<16xf32>
    %408 = vector.shape_cast %407 : vector<16xf32> to vector<16x1xf32>
    %409 = tpu.reciprocal %408 {approx = true} : vector<16x1xf32> -> vector<16x1xf32>
    %410 = vector.broadcast %409 : vector<16x1xf32> to vector<16x16xf32>
    %411 = arith.mulf %406, %410 : vector<16x16xf32>
    %cst_107 = arith.constant dense<0.000000e+00> : vector<16x48xf32>
    %412 = tpu.matmul %411, %359, %cst_107 {dimension_numbers = #tpu.dot_dimension_numbers<[1], [0], [0], [1], [0, 0, 1, 1], [], []>} : vector<16x16xf32>, vector<16x48xf32>, vector<16x48xf32> -> vector<16x48xf32>
    %413 = vector.extract_strided_slice %262 {offsets = [1, 0, 0], sizes = [1, 1, 48], strides = [1, 1, 1]} : vector<3x1x48xf32> to vector<1x1x48xf32>
    %414 = vector.shape_cast %413 : vector<1x1x48xf32> to vector<1x48xf32>
    %415 = vector.broadcast %414 : vector<1x48xf32> to vector<16x48xf32>
    %416 = arith.mulf %412, %415 : vector<16x48xf32>
    %417 = arith.addf %390, %416 : vector<16x48xf32>
    %418 = vector.extract_strided_slice %360 {offsets = [0, 2], sizes = [16, 1], strides = [1, 1]} : vector<16x3xf32> to vector<16x1xf32>
    %419 = vector.extract_strided_slice %362 {offsets = [2, 0], sizes = [1, 16], strides = [1, 1]} : vector<3x16xf32> to vector<1x16xf32>
    %420 = vector.broadcast %418 : vector<16x1xf32> to vector<16x16xf32>
    %421 = vector.broadcast %419 : vector<1x16xf32> to vector<16x16xf32>
    %422 = arith.addf %420, %421 : vector<16x16xf32>
    %cst_108 = arith.constant 0.000000e+00 : f32
    %423 = vector.broadcast %cst_108 : f32 to vector<16x16xf32>
    %424 = arith.cmpf ogt, %422, %423 : vector<16x16xf32>
    %cst_109 = arith.constant 2.000000e-01 : f32
    %425 = vector.broadcast %cst_109 : f32 to vector<16x16xf32>
    %426 = arith.mulf %425, %422 : vector<16x16xf32>
    %427 = arith.select %424, %422, %426 : vector<16x16xi1>, vector<16x16xf32>
    %428 = arith.addf %427, %5 : vector<16x16xf32>
    %cst_110 = arith.constant dense<0xFF800000> : vector<16xf32>
    %429 = vector.multi_reduction <maximumf>, %428, %cst_110 [1] : vector<16x16xf32> to vector<16xf32>
    %430 = vector.shape_cast %429 : vector<16xf32> to vector<16x1xf32>
    %431 = vector.broadcast %430 : vector<16x1xf32> to vector<16x16xf32>
    %432 = arith.subf %428, %431 : vector<16x16xf32>
    %433 = math.exp %432 : vector<16x16xf32>
    %cst_111 = arith.constant dense<0.000000e+00> : vector<16xf32>
    %434 = vector.multi_reduction <add>, %433, %cst_111 [1] : vector<16x16xf32> to vector<16xf32>
    %435 = vector.shape_cast %434 : vector<16xf32> to vector<16x1xf32>
    %436 = tpu.reciprocal %435 {approx = true} : vector<16x1xf32> -> vector<16x1xf32>
    %437 = vector.broadcast %436 : vector<16x1xf32> to vector<16x16xf32>
    %438 = arith.mulf %433, %437 : vector<16x16xf32>
    %cst_112 = arith.constant dense<0.000000e+00> : vector<16x48xf32>
    %439 = tpu.matmul %438, %359, %cst_112 {dimension_numbers = #tpu.dot_dimension_numbers<[1], [0], [0], [1], [0, 0, 1, 1], [], []>} : vector<16x16xf32>, vector<16x48xf32>, vector<16x48xf32> -> vector<16x48xf32>
    %440 = vector.extract_strided_slice %262 {offsets = [2, 0, 0], sizes = [1, 1, 48], strides = [1, 1, 1]} : vector<3x1x48xf32> to vector<1x1x48xf32>
    %441 = vector.shape_cast %440 : vector<1x1x48xf32> to vector<1x48xf32>
    %442 = vector.broadcast %441 : vector<1x48xf32> to vector<16x48xf32>
    %443 = arith.mulf %439, %442 : vector<16x48xf32>
    %444 = arith.addf %417, %443 : vector<16x48xf32>
    %cst_113 = arith.constant 0.000000e+00 : f32
    %445 = vector.broadcast %cst_113 : f32 to vector<16x48xf32>
    %446 = arith.cmpf ogt, %444, %445 : vector<16x48xf32>
    %447 = math.exp %444 : vector<16x48xf32>
    %cst_114 = arith.constant 1.000000e+00 : f32
    %448 = vector.broadcast %cst_114 : f32 to vector<16x48xf32>
    %449 = arith.subf %447, %448 : vector<16x48xf32>
    %450 = arith.select %446, %444, %449 : vector<16x48xi1>, vector<16x48xf32>
    %451 = tpu.concatenate %358, %450 in 0 : vector<16x48xf32>, vector<16x48xf32> -> vector<32x48xf32>
    %c0_115 = arith.constant 0 : index
    %c0_116 = arith.constant 0 : index
    %452 = vector.load %arg13[%c0_115, %c0_116] : memref<48x1xf32, #tpu.memory_space<vmem>>, vector<48x1xf32>
    %cst_117 = arith.constant dense<0.000000e+00> : vector<32x1xf32>
    %453 = tpu.matmul %451, %452, %cst_117 {dimension_numbers = #tpu.dot_dimension_numbers<[1], [0], [0], [1], [0, 0, 1, 1], [], []>} : vector<32x48xf32>, vector<48x1xf32>, vector<32x1xf32> -> vector<32x1xf32>
    %c0_118 = arith.constant 0 : index
    %c0_119 = arith.constant 0 : index
    %454 = vector.load %arg14[%c0_118, %c0_119] : memref<1x1xf32, #tpu.memory_space<vmem>>, vector<1x1xf32>
    %455 = vector.broadcast %454 : vector<1x1xf32> to vector<32x1xf32>
    %456 = arith.addf %453, %455 : vector<32x1xf32>
    %c0_120 = arith.constant 0 : index
    %c0_121 = arith.constant 0 : index
    %457 = vector.load %arg0[%c0_120, %c0_121] : memref<2x16xf32, #tpu.memory_space<vmem>>, vector<2x16xf32>
    %458 = vector.extract_strided_slice %259 {offsets = [0, 0], sizes = [16, 1], strides = [1, 1]} : vector<32x1xf32> to vector<16x1xf32>
    %459 = tpu.transpose %458, [1, 0] : vector<16x1xf32> -> vector<1x16xf32>
    %460 = vector.extract_strided_slice %259 {offsets = [16, 0], sizes = [16, 1], strides = [1, 1]} : vector<32x1xf32> to vector<16x1xf32>
    %461 = tpu.transpose %460, [1, 0] : vector<16x1xf32> -> vector<1x16xf32>
    %462 = tpu.concatenate %459, %461 in 0 : vector<1x16xf32>, vector<1x16xf32> -> vector<2x16xf32>
    %463 = vector.extract_strided_slice %456 {offsets = [0, 0], sizes = [16, 1], strides = [1, 1]} : vector<32x1xf32> to vector<16x1xf32>
    %464 = tpu.transpose %463, [1, 0] : vector<16x1xf32> -> vector<1x16xf32>
    %465 = vector.extract_strided_slice %456 {offsets = [16, 0], sizes = [16, 1], strides = [1, 1]} : vector<32x1xf32> to vector<16x1xf32>
    %466 = tpu.transpose %465, [1, 0] : vector<16x1xf32> -> vector<1x16xf32>
    %467 = tpu.concatenate %464, %466 in 0 : vector<1x16xf32>, vector<1x16xf32> -> vector<2x16xf32>
    %c0_122 = arith.constant 0 : index
    %c0_123 = arith.constant 0 : index
    %c0_124 = arith.constant 0 : index
    %468 = vector.load %arg15[%c0_122, %c0_123, %c0_124] : memref<3x16x600xbf16, #tpu.memory_space<vmem>>, vector<3x16x600xbf16>
    %469 = arith.truncf %457 : vector<2x16xf32> to vector<2x16xbf16>
    %470 = vector.extract_strided_slice %468 {offsets = [0, 0, 0], sizes = [1, 16, 600], strides = [1, 1, 1]} : vector<3x16x600xbf16> to vector<1x16x600xbf16>
    %471 = vector.shape_cast %470 : vector<1x16x600xbf16> to vector<16x600xbf16>
    %cst_125 = arith.constant dense<0.000000e+00> : vector<2x600xf32>
    %472 = tpu.matmul %469, %471, %cst_125 {dimension_numbers = #tpu.dot_dimension_numbers<[1], [0], [0], [1], [0, 0, 1, 1], [], []>} : vector<2x16xbf16>, vector<16x600xbf16>, vector<2x600xf32> -> vector<2x600xf32>
    %473 = arith.truncf %462 : vector<2x16xf32> to vector<2x16xbf16>
    %474 = vector.extract_strided_slice %468 {offsets = [1, 0, 0], sizes = [1, 16, 600], strides = [1, 1, 1]} : vector<3x16x600xbf16> to vector<1x16x600xbf16>
    %475 = vector.shape_cast %474 : vector<1x16x600xbf16> to vector<16x600xbf16>
    %cst_126 = arith.constant dense<0.000000e+00> : vector<2x600xf32>
    %476 = tpu.matmul %473, %475, %cst_126 {dimension_numbers = #tpu.dot_dimension_numbers<[1], [0], [0], [1], [0, 0, 1, 1], [], []>} : vector<2x16xbf16>, vector<16x600xbf16>, vector<2x600xf32> -> vector<2x600xf32>
    %477 = arith.addf %472, %476 : vector<2x600xf32>
    %478 = arith.truncf %467 : vector<2x16xf32> to vector<2x16xbf16>
    %479 = vector.extract_strided_slice %468 {offsets = [2, 0, 0], sizes = [1, 16, 600], strides = [1, 1, 1]} : vector<3x16x600xbf16> to vector<1x16x600xbf16>
    %480 = vector.shape_cast %479 : vector<1x16x600xbf16> to vector<16x600xbf16>
    %cst_127 = arith.constant dense<0.000000e+00> : vector<2x600xf32>
    %481 = tpu.matmul %478, %480, %cst_127 {dimension_numbers = #tpu.dot_dimension_numbers<[1], [0], [0], [1], [0, 0, 1, 1], [], []>} : vector<2x16xbf16>, vector<16x600xbf16>, vector<2x600xf32> -> vector<2x600xf32>
    %482 = arith.addf %477, %481 : vector<2x600xf32>
    %c0_128 = arith.constant 0 : index
    %c0_129 = arith.constant 0 : index
    %483 = vector.load %arg16[%c0_128, %c0_129] : memref<1x600xf32, #tpu.memory_space<vmem>>, vector<1x600xf32>
    %484 = vector.broadcast %483 : vector<1x600xf32> to vector<2x600xf32>
    %485 = arith.addf %482, %484 : vector<2x600xf32>
    %cst_130 = arith.constant 0.000000e+00 : f32
    %486 = vector.broadcast %cst_130 : f32 to vector<2x600xf32>
    %487 = arith.cmpf ogt, %485, %486 : vector<2x600xf32>
    %488 = math.exp %485 : vector<2x600xf32>
    %cst_131 = arith.constant 1.000000e+00 : f32
    %489 = vector.broadcast %cst_131 : f32 to vector<2x600xf32>
    %490 = arith.subf %488, %489 : vector<2x600xf32>
    %491 = arith.select %487, %485, %490 : vector<2x600xi1>, vector<2x600xf32>
    %492 = arith.truncf %491 : vector<2x600xf32> to vector<2x600xbf16>
    %c0_132 = arith.constant 0 : index
    %c0_133 = arith.constant 0 : index
    %493 = vector.load %arg17[%c0_132, %c0_133] : memref<600x256xbf16, #tpu.memory_space<vmem>>, vector<600x256xbf16>
    %cst_134 = arith.constant dense<0.000000e+00> : vector<2x256xf32>
    %494 = tpu.matmul %492, %493, %cst_134 {dimension_numbers = #tpu.dot_dimension_numbers<[1], [0], [0], [1], [0, 0, 1, 1], [], []>} : vector<2x600xbf16>, vector<600x256xbf16>, vector<2x256xf32> -> vector<2x256xf32>
    %c0_135 = arith.constant 0 : index
    %c0_136 = arith.constant 0 : index
    %495 = vector.load %arg18[%c0_135, %c0_136] : memref<1x256xf32, #tpu.memory_space<vmem>>, vector<1x256xf32>
    %496 = vector.broadcast %495 : vector<1x256xf32> to vector<2x256xf32>
    %497 = arith.addf %494, %496 : vector<2x256xf32>
    %cst_137 = arith.constant 0.000000e+00 : f32
    %498 = vector.broadcast %cst_137 : f32 to vector<2x256xf32>
    %499 = arith.cmpf ogt, %497, %498 : vector<2x256xf32>
    %500 = math.exp %497 : vector<2x256xf32>
    %cst_138 = arith.constant 1.000000e+00 : f32
    %501 = vector.broadcast %cst_138 : f32 to vector<2x256xf32>
    %502 = arith.subf %500, %501 : vector<2x256xf32>
    %503 = arith.select %499, %497, %502 : vector<2x256xi1>, vector<2x256xf32>
    %c0_139 = arith.constant 0 : index
    %c0_140 = arith.constant 0 : index
    %504 = vector.load %arg19[%c0_139, %c0_140] : memref<256x64xf32, #tpu.memory_space<vmem>>, vector<256x64xf32>
    %cst_141 = arith.constant dense<0.000000e+00> : vector<2x64xf32>
    %505 = tpu.matmul %503, %504, %cst_141 {dimension_numbers = #tpu.dot_dimension_numbers<[1], [0], [0], [1], [0, 0, 1, 1], [], []>} : vector<2x256xf32>, vector<256x64xf32>, vector<2x64xf32> -> vector<2x64xf32>
    %c0_142 = arith.constant 0 : index
    %c0_143 = arith.constant 0 : index
    %506 = vector.load %arg20[%c0_142, %c0_143] : memref<1x64xf32, #tpu.memory_space<vmem>>, vector<1x64xf32>
    %507 = vector.broadcast %506 : vector<1x64xf32> to vector<2x64xf32>
    %508 = arith.addf %505, %507 : vector<2x64xf32>
    %cst_144 = arith.constant 0.000000e+00 : f32
    %509 = vector.broadcast %cst_144 : f32 to vector<2x64xf32>
    %510 = arith.cmpf ogt, %508, %509 : vector<2x64xf32>
    %511 = math.exp %508 : vector<2x64xf32>
    %cst_145 = arith.constant 1.000000e+00 : f32
    %512 = vector.broadcast %cst_145 : f32 to vector<2x64xf32>
    %513 = arith.subf %511, %512 : vector<2x64xf32>
    %514 = arith.select %510, %508, %513 : vector<2x64xi1>, vector<2x64xf32>
    %c0_146 = arith.constant 0 : index
    %c0_147 = arith.constant 0 : index
    %515 = vector.load %arg21[%c0_146, %c0_147] : memref<64x32xf32, #tpu.memory_space<vmem>>, vector<64x32xf32>
    %cst_148 = arith.constant dense<0.000000e+00> : vector<2x32xf32>
    %516 = tpu.matmul %514, %515, %cst_148 {dimension_numbers = #tpu.dot_dimension_numbers<[1], [0], [0], [1], [0, 0, 1, 1], [], []>} : vector<2x64xf32>, vector<64x32xf32>, vector<2x32xf32> -> vector<2x32xf32>
    %c0_149 = arith.constant 0 : index
    %c0_150 = arith.constant 0 : index
    %517 = vector.load %arg22[%c0_149, %c0_150] : memref<1x32xf32, #tpu.memory_space<vmem>>, vector<1x32xf32>
    %518 = vector.broadcast %517 : vector<1x32xf32> to vector<2x32xf32>
    %519 = arith.addf %516, %518 : vector<2x32xf32>
    %cst_151 = arith.constant 0.000000e+00 : f32
    %520 = vector.broadcast %cst_151 : f32 to vector<2x32xf32>
    %521 = arith.cmpf ogt, %519, %520 : vector<2x32xf32>
    %522 = math.exp %519 : vector<2x32xf32>
    %cst_152 = arith.constant 1.000000e+00 : f32
    %523 = vector.broadcast %cst_152 : f32 to vector<2x32xf32>
    %524 = arith.subf %522, %523 : vector<2x32xf32>
    %525 = arith.select %521, %519, %524 : vector<2x32xi1>, vector<2x32xf32>
    %c0_153 = arith.constant 0 : index
    %c0_154 = arith.constant 0 : index
    %526 = vector.load %arg23[%c0_153, %c0_154] : memref<32x2xf32, #tpu.memory_space<vmem>>, vector<32x2xf32>
    %cst_155 = arith.constant dense<0.000000e+00> : vector<2x2xf32>
    %527 = tpu.matmul %525, %526, %cst_155 {dimension_numbers = #tpu.dot_dimension_numbers<[1], [0], [0], [1], [0, 0, 1, 1], [], []>} : vector<2x32xf32>, vector<32x2xf32>, vector<2x2xf32> -> vector<2x2xf32>
    %c0_156 = arith.constant 0 : index
    %c0_157 = arith.constant 0 : index
    %528 = vector.load %arg24[%c0_156, %c0_157] : memref<1x2xf32, #tpu.memory_space<vmem>>, vector<1x2xf32>
    %529 = vector.broadcast %528 : vector<1x2xf32> to vector<2x2xf32>
    %530 = arith.addf %527, %529 : vector<2x2xf32>
    %c0_158 = arith.constant 0 : index
    %c0_159 = arith.constant 0 : index
    %531 = vector.load %arg25[%c0_158, %c0_159] : memref<2x64xf32, #tpu.memory_space<vmem>>, vector<2x64xf32>
    tpu.vector_store %arg25[%c0_158, %c0_159], %514 {strides = array<i32>} : memref<2x64xf32, #tpu.memory_space<vmem>>, vector<2x64xf32>,
    %c0_160 = arith.constant 0 : index
    %c0_161 = arith.constant 0 : index
    %532 = vector.load %arg26[%c0_160, %c0_161] : memref<2x2xf32, #tpu.memory_space<vmem>>, vector<2x2xf32>
    tpu.vector_store %arg26[%c0_160, %c0_161], %530 {strides = array<i32>} : memref<2x2xf32, #tpu.memory_space<vmem>>, vector<2x2xf32>,
    return
  }
}

</mosaic_0001>

<bundles_post_ra>
// kernel: gat_forward.1
= control target key start
LH: loop header
LB: loop body
LE: loop exit
PB: predicated region body
PF: predicated region fallthrough
CT: control target
= control target key end

     0   :  { %s7325_s0 = inlined_call_operand.vmem [shape: f32[2,16], index: 0, kind: input, shape index: {}]   ;;  %s7326_s1 = inlined_call_operand.vmem [shape: f32[32,1], index: 1, kind: input, shape index: {}]   ;;  %s7327_s2 = inlined_call_operand.vmem [shape: f32[16,16], index: 2, kind: input, shape index: {}]   ;;  %s7328_s3 = inlined_call_operand.hbm [shape: f32[1,32], index: 3, kind: input, shape index: {}]   ;;  %s7329_s4 = inlined_call_operand.vmem [shape: f32[32,4], index: 4, kind: input, shape index: {}]   ;;  %s7330_s5 = inlined_call_operand.vmem [shape: f32[32,4], index: 5, kind: input, shape index: {}]   ;;  %s7331_s6 = inlined_call_operand.hbm [shape: f32[4,1,32], index: 6, kind: input, shape index: {}]   ;;  %s7332_s7 = inlined_call_operand.vmem [shape: f32[32,48], index: 7, kind: input, shape index: {}]   ;;  %s7333_s8 = inlined_call_operand.vmem [shape: f32[48,3], index: 8, kind: input, shape index: {}]   ;;  %s7334_s9 = inlined_call_operand.vmem [shape: f32[48,3], index: 9, kind: input, shape index: {}]   ;;  %s7335_s10 = inlined_call_operand.hbm [shape: f32[3,1,48], index: 10, kind: input, shape index: {}]   ;;  %s7336_s11 = inlined_call_operand.vmem [shape: f32[32,1], index: 11, kind: input, shape index: {}]   ;;  %s7337_s12 = inlined_call_operand.<no memory space> [shape: f32[1,1], index: 12, kind: input, shape index: {}]   ;;  %s7338_s13 = inlined_call_operand.vmem [shape: f32[48,1], index: 13, kind: input, shape index: {}]   ;;  %s7339_s15 = inlined_call_operand.vmem [shape: bf16[3,16,600], index: 15, kind: input, shape index: {}]   ;;  %s7340_s16 = inlined_call_operand.hbm [shape: f32[1,600], index: 16, kind: input, shape index: {}]   ;;  %s7341_s17 = inlined_call_operand.vmem [shape: bf16[600,256], index: 17, kind: input, shape index: {}]   ;;  %s7342_s18 = inlined_call_operand.hbm [shape: f32[1,256], index: 18, kind: input, shape index: {}]   ;;  %s7343_s19 = inlined_call_operand.vmem [shape: f32[256,64], index: 19, kind: input, shape index: {}]   ;;  %s7344_s20 = inlined_call_operand.hbm [shape: f32[1,64], index: 20, kind: input, shape index: {}]   ;;  %s7345_s21 = inlined_call_operand.vmem [shape: f32[64,32], index: 21, kind: input, shape index: {}]   ;;  %s7346_s22 = inlined_call_operand.hbm [shape: f32[1,32], index: 22, kind: input, shape index: {}]   ;;  %s7347_s23 = inlined_call_operand.vmem [shape: f32[32,2], index: 23, kind: input, shape index: {}]   ;;  %s7348_s24 = inlined_call_operand.hbm [shape: f32[1,2], index: 24, kind: input, shape index: {}]   ;;  %s7349_s25 = inlined_call_operand.hbm [shape: f32[2,64], index: 25, kind: output, shape index: {0}]   ;;  %s7350_s26 = inlined_call_operand.hbm [shape: f32[2,2], index: 26, kind: output, shape index: {1}]   ;;  %s7351_s14 = inlined_call_operand.<no memory space> [shape: f32[1,1], index: 14, kind: input, shape index: {}]  }
   0x1   :  { %7362 = sst [smem:[#allocation28_spill]] %s7325_s0  ;;  %v32_v0 = vstv %s7337_s12  ;;  %v34_v1 = vstv %s7351_s14 }
   0x2   :  { %7363 = sst [smem:[#allocation29_spill]] %s7326_s1  ;;  %33 = vst [vmem:[#allocation2] sm:$0x1] %v32_v0  ;;  %35 = vst [vmem:[#allocation3] sm:$0x1] %v34_v1 }
   0x3   :  { %7364 = sst [smem:[#allocation30_spill]] %s7327_s2 }
   0x4   :  { %7365 = sst [smem:[#allocation31_spill]] %s7328_s3 }
   0x5   :  { %7366 = sst [smem:[#allocation32_spill]] %s7329_s4 }
   0x6   :  { %7367 = sst [smem:[#allocation33_spill]] %s7330_s5 }
   0x7   :  { %7368 = sst [smem:[#allocation34_spill]] %s7331_s6 }
   0x8   :  { %7369 = sst [smem:[#allocation35_spill]] %s7332_s7 }
   0x9   :  { %7370 = sst [smem:[#allocation36_spill]] %s7333_s8 }
   0xa   :  { %7371 = sst [smem:[#allocation37_spill]] %s7334_s9 }
   0xb   :  { %7372 = sst [smem:[#allocation38_spill]] %s7335_s10 }
   0xc   :  { %36 = vsyncpa [#allocation5], 0 }
   0xd   :  { %37 = vsyncpa [#allocation8], 0 }
   0xe   :  { %38 = vsyncpa [#allocation11], 0 }
   0xf   :  { %39 = vsyncpa [#allocation14], 0 }
  0x10   :  { %40 = vsyncpa [#allocation17], 0 }
  0x11   :  { %41 = vsyncpa [#allocation6], 0 }
  0x12   :  { %42 = vsyncpa [#allocation20], 0  ;;  %s5948_s8 = smov [#allocation7]   ;;  %s7373_s9 = sld [smem:[#allocation34_spill]] }
  0x13   :  { %s68_s4 = sshll.u32 %s5948_s8, 4  ;;  %s69_s4 = int_to_ptr.vmem [resolvable:$true] %s68_s4 }
  0x18   :  { %s5714_s12 = scalar_lea.hbm %s7373_s9, 64 }
  0x19   :  { %p5715_p0 = scmp.ne.s32.totalorder %s7373_s9, %s5714_s12  ;;  %p5718_p1 = scmp.lt.u32.totalorder %s5714_s12, %s7373_s9 }
  0x1b   :  { %p5720_p2 = pnand %p5718_p1, %p5715_p0 }
  0x1d   :  { %5723 = shalt.err (!%p5720_p2)
}
  0x1e   :  { %s5724_s10 = scalar_lea.vmem %s69_s4, 64  ;;  %p5729_p4 = scmp.lt.s32.totalorder %s69_s4, %s69_s4 }
  0x1f   :  { %p5725_p3 = scmp.ne.s32.totalorder %s69_s4, %s5724_s10  ;;  %p5730_p5 = scmp.lt.s32.totalorder %s5724_s10, %s5724_s10 }
  0x21   :  { %p5731_p6 = por %p5730_p5, %p5729_p4 }
  0x23   :  { %p5732_p7 = pnand %p5731_p6, %p5725_p3 }
  0x25   :  { %5735 = shalt.err (!%p5732_p7)
}
  0x26   :  { %s5949_s6 = smov 16   ;;  %s5950_s1 = smov 1  }
  0x27   :  { %74 = dma.hbm_to_vmem [thread:$0]  %s7373_s9, 64, %s69_s4, [#allocation8], %s5949_s6, %s5949_s6, %s5950_s1  }
  0x28   :  { %s5951_s7 = smov [#allocation10]   ;;  %s5952_s8 = smov [#allocation13]  }
  0x29   :  { %s109_s28 = sshll.u32 %s5951_s7, 4  ;;  %s133_s29 = sshll.u32 %s5952_s8, 4  ;;  %s110_s28 = int_to_ptr.vmem [resolvable:$true] %s109_s28  ;;  %s134_s29 = int_to_ptr.vmem [resolvable:$true] %s133_s29 }
  0x2a   :  { %s5736_s30 = scalar_lea.hbm %s7340_s16, 80 }
  0x2b   :  { %p5737_p8 = scmp.ne.s32.totalorder %s7340_s16, %s5736_s30  ;;  %p5740_p9 = scmp.lt.u32.totalorder %s5736_s30, %s7340_s16 }
  0x2d   :  { %p5742_p10 = pnand %p5740_p9, %p5737_p8 }
  0x2f   :  { %5745 = shalt.err (!%p5742_p10)
}
  0x30   :  { %s5746_s4 = scalar_lea.vmem %s110_s28, 80  ;;  %s5750_s9 = scalar_lea.vmem %s110_s28, 96 }
  0x31   :  { %p5747_p11 = scmp.ne.s32.totalorder %s110_s28, %s5746_s4  ;;  %p5751_p12 = scmp.lt.s32.totalorder %s110_s28, %s110_s28 }
  0x32   :  { %p5752_p13 = scmp.lt.s32.totalorder %s5750_s9, %s5746_s4 }
  0x34   :  { %p5753_p0 = por %p5752_p13, %p5751_p12 }
  0x36   :  { %p5754_p1 = pnand %p5753_p0, %p5747_p11 }
  0x38   :  { %5757 = shalt.err (!%p5754_p1)
}
  0x39   :  { %112 = dma.hbm_to_vmem [thread:$0]  %s7340_s16, 80, %s110_s28, [#allocation11]  }
  0x3a   :  { %s5758_s0 = scalar_lea.hbm %s7344_s20, 16 }
  0x3b   :  { %p5759_p2 = scmp.ne.s32.totalorder %s7344_s20, %s5758_s0  ;;  %p5762_p3 = scmp.lt.u32.totalorder %s5758_s0, %s7344_s20 }
  0x3d   :  { %p5764_p4 = pnand %p5762_p3, %p5759_p2 }
  0x3f   :  { %5767 = shalt.err (!%p5764_p4)
}
  0x40   :  { %s5768_s5 = scalar_lea.vmem %s134_s29, 16  ;;  %s5772_s10 = scalar_lea.vmem %s134_s29, 32 }
  0x41   :  { %p5769_p5 = scmp.ne.s32.totalorder %s134_s29, %s5768_s5  ;;  %p5773_p6 = scmp.lt.s32.totalorder %s134_s29, %s134_s29 }
  0x42   :  { %p5774_p7 = scmp.lt.s32.totalorder %s5772_s10, %s5768_s5 }
  0x44   :  { %p5775_p8 = por %p5774_p7, %p5773_p6 }
  0x46   :  { %p5776_p9 = pnand %p5775_p8, %p5769_p5 }
  0x48   :  { %5779 = shalt.err (!%p5776_p9)
}
  0x49   :  { %136 = dma.hbm_to_vmem [thread:$0]  %s7344_s20, 16, %s134_s29, [#allocation14]  }
  0x4a   :  { %s5953_s4 = smov [#allocation4]   ;;  %s5954_s27 = smov [#allocation9]  }
  0x4b   :  { %s55_s9 = sshll.u32 %s5953_s4, 4  ;;  %s86_s3 = sshll.u32 %s5954_s27, 4  ;;  %s56_s9 = int_to_ptr.vmem [resolvable:$true] %s55_s9  ;;  %s87_s3 = int_to_ptr.vmem [resolvable:$true] %s86_s3 }
  0x4c   :  { %s7374_s0 = sld [smem:[#allocation31_spill]] }
  0x52   :  { %s5780_s12 = scalar_lea.hbm %s7374_s0, 16 }
  0x53   :  { %p5781_p10 = scmp.ne.s32.totalorder %s7374_s0, %s5780_s12  ;;  %p5784_p11 = scmp.lt.u32.totalorder %s5780_s12, %s7374_s0 }
  0x55   :  { %p5786_p12 = pnand %p5784_p11, %p5781_p10 }
  0x57   :  { %5789 = shalt.err (!%p5786_p12)
}
  0x58   :  { %s5790_s20 = scalar_lea.vmem %s56_s9, 16  ;;  %s5794_s29 = scalar_lea.vmem %s56_s9, 32 }
  0x59   :  { %p5791_p13 = scmp.ne.s32.totalorder %s56_s9, %s5790_s20  ;;  %p5795_p0 = scmp.lt.s32.totalorder %s56_s9, %s56_s9 }
  0x5a   :  { %p5796_p1 = scmp.lt.s32.totalorder %s5794_s29, %s5790_s20 }
  0x5c   :  { %p5797_p2 = por %p5796_p1, %p5795_p0 }
  0x5e   :  { %p5798_p3 = pnand %p5797_p2, %p5791_p13 }
  0x60   :  { %5801 = shalt.err (!%p5798_p3)
}
  0x61   :  { %58 = dma.hbm_to_vmem [thread:$0]  %s7374_s0, 16, %s56_s9, [#allocation5]  }
  0x62   :  { %s7375_s27 = sld [smem:[#allocation38_spill]] }
  0x68   :  { %s5802_s7 = scalar_lea.hbm %s7375_s27, 48 }
  0x69   :  { %p5803_p4 = scmp.ne.s32.totalorder %s7375_s27, %s5802_s7  ;;  %p5806_p5 = scmp.lt.u32.totalorder %s5802_s7, %s7375_s27 }
  0x6b   :  { %p5808_p6 = pnand %p5806_p5, %p5803_p4 }
  0x6d   :  { %5811 = shalt.err (!%p5808_p6)
}
  0x6e   :  { %s5812_s14 = scalar_lea.vmem %s87_s3, 48  ;;  %s5816_s5 = scalar_lea.vmem %s87_s3, 64 }
  0x6f   :  { %p5813_p7 = scmp.ne.s32.totalorder %s87_s3, %s5812_s14  ;;  %p5817_p8 = scmp.lt.s32.totalorder %s87_s3, %s87_s3 }
  0x70   :  { %p5818_p9 = scmp.lt.s32.totalorder %s5816_s5, %s5812_s14 }
  0x72   :  { %p5819_p10 = por %p5818_p9, %p5817_p8 }
  0x74   :  { %p5820_p11 = pnand %p5819_p10, %p5813_p7 }
  0x76   :  { %5823 = shalt.err (!%p5820_p11)
}
  0x77   :  { %92 = dma.hbm_to_vmem [thread:$0]  %s7375_s27, 48, %s87_s3, [#allocation8], %s5949_s6, %s5949_s6, %s5950_s1  }
  0x78   :  { %s5955_s20 = smov [#allocation12]   ;;  %s5956_s10 = smov [#allocation15]  }
  0x79   :  { %s121_s29 = sshll.u32 %s5955_s20, 4  ;;  %s145_s16 = sshll.u32 %s5956_s10, 4  ;;  %s122_s29 = int_to_ptr.vmem [resolvable:$true] %s121_s29  ;;  %s146_s16 = int_to_ptr.vmem [resolvable:$true] %s145_s16 }
  0x7a   :  { %s5824_s7 = scalar_lea.hbm %s7342_s18, 32 }
  0x7b   :  { %p5825_p12 = scmp.ne.s32.totalorder %s7342_s18, %s5824_s7  ;;  %p5828_p13 = scmp.lt.u32.totalorder %s5824_s7, %s7342_s18 }
  0x7d   :  { %p5830_p0 = pnand %p5828_p13, %p5825_p12 }
  0x7f   :  { %5833 = shalt.err (!%p5830_p0)
}
  0x80   :  { %s5834_s6 = scalar_lea.vmem %s122_s29, 32  ;;  %p5839_p2 = scmp.lt.s32.totalorder %s122_s29, %s122_s29 }
  0x81   :  { %p5835_p1 = scmp.ne.s32.totalorder %s122_s29, %s5834_s6  ;;  %p5840_p3 = scmp.lt.s32.totalorder %s5834_s6, %s5834_s6 }
  0x83   :  { %p5841_p4 = por %p5840_p3, %p5839_p2 }
  0x85   :  { %p5842_p5 = pnand %p5841_p4, %p5835_p1 }
  0x87   :  { %5845 = shalt.err (!%p5842_p5)
}
  0x88   :  { %124 = dma.hbm_to_vmem [thread:$0]  %s7342_s18, 32, %s122_s29, [#allocation11]  }
  0x89   :  { %s5846_s5 = scalar_lea.hbm %s7346_s22, 16 }
  0x8a   :  { %p5847_p6 = scmp.ne.s32.totalorder %s7346_s22, %s5846_s5  ;;  %p5850_p7 = scmp.lt.u32.totalorder %s5846_s5, %s7346_s22 }
  0x8c   :  { %p5852_p8 = pnand %p5850_p7, %p5847_p6 }
  0x8e   :  { %5855 = shalt.err (!%p5852_p8)
}
  0x8f   :  { %s5856_s28 = scalar_lea.vmem %s146_s16, 16  ;;  %s5860_s4 = scalar_lea.vmem %s146_s16, 32 }
  0x90   :  { %p5857_p9 = scmp.ne.s32.totalorder %s146_s16, %s5856_s28  ;;  %p5861_p10 = scmp.lt.s32.totalorder %s146_s16, %s146_s16 }
  0x91   :  { %p5862_p11 = scmp.lt.s32.totalorder %s5860_s4, %s5856_s28 }
  0x93   :  { %p5863_p12 = por %p5862_p11, %p5861_p10 }
  0x95   :  { %p5864_p13 = pnand %p5863_p12, %p5857_p9 }
  0x97   :  { %5867 = shalt.err (!%p5864_p13)
}
  0x98   :  { %148 = dma.hbm_to_vmem [thread:$0]  %s7346_s22, 16, %s146_s16, [#allocation14]  }
  0x99   :  { %s5957_s7 = smov [#allocation16]   ;;  %s5868_s2 = scalar_lea.hbm %s7348_s24, 16 }
  0x9a   :  { %s157_s8 = sshll.u32 %s5957_s7, 4  ;;  %p5869_p0 = scmp.ne.s32.totalorder %s7348_s24, %s5868_s2  ;;  %s158_s8 = int_to_ptr.vmem [resolvable:$true] %s157_s8 }
  0x9b   :  { %p5872_p1 = scmp.lt.u32.totalorder %s5868_s2, %s7348_s24 }
  0x9d   :  { %p5874_p2 = pnand %p5872_p1, %p5869_p0 }
  0x9f   :  { %5877 = shalt.err (!%p5874_p2)
}
  0xa0   :  { %s5878_s14 = scalar_lea.vmem %s158_s8, 16  ;;  %s5882_s22 = scalar_lea.vmem %s158_s8, 32 }
  0xa1   :  { %p5879_p3 = scmp.ne.s32.totalorder %s158_s8, %s5878_s14  ;;  %p5883_p4 = scmp.lt.s32.totalorder %s158_s8, %s158_s8 }
  0xa2   :  { %p5884_p5 = scmp.lt.s32.totalorder %s5882_s22, %s5878_s14 }
  0xa4   :  { %p5885_p6 = por %p5884_p5, %p5883_p4 }
  0xa6   :  { %p5886_p7 = pnand %p5885_p6, %p5879_p3 }
  0xa8   :  { %5889 = shalt.err (!%p5886_p7)
}
  0xa9   :  { %160 = dma.hbm_to_vmem [thread:$0]  %s7348_s24, 16, %s158_s8, [#allocation17]  }
  0xaa   :  { %5934 = dma.done.wait [#allocation5], 16  }
  0xab   :  { %5935 = vsyncadd [#allocation5], 4294967280 }
  0xac   :  { %5936 = dma.done.wait [#allocation8], 112  }
  0xad   :  { %5937 = vsyncadd [#allocation8], 4294967184 }
  0xae   :  { %5938 = dma.done.wait [#allocation11], 112  }
  0xaf   :  { %5939 = vsyncadd [#allocation11], 4294967184 }
  0xb0   :  { %5940 = dma.done.wait [#allocation14], 32  }
  0xb1   :  { %5941 = vsyncadd [#allocation14], 4294967264 }
  0xb2   :  { %5942 = dma.done.wait [#allocation17], 16  }
  0xb3   :  { %5943 = vsyncadd [#allocation17], 4294967280  ;;  %v5958_v2 = vmov 0   ;;  %s7376_s20 = sld [smem:[#allocation29_spill]]  ;;  %s7377_s7 = sld [smem:[#allocation32_spill]]  ;;  %v5959_v19 = vmov 2   ;;  %v464_v55 = vlaneseq }
  0xb4   :  { %5387 = vset.pattern.permute.xlu0 %v5958_v2  ;;  %5388 = vset.pattern.permute.xlu1 %v5958_v2  ;;  %s7378_s3 = sld [smem:[#allocation33_spill]]  ;;  %v4566_v20 = vld [vmem:[#allocation4] ss:$0 sm:$0xff]  ;;  %vm235_vm0 = vcmask 261120   ;;  %v5960_v35 = vmov 1   ;;  %v5961_v40 = vmov 3  }
  0xb5   :  { %v6289_v56 = vshrl.u32 %v464_v55, 7  ;;  %s7379_s18 = sld [smem:[#allocation30_spill]]  ;;  %vm478_vm8 = vcmask 130048   ;;  %s7382_s12 = sld [smem:[#allocation37_spill]] }
  0xb6   :  { %s7383_s2 = sld [smem:[#allocation28_spill]] }
  0xb7   :  { %v6302_v61 = vsub.s32 0, %v6289_v56  ;;  %v6305_v62 = vsub.s32 1, %v6289_v56  ;;  %v6308_v63 = vsub.s32 2, %v6289_v56  ;;  %v6311_v0 = vsub.s32 3, %v6289_v56 }
  0xb9   :  { %v192_v3 = vld [vmem:[%s7376_s20] sm:$0xff]  ;;  %v194_v4 = vld [vmem:[%s7376_s20 + $0x10] sm:$0xff]  ;;  %v193_v5 = vld [vmem:[%s7376_s20 + $0x8] sm:$0xff] }
  0xba   :  { %199 = vperm.xlu0 %5387, %v192_v3   ;;  %209 = vperm.xlu1 %5388, %v194_v4   ;;  %v231_v6 = vld [vmem:[%s7377_s7] sm:$0xff]  ;;  %v232_v7 = vld [vmem:[%s7377_s7 + $0x8] sm:$0xff]  ;;  %v195_v8 = vld [vmem:[%s7376_s20 + $0x18] sm:$0xff] }
  0xbb   :  { %v5185_v9 = vpack.c.bf16 %v232_v7, %v231_v6  ;;  %v333_v10 = vld [vmem:[%s7378_s3] sm:$0xff]  ;;  %v334_v11 = vld [vmem:[%s7378_s3 + $0x8] sm:$0xff]  ;;  %v233_v13 = vld [vmem:[%s7377_s7 + $0x10] sm:$0xff] }
  0xbc   :  { %v5193_v12 = vpack.c.bf16 %v334_v11, %v333_v10  ;;  %v234_v14 = vld [vmem:[%s7377_s7 + $0x18] sm:$0xff]  ;;  %v335_v15 = vld [vmem:[%s7378_s3 + $0x10] sm:$0xff]  ;;  %v187_v59 = vld [vmem:[%s7379_s18 + $0x8] sm:$0xff] }
  0xbd   :  { %5186 = vmatprep.subr.bf16.mxu0 %v5185_v9  ;;  %v5189_v16 = vpack.c.bf16 %v234_v14, %v233_v13  ;;  %v336_v17 = vld [vmem:[%s7378_s3 + $0x18] sm:$0xff]  ;;  %v186_v60 = vld [vmem:[%s7379_s18] sm:$0xff]  ;;  %vm189_vm1 = vcmp.gt.f32.partialorder %v187_v59, 0.0  ;;  %s7380_s3 = sld [smem:[#allocation35_spill]]  ;;  %s7381_s18 = sld [smem:[#allocation36_spill]] }
  0xbe   :  { %204 = vperm.xlu0 %5387, %v193_v5   ;;  %214 = vperm.xlu1 %5388, %v195_v8   ;;  %v5197_v18 = vpack.c.bf16 %v336_v17, %v335_v15  ;;  %vm188_vm2 = vcmp.gt.f32.partialorder %v186_v60, 0.0 }
  0xbf   :  { %5194 = vmatprep.subr.bf16.mxu1 %v5193_v12  ;;  %5188 = vmatpush3.bf16.msra.mxu0 %v5185_v9  ;;  %v5962_v9 = vmov -9e+15  }
  0xc0   :  { %5196 = vmatpush3.bf16.msra.mxu1 %v5193_v12  ;;  %5190 = vmatprep.subr.bf16.mxu0 %v5189_v16  ;;  %v6321_v10 = vsel %vm189_vm1, 0.0, %v5962_v9  ;;  %v6323_v11 = vsel %vm188_vm2, 0.0, %v5962_v9 }
  0xc1   :  { %5198 = vmatprep.subr.bf16.mxu1 %v5197_v18 }
  0xc2   :  { %5390 = vset.pattern.permute.xlu0 %v5959_v19 }
  0xc3   :  { %5192 = vmatpush3.bf16.msra.mxu0 %v5189_v16 }
  0xc4   :  { %5200 = vmatpush3.bf16.msra.mxu1 %v5197_v18 }
 0x139   :  { %v200_v21 = vpop.permute.xlu0 %199  ;;  %v210_v22 = vpop.permute.xlu1 %209 }
 0x13a   :  { %v223_v23 = vmul.f32 %v4566_v20, %v200_v21  ;;  %v225_v25 = vmul.f32 %v4566_v20, %v210_v22 }
 0x13c   :  { %4937 = vmatprep.mubr.msk.f32.mxu0 %vm235_vm0, %v223_v23  ;;  %4951 = vmatprep.mubr.msk.f32.mxu1 %vm235_vm0, %v223_v23 }
 0x13d   :  { %v205_v24 = vpop.permute.xlu0 %204  ;;  %v215_v26 = vpop.permute.xlu1 %214 }
 0x13e   :  { %v224_v27 = vmul.f32 %v4566_v20, %v205_v24  ;;  %v226_v28 = vmul.f32 %v4566_v20, %v215_v26 }
 0x140   :  { %v6252_v29 = vpack.c.bf16 %v224_v27, %v223_v23  ;;  %4938 = vmatmul.mubr.msk.f32.vlgmr.msra.gmra.mrb[0].mxu0 %vm235_vm0, %v224_v27  ;;  %4952 = vmatmul.mubr.msk.f32.vlgmr.msra.gmra.mrb[0].mxu1 %vm235_vm0, %v224_v27  ;;  %v6256_v30 = vpack.c.bf16 %v226_v28, %v225_v25 }
 0x141   :  { %4940 = vmatprep.mubr.msk.f32.mxu0 %vm235_vm0, %v225_v25  ;;  %4954 = vmatprep.mubr.msk.f32.mxu1 %vm235_vm0, %v225_v25 }
 0x142   :  { %5202 = vmatprep.subr.bf16.mxu0 %v6252_v29  ;;  %5206 = vmatprep.subr.bf16.mxu1 %v6252_v29 }
 0x143   :  { %5204 = vmatpush3.bf16.msra.mxu0 %v6252_v29  ;;  %5208 = vmatpush3.bf16.msra.mxu1 %v6252_v29 }
 0x144   :  { %5210 = vmatprep.subr.bf16.mxu0 %v6252_v29  ;;  %5214 = vmatprep.subr.bf16.mxu1 %v6252_v29 }
 0x145   :  { %4941 = vmatmul.mubr.msk.f32.gmra.mrb[2].mxu0 %vm235_vm0, %v226_v28  ;;  %4955 = vmatmul.mubr.msk.f32.gmra.mrb[2].mxu1 %vm235_vm0, %v226_v28 }
 0x213   :  { %v4939_v31 = vpop.f32.mrb[0].mxu0  ;;  %v4953_v32 = vpop.f32.mrb[0].mxu1 }
 0x214   :  { %v403_v33 = vpop.f32.mrb[1].mxu1  ;;  %732 = vperm.xlu0 %5390, %v4939_v31   ;;  %461 = vperm.xlu1 %5388, %v4939_v31   ;;  %v314_v34 = vpop.f32.mrb[1].mxu0 }
 0x218   :  { %5392 = vset.pattern.permute.xlu0 %v5958_v2  ;;  %5389 = vset.pattern.permute.xlu1 %v5960_v35  ;;  %v4942_v36 = vpop.f32.mrb[2].mxu0  ;;  %v4956_v37 = vpop.f32.mrb[2].mxu1 }
 0x219   :  { %597 = vperm.xlu1 %5389, %v4939_v31   ;;  %456 = vperm.xlu0 %5392, %v314_v34   ;;  %v324_v38 = vpop.f32.mrb[3].mxu0  ;;  %v413_v39 = vpop.f32.mrb[3].mxu1 }
 0x21d   :  { %5391 = vset.pattern.permute.xlu1 %v5961_v40  ;;  %5393 = vset.pattern.permute.xlu0 %v5960_v35 }
 0x21e   :  { %867 = vperm.xlu1 %5391, %v4939_v31   ;;  %593 = vperm.xlu0 %5393, %v314_v34  }
 0x222   :  { %5394 = vset.pattern.permute.xlu1 %v5959_v19  ;;  %1175 = vperm.xlu0 %5393, %v4942_v36  }
 0x223   :  { %728 = vperm.xlu1 %5394, %v314_v34  }
 0x226   :  { %5399 = vset.pattern.permute.xlu0 %v5958_v2 }
 0x227   :  { %5395 = vset.pattern.permute.xlu1 %v5961_v40  ;;  %1041 = vperm.xlu0 %5399, %v324_v38  }
 0x228   :  { %863 = vperm.xlu1 %5395, %v314_v34  }
 0x22b   :  { %5402 = vset.pattern.permute.xlu0 %v5961_v40 }
 0x22c   :  { %5396 = vset.pattern.permute.xlu1 %v5958_v2  ;;  %1429 = vperm.xlu0 %5402, %v324_v38  }
 0x22d   :  { %1046 = vperm.xlu1 %5396, %v4942_v36  }
 0x231   :  { %5397 = vset.pattern.permute.xlu1 %v5959_v19 }
 0x232   :  { %1304 = vperm.xlu1 %5397, %v4942_v36  }
 0x236   :  { %5398 = vset.pattern.permute.xlu1 %v5961_v40 }
 0x237   :  { %1433 = vperm.xlu1 %5398, %v4942_v36  }
 0x23b   :  { %5400 = vset.pattern.permute.xlu1 %v5960_v35 }
 0x23c   :  { %1171 = vperm.xlu1 %5400, %v324_v38  }
 0x240   :  { %5401 = vset.pattern.permute.xlu1 %v5959_v19 }
 0x241   :  { %1300 = vperm.xlu1 %5401, %v324_v38  }
 0x24a   :  { %1007 = vxpose.xlu0.b32.start [1/2] (short) (narrow) %v413_v39, 8 }
 0x24e   :  { %1008 = vxpose.xlu0.b32.end [2/2] (short) (narrow) %v4956_v37, 8 }
 0x26a   :  { %422 = vxpose.xlu1.b32.start [1/2] (short) (narrow) %v403_v33, 8 }
 0x26e   :  { %423 = vxpose.xlu1.b32.end [2/2] (short) (narrow) %v4953_v32, 8 }
 0x277   :  { %5406 = vset.pattern.permute.xlu0 %v5958_v2 }
 0x28c   :  { %5403 = vset.pattern.permute.xlu1 %v5958_v2 }
 0x293   :  { %v462_v41 = vpop.permute.xlu1 %461  ;;  %v733_v46 = vpop.permute.xlu0 %732 }
 0x298   :  { %v598_v42 = vpop.permute.xlu1 %597  ;;  %v457_v48 = vpop.permute.xlu0 %456 }
 0x29d   :  { %v868_v43 = vpop.permute.xlu1 %867  ;;  %v594_v50 = vpop.permute.xlu0 %593 }
 0x2a1   :  { %v6283_v51 = vpop.permute.xlu0 %1175 }
 0x2a2   :  { %v729_v44 = vpop.permute.xlu1 %728 }
 0x2a6   :  { %v1042_v53 = vpop.permute.xlu0 %1041 }
 0x2a7   :  { %v864_v45 = vpop.permute.xlu1 %863 }
 0x2ab   :  { %v6291_v57 = vpop.permute.xlu0 %1429 }
 0x2ac   :  { %v6279_v47 = vpop.permute.xlu1 %1046 }
 0x2b1   :  { %v6281_v49 = vpop.permute.xlu1 %1304 }
 0x2b6   :  { %v6285_v52 = vpop.permute.xlu1 %1433 }
 0x2bb   :  { %v6287_v54 = vpop.permute.xlu1 %1171 }
 0x2c0   :  { %v6293_v58 = vpop.permute.xlu1 %1300 }
 0x2ca   :  { %v6313_v1 = vpop.trf.xlu0 }
 0x2cb   :  { %v1052_v8 = vrot.slane %v6313_v1, %v6302_v61  ;;  %v1181_v34 = vrot.slane %v6313_v1, %v6305_v62  ;;  %v1310_v55 = vrot.slane %v6313_v1, %v6308_v63 }
 0x2ea   :  { %v438_v3 = vpop.trf.xlu1 }
 0x2eb   :  { %v467_v4 = vrot.slane %v438_v3, %v6302_v61  ;;  %v603_v5 = vrot.slane %v438_v3, %v6305_v62  ;;  %v738_v6 = vrot.slane %v438_v3, %v6308_v63  ;;  %v873_v7 = vrot.slane %v438_v3, %v6311_v0 }
 0x2ed   :  { %v468_v12 = vadd.f32 %v467_v4, %v457_v48  ;;  %v469_v13 = vadd.f32 %v467_v4, %v462_v41  ;;  %v604_v14 = vadd.f32 %v603_v5, %v594_v50  ;;  %v605_v15 = vadd.f32 %v603_v5, %v598_v42 }
 0x2ee   :  { %v739_v16 = vadd.f32 %v738_v6, %v729_v44  ;;  %v740_v17 = vadd.f32 %v738_v6, %v733_v46  ;;  %v874_v18 = vadd.f32 %v873_v7, %v864_v45  ;;  %v875_v20 = vadd.f32 %v873_v7, %v868_v43 }
 0x2ef   :  { %vm471_vm3 = vcmp.gt.f32.partialorder %v469_v13, 0.0  ;;  %v473_v21 = vmul.f32 0.2, %v469_v13  ;;  %vm470_vm4 = vcmp.gt.f32.partialorder %v468_v12, 0.0  ;;  %v472_v22 = vmul.f32 0.2, %v468_v12 }
 0x2f0   :  { %vm607_vm5 = vcmp.gt.f32.partialorder %v605_v15, 0.0  ;;  %v609_v23 = vmul.f32 0.2, %v605_v15  ;;  %vm606_vm6 = vcmp.gt.f32.partialorder %v604_v14, 0.0  ;;  %v608_v24 = vmul.f32 0.2, %v604_v14 }
 0x2f1   :  { %v475_v25 = vsel %vm471_vm3, %v469_v13, %v473_v21  ;;  %v474_v26 = vsel %vm470_vm4, %v468_v12, %v472_v22  ;;  %vm742_vm7 = vcmp.gt.f32.partialorder %v740_v17, 0.0  ;;  %v744_v27 = vmul.f32 0.2, %v740_v17 }
 0x2f2   :  { %v6326_v28 = vadd.f32 %v475_v25, %v6321_v10  ;;  %v6329_v31 = vadd.f32 %v474_v26, %v6323_v11  ;;  %v611_v32 = vsel %vm607_vm5, %v605_v15, %v609_v23  ;;  %v610_v33 = vsel %vm606_vm6, %v604_v14, %v608_v24 }
 0x2f3   :  { %v6334_v36 = vadd.f32 %v611_v32, %v6321_v10  ;;  %vm741_vm9 = vcmp.gt.f32.partialorder %v739_v16, 0.0  ;;  %v6341_v39 = vadd.f32 %v610_v33, %v6323_v11  ;;  %v743_v40 = vmul.f32 0.2, %v739_v16 }
 0x2f4   :  { %v482_v37 = vsel %vm478_vm8, %v6326_v28, -inf  ;;  %v479_v38 = vsel %vm478_vm8, %v6329_v31, -inf  ;;  %v1053_v41 = vadd.f32 %v1052_v8, %v1042_v53  ;;  %v1054_v42 = vadd.f32 %v1052_v8, %v6279_v47 }
 0x2f5   :  { %483 = vmax.xlane.f32.xlu1 %v482_v37  ;;  %480 = vmax.xlane.f32.xlu0 %v479_v38  ;;  %v746_v43 = vsel %vm742_vm7, %v740_v17, %v744_v27  ;;  %v879_v44 = vmul.f32 0.2, %v875_v20  ;;  %v745_v45 = vsel %vm741_vm9, %v739_v16, %v743_v40  ;;  %vm877_vm10 = vcmp.gt.f32.partialorder %v875_v20, 0.0 }
 0x2f6   :  { %vm876_vm11 = vcmp.gt.f32.partialorder %v874_v18, 0.0  ;;  %v878_v46 = vmul.f32 0.2, %v874_v18  ;;  %v1182_v48 = vadd.f32 %v1181_v34, %v6287_v54  ;;  %v1183_v50 = vadd.f32 %v1181_v34, %v6283_v51 }
 0x2f7   :  { %v617_v53 = vsel %vm478_vm8, %v6334_v36, -inf  ;;  %v614_v47 = vsel %vm478_vm8, %v6341_v39, -inf  ;;  %v6354_v59 = vadd.f32 %v746_v43, %v6321_v10  ;;  %v6357_v60 = vadd.f32 %v745_v45, %v6323_v11 }
 0x2f8   :  { %v881_v54 = vsel %vm877_vm10, %v875_v20, %v879_v44  ;;  %v880_v3 = vsel %vm876_vm11, %v874_v18, %v878_v46  ;;  %v1058_v51 = vmul.f32 0.2, %v1054_v42  ;;  %v1057_v4 = vmul.f32 0.2, %v1053_v41 }
 0x2f9   :  { %618 = vmax.xlane.f32.xlu1 %v617_v53  ;;  %615 = vmax.xlane.f32.xlu0 %v614_v47  ;;  %vm1056_vm12 = vcmp.gt.f32.partialorder %v1054_v42, 0.0  ;;  %vm1055_vm13 = vcmp.gt.f32.partialorder %v1053_v41, 0.0  ;;  %v1311_v5 = vadd.f32 %v1310_v55, %v6293_v58  ;;  %v1312_v6 = vadd.f32 %v1310_v55, %v6281_v49 }
 0x2fa   :  { %v1439_v7 = vrot.slane %v6313_v1, %v6311_v0  ;;  %v752_v8 = vsel %vm478_vm8, %v6354_v59, -inf  ;;  %v749_v9 = vsel %vm478_vm8, %v6357_v60, -inf  ;;  %v6368_v12 = vadd.f32 %v881_v54, %v6321_v10 }
 0x2fb   :  { %v6371_v13 = vadd.f32 %v880_v3, %v6323_v11  ;;  %v1060_v58 = vsel %vm1056_vm12, %v1054_v42, %v1058_v51  ;;  %v1059_v14 = vsel %vm1055_vm13, %v1053_v41, %v1057_v4  ;;  %v1187_v49 = vmul.f32 0.2, %v1183_v50 }
 0x2fc   :  { %v1186_v15 = vmul.f32 0.2, %v1182_v48  ;;  %vm1185_vm14 = vcmp.gt.f32.partialorder %v1183_v50, 0.0  ;;  %vm1184_vm15 = vcmp.gt.f32.partialorder %v1182_v48, 0.0  ;;  %v1440_v1 = vadd.f32 %v1439_v7, %v6291_v57 }
 0x2fd   :  { %753 = vmax.xlane.f32.xlu1 %v752_v8  ;;  %750 = vmax.xlane.f32.xlu0 %v749_v9  ;;  %v1441_v16 = vadd.f32 %v1439_v7, %v6285_v52  ;;  %v887_v17 = vsel %vm478_vm8, %v6368_v12, -inf  ;;  %v884_v18 = vsel %vm478_vm8, %v6371_v13, -inf  ;;  %v6380_v20 = vadd.f32 %v1060_v58, %v6321_v10 }
 0x2fe   :  { %v6383_v21 = vadd.f32 %v1059_v14, %v6323_v11  ;;  %v1189_v22 = vsel %vm1185_vm14, %v1183_v50, %v1187_v49  ;;  %v1188_v23 = vsel %vm1184_vm15, %v1182_v48, %v1186_v15  ;;  %v1316_v24 = vmul.f32 0.2, %v1312_v6 }
 0x2ff   :  { %v1315_v57 = vmul.f32 0.2, %v1311_v5  ;;  %vm1314_vm1 = vcmp.gt.f32.partialorder %v1312_v6, 0.0  ;;  %vm1313_vm2 = vcmp.gt.f32.partialorder %v1311_v5, 0.0  ;;  %v1066_v52 = vsel %vm478_vm8, %v6380_v20, -inf }
 0x300   :  { %v1063_v25 = vsel %vm478_vm8, %v6383_v21, -inf  ;;  %v6390_v26 = vadd.f32 %v1189_v22, %v6321_v10  ;;  %v6393_v27 = vadd.f32 %v1188_v23, %v6323_v11  ;;  %v1318_v32 = vsel %vm1314_vm1, %v1312_v6, %v1316_v24 }
 0x301   :  { %888 = vmax.xlane.f32.xlu1 %v887_v17  ;;  %885 = vmax.xlane.f32.xlu0 %v884_v18  ;;  %v1317_v33 = vsel %vm1313_vm2, %v1311_v5, %v1315_v57  ;;  %v1445_v34 = vmul.f32 0.2, %v1441_v16  ;;  %v1444_v37 = vmul.f32 0.2, %v1440_v1  ;;  %vm1443_vm3 = vcmp.gt.f32.partialorder %v1441_v16, 0.0 }
 0x302   :  { %vm1442_vm4 = vcmp.gt.f32.partialorder %v1440_v1, 0.0  ;;  %v1195_v38 = vsel %vm478_vm8, %v6390_v26, -inf  ;;  %v1192_v40 = vsel %vm478_vm8, %v6393_v27, -inf  ;;  %v6400_v41 = vadd.f32 %v1318_v32, %v6321_v10 }
 0x303   :  { %v6403_v42 = vadd.f32 %v1317_v33, %v6323_v11  ;;  %v1447_v43 = vsel %vm1443_vm3, %v1441_v16, %v1445_v34  ;;  %v1446_v44 = vsel %vm1442_vm4, %v1440_v1, %v1444_v37  ;;  %vm1773_vm10 = vcmask 392192  }
 0x304   :  { %v1324_v45 = vsel %vm478_vm8, %v6400_v41, -inf  ;;  %v6410_v48 = vadd.f32 %v1447_v43, %v6321_v10  ;;  %v6413_v50 = vadd.f32 %v1446_v44, %v6323_v11 }
 0x305   :  { %1067 = vmax.xlane.f32.xlu1 %v1066_v52  ;;  %1064 = vmax.xlane.f32.xlu0 %v1063_v25  ;;  %v1321_v46 = vsel %vm478_vm8, %v6403_v42, -inf }
 0x306   :  { %v1453_v55 = vsel %vm478_vm8, %v6410_v48, -inf  ;;  %v1450_v53 = vsel %vm478_vm8, %v6413_v50, -inf }
 0x309   :  { %1196 = vmax.xlane.f32.xlu1 %v1195_v38  ;;  %1193 = vmax.xlane.f32.xlu0 %v1192_v40 }
 0x30d   :  { %1325 = vmax.xlane.f32.xlu1 %v1324_v45  ;;  %1322 = vmax.xlane.f32.xlu0 %v1321_v46 }
 0x311   :  { %1454 = vmax.xlane.f32.xlu1 %v1453_v55  ;;  %1451 = vmax.xlane.f32.xlu0 %v1450_v53 }
 0x382   :  { %v484_v47 = vpop.xlane.xlu1 %483  ;;  %v481_v54 = vpop.xlane.xlu0 %480 }
 0x383   :  { %v486_v3 = vsub.f32 %v6326_v28, %v484_v47  ;;  %v485_v51 = vsub.f32 %v6329_v31, %v481_v54 }
 0x385   :  { %v489_v4 = vmul.f32 1.442695, %v486_v3  ;;  %v487_v5 = vmul.f32 1.442695, %v485_v51 }
 0x386   :  { %v619_v6 = vpop.xlane.xlu1 %618  ;;  %v616_v7 = vpop.xlane.xlu0 %615 }
 0x387   :  { %5568 = vpow2.f32 %v489_v4  ;;  %v621_v8 = vsub.f32 %v6334_v36, %v619_v6  ;;  %v620_v9 = vsub.f32 %v6341_v39, %v616_v7 }
 0x388   :  { %5570 = vpow2.f32 %v487_v5 }
 0x389   :  { %v624_v58 = vmul.f32 1.442695, %v621_v8  ;;  %v622_v14 = vmul.f32 1.442695, %v620_v9 }
 0x38a   :  { %v754_v49 = vpop.xlane.xlu1 %753  ;;  %v751_v15 = vpop.xlane.xlu0 %750 }
 0x38b   :  { %5572 = vpow2.f32 %v624_v58  ;;  %v756_v1 = vsub.f32 %v6354_v59, %v754_v49  ;;  %v755_v28 = vsub.f32 %v6357_v60, %v751_v15 }
 0x38c   :  { %5574 = vpow2.f32 %v622_v14 }
 0x38d   :  { %v759_v31 = vmul.f32 1.442695, %v756_v1  ;;  %v757_v16 = vmul.f32 1.442695, %v755_v28 }
 0x38e   :  { %v889_v17 = vpop.xlane.xlu1 %888  ;;  %v886_v18 = vpop.xlane.xlu0 %885 }
 0x38f   :  { %5576 = vpow2.f32 %v759_v31  ;;  %v891_v36 = vsub.f32 %v6368_v12, %v889_v17  ;;  %v890_v39 = vsub.f32 %v6371_v13, %v886_v18 }
 0x390   :  { %5578 = vpow2.f32 %v757_v16 }
 0x391   :  { %v6427_v22 = vpop.eup %5568  ;;  %v894_v23 = vmul.f32 1.442695, %v891_v36  ;;  %v892_v24 = vmul.f32 1.442695, %v890_v39 }
 0x392   :  { %v6429_v57 = vpop.eup %5570  ;;  %v1068_v59 = vpop.xlane.xlu1 %1067  ;;  %v494_v60 = vsel %vm478_vm8, %v6427_v22, 0.0 }
 0x393   :  { %v1065_v52 = vpop.xlane.xlu0 %1064  ;;  %5580 = vpow2.f32 %v894_v23  ;;  %v1070_v25 = vsub.f32 %v6380_v20, %v1068_v59  ;;  %495 = vadd.xlane.f32.xlu1 %v494_v60  ;;  %v491_v12 = vsel %vm478_vm8, %v6429_v57, 0.0 }
 0x394   :  { %v1069_v32 = vsub.f32 %v6383_v21, %v1065_v52  ;;  %5582 = vpow2.f32 %v892_v24  ;;  %492 = vadd.xlane.f32.xlu0 %v491_v12 }
 0x395   :  { %v6437_v13 = vpop.eup %5572  ;;  %v1073_v33 = vmul.f32 1.442695, %v1070_v25 }
 0x396   :  { %v1071_v34 = vmul.f32 1.442695, %v1069_v32  ;;  %v6439_v37 = vpop.eup %5574  ;;  %v1197_v38 = vpop.xlane.xlu1 %1196  ;;  %v629_v43 = vsel %vm478_vm8, %v6437_v13, 0.0 }
 0x397   :  { %v1194_v40 = vpop.xlane.xlu0 %1193  ;;  %5584 = vpow2.f32 %v1073_v33  ;;  %v1199_v20 = vsub.f32 %v6390_v26, %v1197_v38  ;;  %630 = vadd.xlane.f32.xlu1 %v629_v43  ;;  %v626_v44 = vsel %vm478_vm8, %v6439_v37, 0.0 }
 0x398   :  { %v1198_v21 = vsub.f32 %v6393_v27, %v1194_v40  ;;  %5586 = vpow2.f32 %v1071_v34  ;;  %627 = vadd.xlane.f32.xlu0 %v626_v44 }
 0x399   :  { %v6447_v45 = vpop.eup %5576  ;;  %v1202_v46 = vmul.f32 1.442695, %v1199_v20 }
 0x39a   :  { %v1200_v55 = vmul.f32 1.442695, %v1198_v21  ;;  %v6449_v53 = vpop.eup %5578  ;;  %v1326_v47 = vpop.xlane.xlu1 %1325  ;;  %v764_v3 = vsel %vm478_vm8, %v6447_v45, 0.0 }
 0x39b   :  { %v1323_v54 = vpop.xlane.xlu0 %1322  ;;  %5588 = vpow2.f32 %v1202_v46  ;;  %v1328_v26 = vsub.f32 %v6400_v41, %v1326_v47  ;;  %765 = vadd.xlane.f32.xlu1 %v764_v3  ;;  %v761_v51 = vsel %vm478_vm8, %v6449_v53, 0.0 }
 0x39c   :  { %v1327_v27 = vsub.f32 %v6403_v42, %v1323_v54  ;;  %5590 = vpow2.f32 %v1200_v55  ;;  %762 = vadd.xlane.f32.xlu0 %v761_v51 }
 0x39d   :  { %v6457_v4 = vpop.eup %5580  ;;  %v1331_v5 = vmul.f32 1.442695, %v1328_v26 }
 0x39e   :  { %v1329_v6 = vmul.f32 1.442695, %v1327_v27  ;;  %v6459_v7 = vpop.eup %5582  ;;  %v1455_v8 = vpop.xlane.xlu1 %1454  ;;  %v899_v58 = vsel %vm478_vm8, %v6457_v4, 0.0 }
 0x39f   :  { %v1452_v9 = vpop.xlane.xlu0 %1451  ;;  %5592 = vpow2.f32 %v1331_v5  ;;  %v1457_v41 = vsub.f32 %v6410_v48, %v1455_v8  ;;  %900 = vadd.xlane.f32.xlu1 %v899_v58  ;;  %v896_v14 = vsel %vm478_vm8, %v6459_v7, 0.0 }
 0x3a0   :  { %v1456_v42 = vsub.f32 %v6413_v50, %v1452_v9  ;;  %5594 = vpow2.f32 %v1329_v6  ;;  %897 = vadd.xlane.f32.xlu0 %v896_v14 }
 0x3a1   :  { %v6467_v49 = vpop.eup %5584  ;;  %v1460_v15 = vmul.f32 1.442695, %v1457_v41 }
 0x3a2   :  { %v1458_v1 = vmul.f32 1.442695, %v1456_v42  ;;  %v6469_v28 = vpop.eup %5586  ;;  %v1078_v31 = vsel %vm478_vm8, %v6467_v49, 0.0 }
 0x3a3   :  { %5596 = vpow2.f32 %v1460_v15  ;;  %1079 = vadd.xlane.f32.xlu1 %v1078_v31  ;;  %v1075_v48 = vsel %vm478_vm8, %v6469_v28, 0.0 }
 0x3a4   :  { %5598 = vpow2.f32 %v1458_v1  ;;  %1076 = vadd.xlane.f32.xlu0 %v1075_v48 }
 0x3a5   :  { %v6475_v50 = vpop.eup %5588 }
 0x3a6   :  { %v6477_v16 = vpop.eup %5590  ;;  %v1207_v17 = vsel %vm478_vm8, %v6475_v50, 0.0 }
 0x3a7   :  { %1208 = vadd.xlane.f32.xlu1 %v1207_v17  ;;  %v1204_v18 = vsel %vm478_vm8, %v6477_v16, 0.0 }
 0x3a8   :  { %1205 = vadd.xlane.f32.xlu0 %v1204_v18 }
 0x3a9   :  { %v6483_v36 = vpop.eup %5592 }
 0x3aa   :  { %v6485_v39 = vpop.eup %5594  ;;  %v1336_v23 = vsel %vm478_vm8, %v6483_v36, 0.0 }
 0x3ab   :  { %1337 = vadd.xlane.f32.xlu1 %v1336_v23  ;;  %v1333_v24 = vsel %vm478_vm8, %v6485_v39, 0.0 }
 0x3ac   :  { %1334 = vadd.xlane.f32.xlu0 %v1333_v24 }
 0x3ad   :  { %v6491_v59 = vpop.eup %5596 }
 0x3ae   :  { %v6493_v52 = vpop.eup %5598  ;;  %v1465_v60 = vsel %vm478_vm8, %v6491_v59, 0.0 }
 0x3af   :  { %1466 = vadd.xlane.f32.xlu1 %v1465_v60  ;;  %v1462_v25 = vsel %vm478_vm8, %v6493_v52, 0.0 }
 0x3b0   :  { %1463 = vadd.xlane.f32.xlu0 %v1462_v25 }
 0x420   :  { %v496_v32 = vpop.xlane.xlu1 %495 }
 0x421   :  { %5600 = vrcp.f32 %v496_v32  ;;  %v493_v12 = vpop.xlane.xlu0 %492  ;;  %v1569_v32 = vld [vmem:[%s7336_s11 + $0x10] sm:$0xff] }
 0x422   :  { %5602 = vrcp.f32 %v493_v12  ;;  %v1570_v12 = vld [vmem:[%s7336_s11 + $0x18] sm:$0xff] }
 0x424   :  { %v631_v33 = vpop.xlane.xlu1 %630 }
 0x425   :  { %5604 = vrcp.f32 %v631_v33  ;;  %v628_v34 = vpop.xlane.xlu0 %627  ;;  %v1677_v33 = vld [vmem:[%s7380_s3 + $0x10] sm:$0xff] }
 0x426   :  { %5606 = vrcp.f32 %v628_v34  ;;  %v5237_v34 = vpack.c.bf16 %v1570_v12, %v1569_v32 }
 0x428   :  { %v766_v38 = vpop.xlane.xlu1 %765 }
 0x429   :  { %5608 = vrcp.f32 %v766_v38  ;;  %v763_v40 = vpop.xlane.xlu0 %762  ;;  %v1678_v38 = vld [vmem:[%s7380_s3 + $0x18] sm:$0xff] }
 0x42a   :  { %5610 = vrcp.f32 %v763_v40  ;;  %v5245_v40 = vpack.c.bf16 %v1678_v38, %v1677_v33 }
 0x42b   :  { %v5601_v43 = vpop.eup %5600 }
 0x42c   :  { %v5603_v20 = vpop.eup %5602  ;;  %v500_v21 = vmul.f32 %v5601_v43, %v6427_v22  ;;  %v901_v44 = vpop.xlane.xlu1 %900  ;;  %v1767_v43 = vld [vmem:[%s7381_s18] sm:$0xff] }
 0x42d   :  { %5612 = vrcp.f32 %v901_v44  ;;  %v898_v46 = vpop.xlane.xlu0 %897  ;;  %v499_v55 = vmul.f32 %v5603_v20, %v6429_v57  ;;  %v1768_v20 = vld [vmem:[%s7381_s18 + $0x8] sm:$0xff] }
 0x42e   :  { %5614 = vrcp.f32 %v898_v46  ;;  %v6574_v44 = vpack.c.bf16 %v1768_v20, %v1767_v43  ;;  %v1872_v46 = vld [vmem:[%s7382_s12 + $0x8] sm:$0xff]  ;;  %v1769_v43 = vld [vmem:[%s7381_s18 + $0x10] sm:$0xff]  ;;  %v1770_v20 = vld [vmem:[%s7381_s18 + $0x18] sm:$0xff] }
 0x42f   :  { %v5605_v47 = vpop.eup %5604  ;;  %4961 = vmatprep.mubr.msk.f32.mxu0 %vm478_vm8, %v499_v55 }
 0x430   :  { %v5607_v54 = vpop.eup %5606  ;;  %v635_v3 = vmul.f32 %v5605_v47, %v6437_v13  ;;  %4962 = vmatmul.mubr.msk.f32.vlgmr.msra.gmra.mrb[4].mxu0 %vm478_vm8, %v500_v21  ;;  %v1080_v26 = vpop.xlane.xlu1 %1079  ;;  %v1871_v21 = vld [vmem:[%s7382_s12] sm:$0xff] }
 0x431   :  { %5212 = vmatpush3.bf16.msra.mxu0 %v6252_v29  ;;  %5616 = vrcp.f32 %v1080_v26  ;;  %v1077_v27 = vpop.xlane.xlu0 %1076  ;;  %v634_v22 = vmul.f32 %v5607_v54, %v6439_v37  ;;  %v6579_v55 = vpack.c.bf16 %v1872_v46, %v1871_v21  ;;  %v4580_v26 = vld [vmem:[#allocation7 + $0x1] ss:$0 sm:$0xff] }
 0x432   :  { %5218 = vmatprep.subr.bf16.mxu0 %v6256_v30  ;;  %5618 = vrcp.f32 %v1077_v27 }
 0x433   :  { %v5609_v57 = vpop.eup %5608  ;;  %4968 = vmatprep.mubr.msk.f32.mxu1 %vm478_vm8, %v634_v22 }
 0x434   :  { %v5611_v51 = vpop.eup %5610  ;;  %v770_v5 = vmul.f32 %v5609_v57, %v6447_v45  ;;  %4969 = vmatmul.mubr.msk.f32.vlgmr.msra.gmra.mrb[4].mxu1 %vm478_vm8, %v635_v3  ;;  %v1209_v13 = vpop.xlane.xlu1 %1208  ;;  %v4577_v3 = vld [vmem:[#allocation7] ss:$0 sm:$0xff] }
 0x435   :  { %5216 = vmatpush3.bf16.msra.mxu1 %v6252_v29  ;;  %5620 = vrcp.f32 %v1209_v13  ;;  %v1206_v6 = vpop.xlane.xlu0 %1205  ;;  %v769_v8 = vmul.f32 %v5611_v51, %v6449_v53 }
 0x436   :  { %5222 = vmatprep.subr.bf16.mxu1 %v6256_v30  ;;  %5622 = vrcp.f32 %v1206_v6  ;;  %v4583_v6 = vld [vmem:[#allocation7 + $0x2] ss:$0 sm:$0xff] }
 0x437   :  { %v5613_v37 = vpop.eup %5612  ;;  %4975 = vmatprep.mubr.msk.f32.mxu0 %vm478_vm8, %v769_v8 }
 0x438   :  { %v5615_v9 = vpop.eup %5614  ;;  %v905_v58 = vmul.f32 %v5613_v37, %v6457_v4  ;;  %4976 = vmatmul.mubr.msk.f32.vlgmr.msra.gmra.mrb[6].mxu0 %vm478_vm8, %v770_v5  ;;  %v1338_v45 = vpop.xlane.xlu1 %1337 }
 0x439   :  { %5220 = vmatpush3.bf16.msra.mxu0 %v6256_v30  ;;  %5624 = vrcp.f32 %v1338_v45  ;;  %v1335_v29 = vpop.xlane.xlu0 %1334  ;;  %v904_v41 = vmul.f32 %v5615_v9, %v6459_v7 }
 0x43a   :  { %5226 = vmatprep.subr.bf16.mxu0 %v6256_v30  ;;  %5626 = vrcp.f32 %v1335_v29 }
 0x43b   :  { %v5617_v53 = vpop.eup %5616  ;;  %4982 = vmatprep.mubr.msk.f32.mxu1 %vm478_vm8, %v904_v41  ;;  %v4586_v41 = vld [vmem:[#allocation7 + $0x3] ss:$0 sm:$0xff] }
 0x43c   :  { %v5619_v42 = vpop.eup %5618  ;;  %v1084_v14 = vmul.f32 %v5617_v53, %v6467_v49  ;;  %4983 = vmatmul.mubr.msk.f32.vlgmr.msra.gmra.mrb[6].mxu1 %vm478_vm8, %v905_v58  ;;  %v1467_v4 = vpop.xlane.xlu1 %1466 }
 0x43d   :  { %5224 = vmatpush3.bf16.msra.mxu1 %v6256_v30  ;;  %5628 = vrcp.f32 %v1467_v4  ;;  %v1464_v15 = vpop.xlane.xlu0 %1463  ;;  %v1083_v1 = vmul.f32 %v5619_v42, %v6469_v28 }
 0x43e   :  { %5230 = vmatprep.subr.bf16.mxu1 %v6256_v30  ;;  %5630 = vrcp.f32 %v1464_v15 }
 0x43f   :  { %v5621_v7 = vpop.eup %5620  ;;  %4989 = vmatprep.mubr.msk.f32.mxu0 %vm478_vm8, %v1083_v1 }
 0x440   :  { %v5623_v31 = vpop.eup %5622  ;;  %v1213_v48 = vmul.f32 %v5621_v7, %v6475_v50  ;;  %4990 = vmatmul.mubr.msk.f32.vlgmr.msra.gmra.mrb[8].mxu0 %vm478_vm8, %v1084_v14 }
 0x441   :  { %5228 = vmatpush3.bf16.msra.mxu0 %v6256_v30  ;;  %v1212_v49 = vmul.f32 %v5623_v31, %v6477_v16 }
 0x443   :  { %v5625_v17 = vpop.eup %5624  ;;  %4996 = vmatprep.mubr.msk.f32.mxu1 %vm478_vm8, %v1212_v49 }
 0x444   :  { %v5627_v18 = vpop.eup %5626  ;;  %v1342_v28 = vmul.f32 %v5625_v17, %v6483_v36  ;;  %4997 = vmatmul.mubr.msk.f32.vlgmr.msra.gmra.mrb[8].mxu1 %vm478_vm8, %v1213_v48  ;;  %v1568_v36 = vld [vmem:[%s7336_s11 + $0x8] sm:$0xff] }
 0x445   :  { %5232 = vmatpush3.bf16.msra.mxu1 %v6256_v30  ;;  %v1341_v23 = vmul.f32 %v5627_v18, %v6485_v39  ;;  %v1567_v30 = vld [vmem:[%s7336_s11] sm:$0xff] }
 0x446   :  { %v1675_v39 = vld [vmem:[%s7380_s3] sm:$0xff] }
 0x447   :  { %v5629_v24 = vpop.eup %5628  ;;  %5003 = vmatprep.mubr.msk.f32.mxu0 %vm478_vm8, %v1341_v23 }
 0x448   :  { %v5631_v50 = vpop.eup %5630  ;;  %v1471_v60 = vmul.f32 %v5629_v24, %v6491_v59  ;;  %5004 = vmatmul.mubr.msk.f32.vlgmr.msra.gmra.mrb[10].mxu0 %vm478_vm8, %v1342_v28  ;;  %v5233_v59 = vpack.c.bf16 %v1568_v36, %v1567_v30 }
 0x449   :  { %v1470_v16 = vmul.f32 %v5631_v50, %v6493_v52  ;;  %v1676_v52 = vld [vmem:[%s7380_s3 + $0x8] sm:$0xff] }
 0x44a   :  { %v5241_v25 = vpack.c.bf16 %v1676_v52, %v1675_v39  ;;  %5234 = vmatprep.subr.bf16.mxu0 %v5233_v59 }
 0x44b   :  { %5010 = vmatprep.mubr.msk.f32.mxu1 %vm478_vm8, %v1470_v16  ;;  %5236 = vmatpush3.bf16.msra.mxu0 %v5233_v59 }
 0x44c   :  { %5011 = vmatmul.mubr.msk.f32.vlgmr.msra.gmra.mrb[10].mxu1 %vm478_vm8, %v1471_v60  ;;  %5242 = vmatprep.subr.bf16.mxu1 %v5241_v25 }
 0x44d   :  { %5244 = vmatpush3.bf16.msra.mxu1 %v5241_v25  ;;  %5238 = vmatprep.subr.bf16.mxu0 %v5237_v34 }
 0x44e   :  { %5246 = vmatprep.subr.bf16.mxu1 %v5245_v40 }
 0x44f   :  { %5240 = vmatpush3.bf16.msra.mxu0 %v5237_v34 }
 0x450   :  { %5250 = vmatprep.subr.bf16.mxu0 %v6574_v44 }
 0x451   :  { %5248 = vmatpush3.bf16.msra.mxu1 %v5245_v40 }
 0x452   :  { %5262 = vmatprep.subr.bf16.mxu1 %v6579_v55 }
 0x503   :  { %v4963_v47 = vpop.f32.mrb[4].mxu0 }
 0x504   :  { %v573_v54 = vpop.f32.mrb[5].mxu0  ;;  %v589_v22 = vmul.f32 %v4963_v47, %v4577_v3 }
 0x505   :  { %v588_v5 = vmul.f32 %v4577_v3, %v573_v54  ;;  %v1873_v54 = vld [vmem:[%s7382_s12 + $0x10] sm:$0xff] }
 0x507   :  { %v4970_v27 = vpop.f32.mrb[4].mxu1 }
 0x508   :  { %v724_v57 = vmul.f32 %v4970_v27, %v4580_v26  ;;  %v708_v51 = vpop.f32.mrb[5].mxu1 }
 0x509   :  { %v723_v13 = vmul.f32 %v4580_v26, %v708_v51 }
 0x50a   :  { %v726_v8 = vadd.f32 %v724_v57, %v589_v22  ;;  %v5253_v57 = vpack.c.bf16 %v1770_v20, %v1769_v43 }
 0x50b   :  { %v725_v37 = vadd.f32 %v723_v13, %v588_v5  ;;  %v4977_v9 = vpop.f32.mrb[6].mxu0 }
 0x50c   :  { %v859_v58 = vmul.f32 %v4977_v9, %v4583_v6  ;;  %v843_v45 = vpop.f32.mrb[7].mxu0  ;;  %v1772_v9 = vld [vmem:[%s7381_s18 + $0x28] sm:$0xff] }
 0x50d   :  { %v858_v29 = vmul.f32 %v4583_v6, %v843_v45  ;;  %v1876_v45 = vld [vmem:[%s7382_s12 + $0x28] sm:$0xff] }
 0x50e   :  { %v861_v53 = vadd.f32 %v859_v58, %v726_v8  ;;  %v1875_v58 = vld [vmem:[%s7382_s12 + $0x20] sm:$0xff] }
 0x50f   :  { %v860_v42 = vadd.f32 %v858_v29, %v725_v37  ;;  %v4984_v14 = vpop.f32.mrb[6].mxu1 }
 0x510   :  { %v994_v4 = vmul.f32 %v4984_v14, %v4586_v41  ;;  %v978_v15 = vpop.f32.mrb[7].mxu1 }
 0x511   :  { %v993_v1 = vmul.f32 %v4586_v41, %v978_v15 }
 0x512   :  { %v996_v7 = vadd.f32 %v994_v4, %v861_v53 }
 0x513   :  { %v995_v31 = vadd.f32 %v993_v1, %v860_v42  ;;  %v4991_v48 = vpop.f32.mrb[8].mxu0 }
 0x514   :  { %v1001_v49 = vmul.f32 1.442695, %v996_v7  ;;  %v1157_v17 = vpop.f32.mrb[9].mxu0  ;;  %v1167_v23 = vmul.f32 %v4991_v48, %v4577_v3  ;;  %vm998_vm6 = vcmp.gt.f32.partialorder %v996_v7, 0.0 }
 0x515   :  { %v999_v18 = vmul.f32 1.442695, %v995_v31  ;;  %v1166_v60 = vmul.f32 %v4577_v3, %v1157_v17  ;;  %v1874_v3 = vld [vmem:[%s7382_s12 + $0x18] sm:$0xff]  ;;  %vm997_vm5 = vcmp.gt.f32.partialorder %v995_v31, 0.0  ;;  %s5966_s12 = smov [#allocation18]  }
 0x516   :  { %5632 = vpow2.f32 %v1001_v49  ;;  %v5265_v13 = vpack.c.bf16 %v1874_v3, %v1873_v54  ;;  %v4599_v49 = vld [vmem:[#allocation2] ss:$0 sm:$0xff] }
 0x517   :  { %5634 = vpow2.f32 %v999_v18  ;;  %v4998_v28 = vpop.f32.mrb[8].mxu1 }
 0x518   :  { %v1296_v24 = vmul.f32 %v4998_v28, %v4580_v26  ;;  %v1286_v50 = vpop.f32.mrb[9].mxu1 }
 0x519   :  { %v1295_v16 = vmul.f32 %v4580_v26, %v1286_v50 }
 0x51a   :  { %v1298_v30 = vadd.f32 %v1296_v24, %v1167_v23 }
 0x51b   :  { %v1297_v36 = vadd.f32 %v1295_v16, %v1166_v60  ;;  %v5005_v39 = vpop.f32.mrb[10].mxu0 }
 0x51c   :  { %v1425_v59 = vmul.f32 %v5005_v39, %v4583_v6  ;;  %v1415_v52 = vpop.f32.mrb[11].mxu0 }
 0x51d   :  { %v1424_v25 = vmul.f32 %v4583_v6, %v1415_v52  ;;  %v1771_v6 = vld [vmem:[%s7381_s18 + $0x20] sm:$0xff] }
 0x51e   :  { %v1427_v32 = vadd.f32 %v1425_v59, %v1298_v30  ;;  %v5257_v29 = vpack.c.bf16 %v1772_v9, %v1771_v6 }
 0x51f   :  { %v1426_v12 = vadd.f32 %v1424_v25, %v1297_v36  ;;  %v5012_v33 = vpop.f32.mrb[10].mxu1 }
 0x520   :  { %v5633_v34 = vpop.eup %5632  ;;  %v1554_v38 = vmul.f32 %v5012_v33, %v4586_v41  ;;  %v1544_v40 = vpop.f32.mrb[11].mxu1 }
 0x521   :  { %v5635_v21 = vpop.eup %5634  ;;  %v1553_v46 = vmul.f32 %v4586_v41, %v1544_v40  ;;  %v4588_v47 = vadd.f32 -1.0, %v5633_v34  ;;  %v5269_v41 = vpack.c.bf16 %v1876_v45, %v1875_v58 }
 0x522   :  { %v1556_v26 = vadd.f32 %v1554_v38, %v1427_v32  ;;  %v4587_v27 = vadd.f32 -1.0, %v5635_v21 }
 0x523   :  { %v1555_v22 = vadd.f32 %v1553_v46, %v1426_v12  ;;  %v1006_v37 = vsel %vm998_vm6, %v996_v7, %v4588_v47 }
 0x524   :  { %v1561_v51 = vmul.f32 1.442695, %v1556_v26  ;;  %v1005_v5 = vsel %vm997_vm5, %v995_v31, %v4587_v27  ;;  %vm1558_vm9 = vcmp.gt.f32.partialorder %v1556_v26, 0.0 }
 0x525   :  { %v1559_v8 = vmul.f32 1.442695, %v1555_v22  ;;  %5021 = vmatprep.mubr.msk.f32.mxu0 %vm235_vm0, %v1005_v5  ;;  %5035 = vmatprep.mubr.msk.f32.mxu1 %vm235_vm0, %v1005_v5  ;;  %vm1557_vm7 = vcmp.gt.f32.partialorder %v1555_v22, 0.0 }
 0x526   :  { %5636 = vpow2.f32 %v1561_v51  ;;  %5022 = vmatmul.mubr.msk.f32.vlgmr.msra.gmra.mrb[12].mxu0 %vm235_vm0, %v1006_v37  ;;  %5036 = vmatmul.mubr.msk.f32.vlgmr.msra.gmra.mrb[12].mxu1 %vm235_vm0, %v1006_v37 }
 0x527   :  { %5638 = vpow2.f32 %v1559_v8  ;;  %5252 = vmatpush3.bf16.msra.mxu0 %v6574_v44  ;;  %5264 = vmatpush3.bf16.msra.mxu1 %v6579_v55 }
 0x528   :  { %5254 = vmatprep.subr.bf16.mxu0 %v5253_v57  ;;  %5266 = vmatprep.subr.bf16.mxu1 %v5265_v13 }
 0x52b   :  { %5256 = vmatpush3.bf16.msra.mxu0 %v5253_v57  ;;  %5268 = vmatpush3.bf16.msra.mxu1 %v5265_v13 }
 0x52c   :  { %5258 = vmatprep.subr.bf16.mxu0 %v5257_v29  ;;  %5270 = vmatprep.subr.bf16.mxu1 %v5269_v41 }
 0x52f   :  { %5260 = vmatpush3.bf16.msra.mxu0 %v5257_v29  ;;  %5272 = vmatpush3.bf16.msra.mxu1 %v5269_v41 }
 0x530   :  { %v5637_v53 = vpop.eup %5636 }
 0x531   :  { %v5639_v42 = vpop.eup %5638  ;;  %v4598_v14 = vadd.f32 -1.0, %v5637_v53 }
 0x532   :  { %v4597_v4 = vadd.f32 -1.0, %v5639_v42 }
 0x533   :  { %v1566_v44 = vsel %vm1558_vm9, %v1556_v26, %v4598_v14 }
 0x534   :  { %v1565_v15 = vsel %vm1557_vm7, %v1555_v22, %v4597_v4 }
 0x535   :  { %5024 = vmatprep.mubr.msk.f32.mxu0 %vm235_vm0, %v1565_v15  ;;  %5038 = vmatprep.mubr.msk.f32.mxu1 %vm235_vm0, %v1565_v15 }
 0x536   :  { %5025 = vmatmul.mubr.msk.f32.gmra.mrb[14].mxu0 %vm235_vm0, %v1566_v44  ;;  %5039 = vmatmul.mubr.msk.f32.gmra.mrb[14].mxu1 %vm235_vm0, %v1566_v44 }
 0x5f9   :  { %v5023_v55 = vpop.f32.mrb[12].mxu0  ;;  %v5037_v1 = vpop.f32.mrb[12].mxu1 }
 0x5fa   :  { %v1656_v7 = vpop.f32.mrb[13].mxu0  ;;  %v1745_v31 = vpop.f32.mrb[13].mxu1  ;;  %v6628_v28 = vadd.f32 %v5023_v55, %v4599_v49 }
 0x5fb   :  { %v6617_v48 = vpack.c.bf16 %v5037_v1, %v1745_v31  ;;  %5053 = vmatprep.mubr.msk.f32.mxu0 %vm1773_vm10, %v1745_v31  ;;  %5071 = vmatprep.mubr.msk.f32.mxu1 %vm1773_vm10, %v1745_v31  ;;  %v6632_v60 = vadd.f32 %v4599_v49, %v1656_v7 }
 0x5fc   :  { %5054 = vmatmul.mubr.msk.f32.vlgmr.msra.gmra.mrb[16].mxu0 %vm1773_vm10, %v5037_v1  ;;  %5072 = vmatmul.mubr.msk.f32.vlgmr.msra.gmra.mrb[16].mxu1 %vm1773_vm10, %v5037_v1 }
 0x5fd   :  { %5274 = vmatprep.subr.bf16.mxu0 %v6617_v48  ;;  %5278 = vmatprep.subr.bf16.mxu1 %v6617_v48 }
 0x5fe   :  { %5276 = vmatpush3.bf16.msra.mxu0 %v6617_v48  ;;  %5280 = vmatpush3.bf16.msra.mxu1 %v6617_v48 }
 0x5ff   :  { %5282 = vmatprep.subr.bf16.mxu0 %v6617_v48 }
 0x609   :  { %v5026_v17 = vpop.f32.mrb[14].mxu0  ;;  %v5040_v18 = vpop.f32.mrb[14].mxu1 }
 0x60a   :  { %v6630_v23 = vadd.f32 %v5026_v17, %v4599_v49  ;;  %v1666_v24 = vpop.f32.mrb[15].mxu0  ;;  %v1755_v50 = vpop.f32.mrb[15].mxu1 }
 0x60b   :  { %v6634_v16 = vadd.f32 %v4599_v49, %v1666_v24  ;;  %v6636_v30 = vpack.c.bf16 %v5040_v18, %v1755_v50  ;;  %5056 = vmatprep.mubr.msk.f32.mxu0 %vm1773_vm10, %v1755_v50  ;;  %5074 = vmatprep.mubr.msk.f32.mxu1 %vm1773_vm10, %v1755_v50 }
 0x60c   :  { %v5417_v36 = vpack.i.bf16 %v6628_v28, %v6630_v23  ;;  %5057 = vmatmul.mubr.msk.f32.gmra.mrb[18].mxu0 %vm1773_vm10, %v5040_v18  ;;  %5075 = vmatmul.mubr.msk.f32.gmra.mrb[18].mxu1 %vm1773_vm10, %v5040_v18 }
 0x60d   :  { %v5415_v39 = vpack.i.bf16 %v6632_v60, %v6634_v16  ;;  %5286 = vmatprep.subr.bf16.mxu1 %v6636_v30 }
 0x6cf   :  { %v5055_v59 = vpop.f32.mrb[16].mxu0  ;;  %v5073_v52 = vpop.f32.mrb[16].mxu1 }
 0x6d0   :  { %v1943_v25 = vpop.f32.mrb[17].mxu1  ;;  %2001 = vperm.xlu1 %5403, %v5055_v59   ;;  %v1852_v32 = vpop.f32.mrb[17].mxu0 }
 0x6d1   :  { %1996 = vperm.xlu0 %5406, %v1852_v32  }
 0x6d4   :  { %5404 = vset.pattern.permute.xlu1 %v5960_v35 }
 0x6d5   :  { %2136 = vperm.xlu1 %5404, %v5055_v59   ;;  %5410 = vset.pattern.permute.xlu0 %v5960_v35 }
 0x6d9   :  { %5405 = vset.pattern.permute.xlu1 %v5959_v19 }
 0x6da   :  { %2271 = vperm.xlu1 %5405, %v5055_v59  }
 0x6de   :  { %5407 = vset.pattern.permute.xlu1 %v5960_v35 }
 0x6df   :  { %v5076_v12 = vpop.f32.mrb[18].mxu1  ;;  %2132 = vperm.xlu1 %5407, %v1852_v32   ;;  %v5058_v33 = vpop.f32.mrb[18].mxu0 }
 0x6e0   :  { %v1953_v34 = vpop.f32.mrb[19].mxu1  ;;  %2579 = vperm.xlu0 %5410, %v5058_v33   ;;  %v1862_v38 = vpop.f32.mrb[19].mxu0 }
 0x6e3   :  { %5408 = vset.pattern.permute.xlu1 %v5959_v19 }
 0x6e4   :  { %2267 = vperm.xlu1 %5408, %v1852_v32  }
 0x6e8   :  { %5409 = vset.pattern.permute.xlu1 %v5958_v2 }
 0x6e9   :  { %2450 = vperm.xlu1 %5409, %v5058_v33  }
 0x6ed   :  { %5411 = vset.pattern.permute.xlu1 %v5959_v19 }
 0x6ee   :  { %2708 = vperm.xlu1 %5411, %v5058_v33  }
 0x6f2   :  { %5412 = vset.pattern.permute.xlu1 %v5958_v2 }
 0x6f3   :  { %2445 = vperm.xlu1 %5412, %v1862_v38  }
 0x6f7   :  { %5413 = vset.pattern.permute.xlu1 %v5960_v35 }
 0x6f8   :  { %2575 = vperm.xlu1 %5413, %v1862_v38  }
 0x6fc   :  { %5414 = vset.pattern.permute.xlu1 %v5959_v19 }
 0x6fd   :  { %2704 = vperm.xlu1 %5414, %v1862_v38  }
 0x6fe   :  { %1962 = vxpose.xlu0.b32.start [1/2] (short) (narrow) %v1943_v25, 8 }
 0x702   :  { %1963 = vxpose.xlu0.b32.end [2/2] (short) (narrow) %v5073_v52, 8 }
 0x726   :  { %2411 = vxpose.xlu1.b32.start [1/2] (short) (narrow) %v1953_v34, 8 }
 0x72a   :  { %2412 = vxpose.xlu1.b32.end [2/2] (short) (narrow) %v5076_v12, 8 }
 0x74f   :  { %v2002_v40 = vpop.permute.xlu1 %2001 }
 0x750   :  { %v1997_v21 = vpop.permute.xlu0 %1996 }
 0x754   :  { %v2137_v43 = vpop.permute.xlu1 %2136 }
 0x759   :  { %v2272_v20 = vpop.permute.xlu1 %2271 }
 0x75e   :  { %v2133_v47 = vpop.permute.xlu1 %2132 }
 0x75f   :  { %v2580_v46 = vpop.permute.xlu0 %2579 }
 0x763   :  { %v2268_v27 = vpop.permute.xlu1 %2267 }
 0x768   :  { %v2451_v49 = vpop.permute.xlu1 %2450 }
 0x76d   :  { %v2709_v59 = vpop.permute.xlu1 %2708 }
 0x772   :  { %v2446_v12 = vpop.permute.xlu1 %2445 }
 0x777   :  { %v2576_v33 = vpop.permute.xlu1 %2575 }
 0x77c   :  { %v2705_v34 = vpop.permute.xlu1 %2704 }
 0x77e   :  { %v1978_v54 = vpop.trf.xlu0 }
 0x77f   :  { %v2007_v3 = vrot.slane %v1978_v54, %v6302_v61  ;;  %v2142_v26 = vrot.slane %v1978_v54, %v6305_v62  ;;  %v2277_v35 = vrot.slane %v1978_v54, %v6308_v63 }
 0x781   :  { %v2008_v22 = vadd.f32 %v2007_v3, %v1997_v21  ;;  %v2009_v57 = vadd.f32 %v2007_v3, %v2002_v40  ;;  %v2144_v51 = vadd.f32 %v2142_v26, %v2137_v43  ;;  %v2143_v5 = vadd.f32 %v2142_v26, %v2133_v47 }
 0x782   :  { %v2278_v13 = vadd.f32 %v2277_v35, %v2268_v27  ;;  %v2279_v6 = vadd.f32 %v2277_v35, %v2272_v20 }
 0x783   :  { %vm2146_vm11 = vcmp.gt.f32.partialorder %v2144_v51, 0.0  ;;  %v2148_v8 = vmul.f32 0.2, %v2144_v51  ;;  %vm2011_vm12 = vcmp.gt.f32.partialorder %v2009_v57, 0.0  ;;  %v2013_v37 = vmul.f32 0.2, %v2009_v57 }
 0x784   :  { %vm2281_vm13 = vcmp.gt.f32.partialorder %v2279_v6, 0.0  ;;  %v2283_v9 = vmul.f32 0.2, %v2279_v6  ;;  %vm2280_vm14 = vcmp.gt.f32.partialorder %v2278_v13, 0.0  ;;  %v2282_v58 = vmul.f32 0.2, %v2278_v13 }
 0x785   :  { %v2150_v45 = vsel %vm2146_vm11, %v2144_v51, %v2148_v8  ;;  %v2015_v29 = vsel %vm2011_vm12, %v2009_v57, %v2013_v37  ;;  %vm2010_vm15 = vcmp.gt.f32.partialorder %v2008_v22, 0.0  ;;  %v2012_v41 = vmul.f32 0.2, %v2008_v22 }
 0x786   :  { %v6661_v53 = vadd.f32 %v2150_v45, %v6321_v10  ;;  %v6664_v42 = vadd.f32 %v2015_v29, %v6321_v10  ;;  %v2285_v14 = vsel %vm2281_vm13, %v2279_v6, %v2283_v9  ;;  %v2284_v4 = vsel %vm2280_vm14, %v2278_v13, %v2282_v58 }
 0x787   :  { %v6671_v55 = vadd.f32 %v2285_v14, %v6321_v10  ;;  %v6674_v1 = vadd.f32 %v2284_v4, %v6323_v11  ;;  %v2014_v7 = vsel %vm2010_vm15, %v2008_v22, %v2012_v41  ;;  %v2147_v31 = vmul.f32 0.2, %v2143_v5 }
 0x788   :  { %v2156_v15 = vsel %vm478_vm8, %v6661_v53, -inf  ;;  %v2021_v44 = vsel %vm478_vm8, %v6664_v42, -inf  ;;  %vm2145_vm1 = vcmp.gt.f32.partialorder %v2143_v5, 0.0  ;;  %v6681_v24 = vadd.f32 %v2014_v7, %v6323_v11 }
 0x789   :  { %2157 = vmax.xlane.f32.xlu0 %v2156_v15  ;;  %2022 = vmax.xlane.f32.xlu1 %v2021_v44  ;;  %v2291_v17 = vsel %vm478_vm8, %v6671_v55, -inf  ;;  %v2288_v18 = vsel %vm478_vm8, %v6674_v1, -inf  ;;  %v2149_v50 = vsel %vm2145_vm1, %v2143_v5, %v2147_v31  ;;  %vm5964_vm14 = vmmov 0  }
 0x78a   :  { %v2018_v52 = vsel %vm478_vm8, %v6681_v24, -inf  ;;  %v6686_v25 = vadd.f32 %v2149_v50, %v6323_v11 }
 0x78c   :  { %v2153_v32 = vsel %vm478_vm8, %v6686_v25, -inf }
 0x78d   :  { %2292 = vmax.xlane.f32.xlu0 %v2291_v17  ;;  %2289 = vmax.xlane.f32.xlu1 %v2288_v18 }
 0x791   :  { %2019 = vmax.xlane.f32.xlu0 %v2018_v52 }
 0x795   :  { %2154 = vmax.xlane.f32.xlu0 %v2153_v32 }
 0x7a6   :  { %v2427_v38 = vpop.trf.xlu1 }
 0x7a7   :  { %v2456_v40 = vrot.slane %v2427_v38, %v6302_v61  ;;  %v2585_v43 = vrot.slane %v2427_v38, %v6305_v62  ;;  %v2714_v20 = vrot.slane %v2427_v38, %v6308_v63 }
 0x7a9   :  { %v2457_v21 = vadd.f32 %v2456_v40, %v2446_v12  ;;  %v2458_v47 = vadd.f32 %v2456_v40, %v2451_v49  ;;  %v2586_v54 = vadd.f32 %v2585_v43, %v2576_v33  ;;  %v2587_v3 = vadd.f32 %v2585_v43, %v2580_v46 }
 0x7aa   :  { %v2715_v26 = vadd.f32 %v2714_v20, %v2705_v34  ;;  %v2716_v35 = vadd.f32 %v2714_v20, %v2709_v59 }
 0x7ab   :  { %vm2460_vm2 = vcmp.gt.f32.partialorder %v2458_v47, 0.0  ;;  %v2462_v27 = vmul.f32 0.2, %v2458_v47  ;;  %vm2459_vm3 = vcmp.gt.f32.partialorder %v2457_v21, 0.0  ;;  %v2461_v22 = vmul.f32 0.2, %v2457_v21 }
 0x7ac   :  { %vm2589_vm4 = vcmp.gt.f32.partialorder %v2587_v3, 0.0  ;;  %v2591_v57 = vmul.f32 0.2, %v2587_v3  ;;  %vm2588_vm5 = vcmp.gt.f32.partialorder %v2586_v54, 0.0  ;;  %v2590_v51 = vmul.f32 0.2, %v2586_v54 }
 0x7ad   :  { %v2464_v5 = vsel %vm2460_vm2, %v2458_v47, %v2462_v27  ;;  %v2463_v13 = vsel %vm2459_vm3, %v2457_v21, %v2461_v22  ;;  %vm2718_vm6 = vcmp.gt.f32.partialorder %v2716_v35, 0.0  ;;  %v2720_v6 = vmul.f32 0.2, %v2716_v35 }
 0x7ae   :  { %v6694_v8 = vadd.f32 %v2464_v5, %v6321_v10  ;;  %v6697_v37 = vadd.f32 %v2463_v13, %v6323_v11  ;;  %v2593_v46 = vsel %vm2589_vm4, %v2587_v3, %v2591_v57  ;;  %v2592_v9 = vsel %vm2588_vm5, %v2586_v54, %v2590_v51 }
 0x7af   :  { %v6700_v58 = vadd.f32 %v2593_v46, %v6321_v10  ;;  %vm2717_vm7 = vcmp.gt.f32.partialorder %v2715_v26, 0.0  ;;  %v6707_v41 = vadd.f32 %v2592_v9, %v6323_v11  ;;  %v2719_v14 = vmul.f32 0.2, %v2715_v26 }
 0x7b0   :  { %v2470_v45 = vsel %vm478_vm8, %v6694_v8, -inf  ;;  %v2467_v29 = vsel %vm478_vm8, %v6697_v37, -inf  ;;  %v2722_v4 = vsel %vm2718_vm6, %v2716_v35, %v2720_v6  ;;  %vm4097_vm3 = vcmask 1043456  }
 0x7b1   :  { %2471 = vmax.xlane.f32.xlu0 %v2470_v45  ;;  %2468 = vmax.xlane.f32.xlu1 %v2467_v29  ;;  %v2721_v15 = vsel %vm2717_vm7, %v2715_v26, %v2719_v14  ;;  %v2599_v44 = vsel %vm478_vm8, %v6700_v58, -inf  ;;  %v2596_v7 = vsel %vm478_vm8, %v6707_v41, -inf  ;;  %v6714_v31 = vadd.f32 %v2722_v4, %v6321_v10 }
 0x7b2   :  { %v6717_v49 = vadd.f32 %v2721_v15, %v6323_v11  ;;  %vm4093_vm5 = vcmask 719872  }
 0x7b3   :  { %v2728_v17 = vsel %vm478_vm8, %v6714_v31, -inf }
 0x7b4   :  { %v2725_v18 = vsel %vm478_vm8, %v6717_v49, -inf }
 0x7b5   :  { %2600 = vmax.xlane.f32.xlu0 %v2599_v44  ;;  %2597 = vmax.xlane.f32.xlu1 %v2596_v7 }
 0x7b9   :  { %2729 = vmax.xlane.f32.xlu0 %v2728_v17  ;;  %2726 = vmax.xlane.f32.xlu1 %v2725_v18 }
 0x816   :  { %v2158_v50 = vpop.xlane.xlu0 %2157  ;;  %v2023_v59 = vpop.xlane.xlu1 %2022 }
 0x817   :  { %v2160_v52 = vsub.f32 %v6661_v53, %v2158_v50  ;;  %v2025_v10 = vsub.f32 %v6664_v42, %v2023_v59 }
 0x819   :  { %v2028_v32 = vmul.f32 1.442695, %v2025_v10  ;;  %v2163_v12 = vmul.f32 1.442695, %v2160_v52 }
 0x81a   :  { %v2293_v11 = vpop.xlane.xlu0 %2292  ;;  %v2290_v38 = vpop.xlane.xlu1 %2289 }
 0x81b   :  { %v2295_v33 = vsub.f32 %v6671_v55, %v2293_v11  ;;  %5640 = vpow2.f32 %v2028_v32  ;;  %v2294_v20 = vsub.f32 %v6674_v1, %v2290_v38 }
 0x81c   :  { %5642 = vpow2.f32 %v2163_v12 }
 0x81d   :  { %v2298_v34 = vmul.f32 1.442695, %v2295_v33  ;;  %v2296_v42 = vmul.f32 1.442695, %v2294_v20 }
 0x81e   :  { %v2020_v40 = vpop.xlane.xlu0 %2019 }
 0x81f   :  { %v2024_v43 = vsub.f32 %v6681_v24, %v2020_v40  ;;  %5644 = vpow2.f32 %v2298_v34 }
 0x821   :  { %v2026_v21 = vmul.f32 1.442695, %v2024_v43 }
 0x822   :  { %v2155_v47 = vpop.xlane.xlu0 %2154 }
 0x823   :  { %5646 = vpow2.f32 %v2026_v21  ;;  %v2159_v53 = vsub.f32 %v6686_v25, %v2155_v47 }
 0x825   :  { %v2161_v54 = vmul.f32 1.442695, %v2159_v53  ;;  %v6729_v3 = vpop.eup %5640 }
 0x826   :  { %v2033_v55 = vsel %vm478_vm8, %v6729_v3, 0.0  ;;  %v6733_v26 = vpop.eup %5642 }
 0x827   :  { %5648 = vpow2.f32 %v2161_v54  ;;  %2034 = vadd.xlane.f32.xlu0 %v2033_v55  ;;  %v2168_v1 = vsel %vm478_vm8, %v6733_v26, 0.0 }
 0x828   :  { %5650 = vpow2.f32 %v2296_v42 }
 0x829   :  { %v6737_v24 = vpop.eup %5644 }
 0x82a   :  { %v2303_v27 = vsel %vm478_vm8, %v6737_v24, 0.0 }
 0x82b   :  { %2169 = vadd.xlane.f32.xlu0 %v2168_v1 }
 0x82d   :  { %v6739_v35 = vpop.eup %5646 }
 0x82e   :  { %v2030_v25 = vsel %vm478_vm8, %v6739_v35, 0.0 }
 0x82f   :  { %2031 = vadd.xlane.f32.xlu1 %v2030_v25  ;;  %2304 = vadd.xlane.f32.xlu0 %v2303_v27 }
 0x831   :  { %v6745_v22 = vpop.eup %5648 }
 0x832   :  { %v2165_v57 = vsel %vm478_vm8, %v6745_v22, 0.0  ;;  %v6749_v51 = vpop.eup %5650 }
 0x833   :  { %2166 = vadd.xlane.f32.xlu1 %v2165_v57  ;;  %v2300_v5 = vsel %vm478_vm8, %v6749_v51, 0.0 }
 0x837   :  { %2301 = vadd.xlane.f32.xlu1 %v2300_v5 }
 0x83e   :  { %v2472_v13 = vpop.xlane.xlu0 %2471  ;;  %v2469_v6 = vpop.xlane.xlu1 %2468 }
 0x83f   :  { %v2474_v46 = vsub.f32 %v6694_v8, %v2472_v13  ;;  %v2473_v9 = vsub.f32 %v6697_v37, %v2469_v6 }
 0x841   :  { %v2477_v45 = vmul.f32 1.442695, %v2474_v46  ;;  %v2475_v29 = vmul.f32 1.442695, %v2473_v9 }
 0x842   :  { %v2601_v14 = vpop.xlane.xlu0 %2600  ;;  %v2598_v4 = vpop.xlane.xlu1 %2597 }
 0x843   :  { %5652 = vpow2.f32 %v2477_v45  ;;  %v2603_v15 = vsub.f32 %v6700_v58, %v2601_v14  ;;  %v2602_v44 = vsub.f32 %v6707_v41, %v2598_v4 }
 0x844   :  { %5654 = vpow2.f32 %v2475_v29 }
 0x845   :  { %v2606_v7 = vmul.f32 1.442695, %v2603_v15  ;;  %v2604_v17 = vmul.f32 1.442695, %v2602_v44 }
 0x846   :  { %v2730_v18 = vpop.xlane.xlu0 %2729  ;;  %v2727_v50 = vpop.xlane.xlu1 %2726 }
 0x847   :  { %5656 = vpow2.f32 %v2606_v7  ;;  %v2732_v59 = vsub.f32 %v6714_v31, %v2730_v18  ;;  %v2731_v8 = vsub.f32 %v6717_v49, %v2727_v50  ;;  %v2843_v7 = vld [vmem:[%s7338_s13 + $0x8] sm:$0xff]  ;;  %v2845_v50 = vld [vmem:[%s7338_s13 + $0x18] sm:$0xff] }
 0x848   :  { %5658 = vpow2.f32 %v2604_v17  ;;  %v2844_v17 = vld [vmem:[%s7338_s13 + $0x10] sm:$0xff] }
 0x849   :  { %v2735_v37 = vmul.f32 1.442695, %v2732_v59  ;;  %v2733_v52 = vmul.f32 1.442695, %v2731_v8  ;;  %v5301_v59 = vpack.c.bf16 %v2845_v50, %v2844_v17  ;;  %v2846_v8 = vld [vmem:[%s7338_s13 + $0x20] sm:$0xff] }
 0x84a   :  { %v5434_v50 = vld [vmem:[%s7339_s15 + $0x28] ss:$20 sps:$4 sm:$0xff]  }
 0x84b   :  { %5660 = vpow2.f32 %v2735_v37  ;;  %v2847_v37 = vld [vmem:[%s7338_s13 + $0x28] sm:$0xff] }
 0x84c   :  { %5662 = vpow2.f32 %v2733_v52  ;;  %v5305_v52 = vpack.c.bf16 %v2847_v37, %v2846_v8 }
 0x84d   :  { %v6759_v10 = vpop.eup %5652 }
 0x84e   :  { %v6761_v58 = vpop.eup %5654  ;;  %v2482_v41 = vsel %vm478_vm8, %v6759_v10, 0.0 }
 0x84f   :  { %2483 = vadd.xlane.f32.xlu0 %v2482_v41  ;;  %v2479_v32 = vsel %vm478_vm8, %v6761_v58, 0.0  ;;  %v4618_v41 = vld [vmem:[#allocation9] ss:$0 sm:$0xff] }
 0x850   :  { %2480 = vadd.xlane.f32.xlu1 %v2479_v32  ;;  %v4621_v32 = vld [vmem:[#allocation9 + $0x1] ss:$0 sm:$0xff] }
 0x851   :  { %v6767_v31 = vpop.eup %5656 }
 0x852   :  { %v6769_v49 = vpop.eup %5658  ;;  %v2611_v12 = vsel %vm478_vm8, %v6767_v31, 0.0 }
 0x853   :  { %2612 = vadd.xlane.f32.xlu0 %v2611_v12  ;;  %v2608_v11 = vsel %vm478_vm8, %v6769_v49, 0.0 }
 0x854   :  { %2609 = vadd.xlane.f32.xlu1 %v2608_v11 }
 0x855   :  { %v6775_v33 = vpop.eup %5660 }
 0x856   :  { %v6777_v34 = vpop.eup %5662  ;;  %v2740_v38 = vsel %vm478_vm8, %v6775_v33, 0.0 }
 0x857   :  { %2741 = vadd.xlane.f32.xlu0 %v2740_v38  ;;  %v2737_v40 = vsel %vm478_vm8, %v6777_v34, 0.0  ;;  %v4624_v38 = vld [vmem:[#allocation9 + $0x2] ss:$0 sm:$0xff] }
 0x858   :  { %2738 = vadd.xlane.f32.xlu1 %v2737_v40 }
 0x88b   :  { %5416 = vxpose.xlu1.b32.start [1/2] (short) (narrow) %v5415_v39, 8 }
 0x88f   :  { %5418 = vxpose.xlu1.b32.end [2/2] (short) (narrow) %v5417_v36, 8 }
 0x8b4   :  { %v2035_v43 = vpop.xlane.xlu0 %2034 }
 0x8b5   :  { %5664 = vrcp.f32 %v2035_v43 }
 0x8b8   :  { %v2170_v20 = vpop.xlane.xlu0 %2169 }
 0x8bc   :  { %v2032_v21 = vpop.xlane.xlu1 %2031  ;;  %v2305_v53 = vpop.xlane.xlu0 %2304 }
 0x8bd   :  { %5666 = vrcp.f32 %v2032_v21 }
 0x8be   :  { %5668 = vrcp.f32 %v2170_v20 }
 0x8bf   :  { %v5665_v54 = vpop.eup %5664 }
 0x8c0   :  { %v2167_v47 = vpop.xlane.xlu1 %2166  ;;  %v2039_v16 = vmul.f32 %v5665_v54, %v6729_v3 }
 0x8c1   :  { %5670 = vrcp.f32 %v2167_v47 }
 0x8c2   :  { %5672 = vrcp.f32 %v2305_v53 }
 0x8c4   :  { %v2302_v42 = vpop.xlane.xlu1 %2301 }
 0x8c5   :  { %5674 = vrcp.f32 %v2302_v42 }
 0x8c7   :  { %v5667_v55 = vpop.eup %5666 }
 0x8c8   :  { %v2038_v60 = vmul.f32 %v5667_v55, %v6739_v35  ;;  %v5669_v28 = vpop.eup %5668 }
 0x8c9   :  { %v2174_v39 = vmul.f32 %v5669_v28, %v6733_v26 }
 0x8ca   :  { %5081 = vmatprep.mubr.msk.f32.mxu0 %vm478_vm8, %v2038_v60 }
 0x8cb   :  { %v5671_v23 = vpop.eup %5670  ;;  %5082 = vmatmul.mubr.msk.f32.vlgmr.msra.gmra.mrb[20].mxu0 %vm478_vm8, %v2039_v16 }
 0x8cc   :  { %5284 = vmatpush3.bf16.msra.mxu0 %v6617_v48  ;;  %v2173_v36 = vmul.f32 %v5671_v23, %v6745_v22  ;;  %v5673_v1 = vpop.eup %5672 }
 0x8cd   :  { %5290 = vmatprep.subr.bf16.mxu0 %v6636_v30  ;;  %v2309_v25 = vmul.f32 %v5673_v1, %v6737_v24 }
 0x8ce   :  { %5088 = vmatprep.mubr.msk.f32.mxu1 %vm478_vm8, %v2173_v36 }
 0x8cf   :  { %v5675_v35 = vpop.eup %5674  ;;  %5089 = vmatmul.mubr.msk.f32.vlgmr.msra.gmra.mrb[20].mxu1 %vm478_vm8, %v2174_v39 }
 0x8d0   :  { %5288 = vmatpush3.bf16.msra.mxu1 %v6636_v30  ;;  %v2308_v3 = vmul.f32 %v5675_v35, %v6749_v51 }
 0x8d1   :  { %5294 = vmatprep.subr.bf16.mxu1 %v6636_v30 }
 0x8d2   :  { %5095 = vmatprep.mubr.msk.f32.mxu0 %vm478_vm8, %v2308_v3 }
 0x8d3   :  { %5096 = vmatmul.mubr.msk.f32.vlgmr.msra.gmra.mrb[22].mxu0 %vm478_vm8, %v2309_v25 }
 0x8d4   :  { %5292 = vmatpush3.bf16.msra.mxu0 %v6636_v30 }
 0x8dc   :  { %v2484_v48 = vpop.xlane.xlu0 %2483 }
 0x8dd   :  { %5676 = vrcp.f32 %v2484_v48  ;;  %v2481_v26 = vpop.xlane.xlu1 %2480 }
 0x8de   :  { %5678 = vrcp.f32 %v2481_v26 }
 0x8e0   :  { %v2613_v27 = vpop.xlane.xlu0 %2612 }
 0x8e1   :  { %5680 = vrcp.f32 %v2613_v27  ;;  %v2610_v22 = vpop.xlane.xlu1 %2609 }
 0x8e2   :  { %5682 = vrcp.f32 %v2610_v22 }
 0x8e4   :  { %v2742_v57 = vpop.xlane.xlu0 %2741 }
 0x8e5   :  { %5684 = vrcp.f32 %v2742_v57  ;;  %v2739_v51 = vpop.xlane.xlu1 %2738 }
 0x8e6   :  { %5686 = vrcp.f32 %v2739_v51 }
 0x8e7   :  { %v5677_v24 = vpop.eup %5676 }
 0x8e8   :  { %v5679_v5 = vpop.eup %5678  ;;  %v2488_v13 = vmul.f32 %v5677_v24, %v6759_v10 }
 0x8e9   :  { %v2487_v6 = vmul.f32 %v5679_v5, %v6761_v58 }
 0x8eb   :  { %v5681_v46 = vpop.eup %5680  ;;  %5102 = vmatprep.mubr.msk.f32.mxu1 %vm478_vm8, %v2487_v6 }
 0x8ec   :  { %v5683_v9 = vpop.eup %5682  ;;  %v2617_v45 = vmul.f32 %v5681_v46, %v6767_v31  ;;  %5103 = vmatmul.mubr.msk.f32.vlgmr.msra.gmra.mrb[22].mxu1 %vm478_vm8, %v2488_v13 }
 0x8ed   :  { %5296 = vmatpush3.bf16.msra.mxu1 %v6636_v30  ;;  %v2616_v29 = vmul.f32 %v5683_v9, %v6769_v49  ;;  %v2842_v30 = vld [vmem:[%s7338_s13] sm:$0xff] }
 0x8ee   :  { %v5297_v18 = vpack.c.bf16 %v2843_v7, %v2842_v30 }
 0x8ef   :  { %v5685_v14 = vpop.eup %5684  ;;  %5109 = vmatprep.mubr.msk.f32.mxu0 %vm478_vm8, %v2616_v29 }
 0x8f0   :  { %v5687_v4 = vpop.eup %5686  ;;  %v2746_v15 = vmul.f32 %v5685_v14, %v6775_v33  ;;  %5110 = vmatmul.mubr.msk.f32.vlgmr.msra.gmra.mrb[24].mxu0 %vm478_vm8, %v2617_v45  ;;  %5298 = vmatprep.subr.bf16.mxu1 %v5297_v18 }
 0x8f1   :  { %v2745_v44 = vmul.f32 %v5687_v4, %v6777_v34 }
 0x8f3   :  { %5116 = vmatprep.mubr.msk.f32.mxu1 %vm478_vm8, %v2745_v44 }
 0x8f4   :  { %5117 = vmatmul.mubr.msk.f32.vlgmr.msra.gmra.mrb[24].mxu1 %vm478_vm8, %v2746_v15 }
 0x8f5   :  { %5300 = vmatpush3.bf16.msra.mxu1 %v5297_v18 }
 0x8f6   :  { %5302 = vmatprep.subr.bf16.mxu1 %v5301_v59 }
 0x8f9   :  { %5304 = vmatpush3.bf16.msra.mxu1 %v5301_v59  ;;  %v5436_v59 = vld [vmem:[%s7339_s15 + $0x2c] ss:$20 sps:$4 sm:$0xff]  }
 0x8fa   :  { %5306 = vmatprep.subr.bf16.mxu1 %v5305_v52 }
 0x8fd   :  { %5308 = vmatpush3.bf16.msra.mxu1 %v5305_v52  ;;  %v5439_v52 = vld [vmem:[%s7339_s15 + $0x34] ss:$20 sps:$4 sm:$0xff]  }
 0x8fe   :  { %3139 = vmatprep.subr.bf16.mxu1 %v5436_v59 }
 0x90b   :  { %v5419_v18 = vpop.trf.xlu1 }
 0x90c   :  { %v5423_v8 = vunpack.i.h.bf16 %v5419_v18  ;;  %v5420_v37 = vunpack.i.l.bf16 %v5419_v18 }
 0x99e   :  { %v5083_v10 = vpop.f32.mrb[20].mxu0 }
 0x99f   :  { %v2112_v58 = vpop.f32.mrb[21].mxu0  ;;  %v2128_v49 = vmul.f32 %v5083_v10, %v4618_v41  ;;  %v5963_v10 = vmov 0.0  }
 0x9a0   :  { %v2127_v33 = vmul.f32 %v4618_v41, %v2112_v58  ;;  %5137 = vmatprep.subr.bf16.mxu0 %v5963_v10  ;;  %v5440_v58 = vld [vmem:[%s7339_s15 + $0x38] ss:$20 sps:$4 sm:$0xff]   ;;  %5139 = vmatprep.mubr.msk.bf16.mxu0 %vm5964_vm14, %v5963_v10 }
 0x9a1   :  { %5138 = vmatpush3.bf16.msra.mxu0 %v5440_v58 }
 0x9a2   :  { %v5090_v31 = vpop.f32.mrb[20].mxu1 }
 0x9a3   :  { %v2263_v12 = vmul.f32 %v5090_v31, %v4621_v32  ;;  %v2247_v11 = vpop.f32.mrb[21].mxu1 }
 0x9a4   :  { %v2262_v34 = vmul.f32 %v4621_v32, %v2247_v11  ;;  %v5443_v11 = vld [vmem:[%s7339_s15 + $0x4] ss:$20 sps:$4 sm:$0xff]  }
 0x9a5   :  { %v2265_v40 = vadd.f32 %v2263_v12, %v2128_v49  ;;  %v5437_v49 = vld [vmem:[%s7339_s15 + $0x30] ss:$20 sps:$4 sm:$0xff]  }
 0x9a6   :  { %v2264_v43 = vadd.f32 %v2262_v34, %v2127_v33  ;;  %v5097_v20 = vpop.f32.mrb[22].mxu0  ;;  %v5444_v33 = vld [vmem:[%s7339_s15 + $0x8] ss:$20 sps:$4 sm:$0xff]   ;;  %v2952_v34 = vld [vmem:[%s7383_s2] sm:$0x3] }
 0x9a7   :  { %v2398_v21 = vmul.f32 %v5097_v20, %v4624_v38  ;;  %v2382_v47 = vpop.f32.mrb[23].mxu0  ;;  %v5450_v20 = vld [vmem:[%s7339_s15 + $0x5c] ss:$20 sps:$4 sm:$0xff]  }
 0x9a8   :  { %v2397_v53 = vmul.f32 %v4624_v38, %v2382_v47 }
 0x9a9   :  { %v2400_v42 = vadd.f32 %v2398_v21, %v2265_v40  ;;  %v3108_v40 = vpack.c.bf16 %v2952_v34, %v2952_v34  ;;  %v5448_v21 = vld [vmem:[%s7339_s15 + $0x58] ss:$20 sps:$4 sm:$0xff]  }
 0x9aa   :  { %v2399_v54 = vadd.f32 %v2397_v53, %v2264_v43  ;;  %v5447_v43 = vld [vmem:[%s7339_s15 + $0x10] ss:$20 sps:$4 sm:$0xff]  }
 0x9ab   :  { %v2405_v55 = vmul.f32 1.442695, %v2400_v42  ;;  %vm2402_vm11 = vcmp.gt.f32.partialorder %v2400_v42, 0.0  ;;  %v5460_v34 = vld [vmem:[%s7341_s17 + $0x4] ss:$8 sps:$4 sm:$0xff]  }
 0x9ac   :  { %v2403_v60 = vmul.f32 1.442695, %v2399_v54  ;;  %vm2401_vm9 = vcmp.gt.f32.partialorder %v2399_v54, 0.0 }
 0x9ad   :  { %5688 = vpow2.f32 %v2405_v55 }
 0x9ae   :  { %5690 = vpow2.f32 %v2403_v60 }
 0x9b7   :  { %v5689_v16 = vpop.eup %5688 }
 0x9b8   :  { %v5691_v28 = vpop.eup %5690  ;;  %v4626_v23 = vadd.f32 -1.0, %v5689_v16 }
 0x9b9   :  { %v4625_v36 = vadd.f32 -1.0, %v5691_v28 }
 0x9ba   :  { %v2410_v1 = vsel %vm2402_vm11, %v2400_v42, %v4626_v23  ;;  %v4635_v42 = vld [vmem:[#allocation3] ss:$0 sm:$0xff]  ;;  %vm4529_vm11 = vcmask 517120  }
 0x9bb   :  { %v2409_v39 = vsel %vm2401_vm9, %v2399_v54, %v4625_v36  ;;  %vm4366_vm9 = vcmask 523264  }
 0x9bc   :  { %5131 = vmatprep.mubr.msk.f32.mxu1 %vm1773_vm10, %v2409_v39 }
 0x9bd   :  { %5132 = vmatmul.mubr.msk.f32.vlgmr.msra.gmra.mrb[26].mxu1 %vm1773_vm10, %v2410_v1  ;;  %v5451_v1 = vld [vmem:[%s7339_s15 + $0x50] ss:$20 sps:$4 sm:$0xff]  }
 0x9be   :  { %3140 = vmatpush1.bf16.msra.mxu1 %v5434_v50 }
 0x9bf   :  { %v5104_v35 = vpop.f32.mrb[22].mxu1  ;;  %3180 = vmatprep.subr.bf16.mxu1 %v5439_v52 }
 0x9c0   :  { %v2561_v3 = vpop.f32.mrb[23].mxu1  ;;  %v2571_v48 = vmul.f32 %v5104_v35, %v4618_v41  ;;  %v5453_v35 = vld [vmem:[%s7339_s15 + $0x54] ss:$20 sps:$4 sm:$0xff]  }
 0x9c1   :  { %v2570_v22 = vmul.f32 %v4618_v41, %v2561_v3  ;;  %v3018_v41 = vrot.slane %v5420_v37, 7  ;;  %v5457_v3 = vld [vmem:[%s7341_s17 + $0x104] ss:$8 sps:$4 sm:$0xff]  }
 0x9c3   :  { %v5111_v25 = vpop.f32.mrb[24].mxu0 }
 0x9c4   :  { %v2700_v26 = vmul.f32 %v5111_v25, %v4621_v32  ;;  %v2690_v27 = vpop.f32.mrb[25].mxu0 }
 0x9c5   :  { %v2699_v57 = vmul.f32 %v4621_v32, %v2690_v27  ;;  %v5446_v32 = vld [vmem:[%s7339_s15 + $0xc] ss:$20 sps:$4 sm:$0xff]  }
 0x9c6   :  { %v2702_v51 = vadd.f32 %v2700_v26, %v2571_v48  ;;  %3331 = vmatprep.subr.bf16.mxu0 %v5446_v32 }
 0x9c7   :  { %v2701_v24 = vadd.f32 %v2699_v57, %v2570_v22  ;;  %v5118_v5 = vpop.f32.mrb[24].mxu1 }
 0x9c8   :  { %v2829_v13 = vmul.f32 %v5118_v5, %v4624_v38  ;;  %v2819_v6 = vpop.f32.mrb[25].mxu1 }
 0x9c9   :  { %v2828_v46 = vmul.f32 %v4624_v38, %v2819_v6  ;;  %v5441_v38 = vld [vmem:[%s7339_s15] ss:$20 sps:$4 sm:$0xff]  }
 0x9ca   :  { %v2831_v9 = vadd.f32 %v2829_v13, %v2702_v51 }
 0x9cb   :  { %v2830_v45 = vadd.f32 %v2828_v46, %v2701_v24 }
 0x9cc   :  { %v2836_v29 = vmul.f32 1.442695, %v2831_v9  ;;  %vm2833_vm13 = vcmp.gt.f32.partialorder %v2831_v9, 0.0 }
 0x9cd   :  { %v2834_v14 = vmul.f32 1.442695, %v2830_v45  ;;  %vm2832_vm12 = vcmp.gt.f32.partialorder %v2830_v45, 0.0 }
 0x9ce   :  { %5692 = vpow2.f32 %v2836_v29 }
 0x9cf   :  { %5694 = vpow2.f32 %v2834_v14 }
 0x9d8   :  { %v5693_v4 = vpop.eup %5692 }
 0x9d9   :  { %v5695_v15 = vpop.eup %5694  ;;  %v4634_v44 = vadd.f32 -1.0, %v5693_v4 }
 0x9da   :  { %v4633_v30 = vadd.f32 -1.0, %v5695_v15 }
 0x9db   :  { %v2841_v17 = vsel %vm2833_vm13, %v2831_v9, %v4634_v44 }
 0x9dc   :  { %v2840_v7 = vsel %vm2832_vm12, %v2830_v45, %v4633_v30 }
 0x9dd   :  { %5134 = vmatprep.mubr.msk.f32.mxu1 %vm1773_vm10, %v2840_v7 }
 0x9de   :  { %5135 = vmatmul.mubr.msk.f32.gmra.mrb[28].mxu1 %vm1773_vm10, %v2841_v17  ;;  %vm3020_vm10 = vcmask 1040384  }
 0x9df   :  { %3171 = vmatprep.mubr.bf16.mxu1 %v5958_v2  ;;  %v3021_v31 = vsel %vm3020_vm10, %v5423_v8, %v3018_v41 }
 0x9e0   :  { %v3109_v12 = vpack.c.bf16 %v3021_v31, %v3021_v31 }
 0x9e2   :  { %4645 = vmatmul.mubr.msk.bf16.vlgmr.msra.gmra.mrb[32].mxu1 %vm478_vm8, %v3109_v12  ;;  %5140 = vmatmul.mubr.msk.bf16.vlgmr.msra.gmra.mrb[28].mxu0 %vm478_vm8, %v3109_v12 }
 0x9e3   :  { %3181 = vmatpush1.bf16.msra.mxu1 %v5437_v49  ;;  %3212 = vmatprep.mubr.bf16.mxu1 %v5958_v2 }
 0x9e4   :  { %3290 = vmatprep.subr.bf16.mxu1 %v5443_v11  ;;  %3332 = vmatpush1.bf16.msra.mxu0 %v5444_v33  ;;  %v5455_v33 = vld [vmem:[%s7341_s17 + $0x100] ss:$8 sps:$4 sm:$0xff]  }
 0x9e5   :  { %3363 = vmatprep.mubr.bf16.mxu0 %v5958_v2  ;;  %3442 = vmatprep.subr.bf16.mxu0 %v5453_v35  ;;  %v5485_v35 = vld [vmem:[%s7341_s17 + $0x150] ss:$8 sps:$4 sm:$0xff]  }
 0x9ea   :  { %4646 = vmatmul.mubr.msk.bf16.vlgmr.msra.gmra.mrb[36].mxu1 %vm478_vm8, %v3109_v12  ;;  %4654 = vmatmul.mubr.msk.bf16.vlgmr.msra.gmra.mrb[32].mxu0 %vm478_vm8, %v3108_v40  ;;  %v5454_v12 = vld [vmem:[%s7339_s15 + $0x60] ss:$20 sps:$4 sm:$0xff]   ;;  %s4539_s15 = sshll.u32 %s5966_s12, 4  ;;  %s4540_s15 = int_to_ptr.vmem [resolvable:$true] %s4539_s15 }
 0x9eb   :  { %3291 = vmatpush1.bf16.msra.mxu1 %v5441_v38  ;;  %3322 = vmatprep.mubr.bf16.mxu1 %v5958_v2  ;;  %v5463_v38 = vld [vmem:[%s7341_s17 + $0x114] ss:$8 sps:$4 sm:$0xff]   ;;  %s5890_s30 = scalar_lea.vmem %s4540_s15, 32  ;;  %p5895_p9 = scmp.lt.s32.totalorder %s4540_s15, %s4540_s15 }
 0x9ec   :  { %5143 = vmatprep.subr.bf16.mxu1 %v5963_v10  ;;  %3474 = vmatprep.mubr.bf16.mxu0 %v5958_v2  ;;  %p5891_p8 = scmp.ne.s32.totalorder %s4540_s15, %s5890_s30  ;;  %p5896_p10 = scmp.lt.s32.totalorder %s5890_s30, %s5890_s30 }
 0x9ed   :  { %3443 = vmatpush1.bf16.msra.mxu0 %v5451_v1  ;;  %v5484_v1 = vld [vmem:[%s7341_s17 + $0x44] ss:$8 sps:$4 sm:$0xff]  }
 0x9ee   :  { %5149 = vmatprep.subr.bf16.mxu0 %v5963_v10  ;;  %p5897_p11 = por %p5896_p10, %p5895_p9 }
 0x9f0   :  { %p5898_p12 = pnand %p5897_p11, %p5891_p8 }
 0x9f2   :  { %4653 = vmatmul.mubr.msk.bf16.vlgmr.msra.gmra.mrb[40].mxu1 %vm478_vm8, %v3108_v40 }
 0x9f3   :  { %5144 = vmatpush3.bf16.msra.mxu1 %v5447_v43  ;;  %5145 = vmatprep.mubr.msk.bf16.mxu1 %vm5964_vm14, %v5963_v10  ;;  %v5469_v43 = vld [vmem:[%s7341_s17 + $0x124] ss:$8 sps:$4 sm:$0xff]  }
 0x9f4   :  { %3483 = vmatprep.subr.bf16.mxu1 %v5450_v20  ;;  %v5458_v20 = vld [vmem:[%s7341_s17] ss:$8 sps:$4 sm:$0xff]  }
 0x9fa   :  { %5146 = vmatmul.mubr.msk.bf16.vlgmr.msra.gmra.mrb[44].mxu1 %vm478_vm8, %v3108_v40  ;;  %v5461_v40 = vld [vmem:[%s7341_s17 + $0x110] ss:$8 sps:$4 sm:$0xff]  }
 0x9fb   :  { %3484 = vmatpush1.bf16.msra.mxu1 %v5448_v21  ;;  %3515 = vmatprep.mubr.bf16.mxu1 %v5958_v2  ;;  %v5466_v21 = vld [vmem:[%s7341_s17 + $0x14] ss:$8 sps:$4 sm:$0xff]  }
 0x9fc   :  { %4145 = vmatprep.subr.bf16.mxu1 %v5457_v3  ;;  %v5493_v3 = vld [vmem:[%s7341_s17 + $0x164] ss:$8 sps:$4 sm:$0xff]  }
 0xa90   :  { %v5133_v47 = vpop.f32.mrb[26].mxu1 }
 0xa91   :  { %v2933_v53 = vpop.f32.mrb[27].mxu1  ;;  %v2939_v55 = vadd.f32 %v5133_v47, %v4635_v42  ;;  %v5467_v47 = vld [vmem:[%s7341_s17 + $0x120] ss:$8 sps:$4 sm:$0xff]  }
 0xa92   :  { %v2934_v28 = vadd.f32 %v4635_v42, %v2933_v53  ;;  %v5475_v53 = vld [vmem:[%s7341_s17 + $0x134] ss:$8 sps:$4 sm:$0xff]  }
 0xab1   :  { %v5136_v54 = vpop.f32.mrb[28].mxu1 }
 0xab2   :  { %v2949_v60 = vadd.f32 %v5136_v54, %v4635_v42  ;;  %v2943_v16 = vpop.f32.mrb[29].mxu1  ;;  %v5472_v54 = vld [vmem:[%s7341_s17 + $0x24] ss:$8 sps:$4 sm:$0xff]  }
 0xab3   :  { %v2944_v23 = vadd.f32 %v4635_v42, %v2943_v16  ;;  %v5464_v42 = vld [vmem:[%s7341_s17 + $0x10] ss:$8 sps:$4 sm:$0xff]   ;;  %v5470_v16 = vld [vmem:[%s7341_s17 + $0x20] ss:$8 sps:$4 sm:$0xff]  }
 0xab4   :  { %v5426_v36 = vpack.i.bf16 %v2939_v55, %v2949_v60  ;;  %v5473_v55 = vld [vmem:[%s7341_s17 + $0x130] ss:$8 sps:$4 sm:$0xff]   ;;  %v5481_v60 = vld [vmem:[%s7341_s17 + $0x144] ss:$8 sps:$4 sm:$0xff]  }
 0xab5   :  { %v5424_v39 = vpack.i.bf16 %v2934_v28, %v2944_v23  ;;  %v3173_v25 = vpop.f32.mrb[32].mxu1  ;;  %v3255_v48 = vpop.f32.mrb[28].mxu0  ;;  %v5478_v28 = vld [vmem:[%s7341_s17 + $0x34] ss:$8 sps:$4 sm:$0xff]   ;;  %v5479_v23 = vld [vmem:[%s7341_s17 + $0x140] ss:$8 sps:$4 sm:$0xff]  }
 0xab6   :  { %v3175_v26 = vpop.f32.mrb[33].mxu1  ;;  %v5141_v27 = vpop.f32.mrb[29].mxu0 }
 0xab7   :  { %5425 = vxpose.xlu0.b32.start [1/2] (short) (narrow) %v5424_v39, 8  ;;  %v3177_v22 = vpop.f32.mrb[34].mxu1  ;;  %v3258_v57 = vpop.f32.mrb[30].mxu0  ;;  %v5476_v39 = vld [vmem:[%s7341_s17 + $0x30] ss:$8 sps:$4 sm:$0xff]  }
 0xab8   :  { %v3178_v51 = vpop.f32.mrb[35].mxu1  ;;  %v5142_v24 = vpop.f32.mrb[31].mxu0  ;;  %v5499_v27 = vld [vmem:[%s7341_s17 + $0x174] ss:$8 sps:$4 sm:$0xff]   ;;  %v5488_v22 = vld [vmem:[%s7341_s17 + $0x50] ss:$8 sps:$4 sm:$0xff]  }
 0xab9   :  { %v5496_v57 = vld [vmem:[%s7341_s17 + $0x64] ss:$8 sps:$4 sm:$0xff]   ;;  %v5497_v51 = vld [vmem:[%s7341_s17 + $0x170] ss:$8 sps:$4 sm:$0xff]  }
 0xaba   :  { %v5505_v24 = vld [vmem:[%s7341_s17 + $0x184] ss:$8 sps:$4 sm:$0xff]  }
 0xabb   :  { %5427 = vxpose.xlu0.b32.end [2/2] (short) (narrow) %v5426_v36, 8  ;;  %v5487_v36 = vld [vmem:[%s7341_s17 + $0x154] ss:$8 sps:$4 sm:$0xff]  }
 0xabd   :  { %v3214_v5 = vpop.f32.mrb[36].mxu1  ;;  %v3365_v13 = vpop.f32.mrb[32].mxu0 }
 0xabe   :  { %v3216_v6 = vpop.f32.mrb[37].mxu1  ;;  %v6910_v46 = vadd.f32 %v3365_v13, %v3214_v5  ;;  %v3367_v9 = vpop.f32.mrb[33].mxu0  ;;  %v5494_v5 = vld [vmem:[%s7341_s17 + $0x60] ss:$8 sps:$4 sm:$0xff]   ;;  %v5502_v13 = vld [vmem:[%s7341_s17 + $0x74] ss:$8 sps:$4 sm:$0xff]  }
 0xabf   :  { %v3218_v45 = vpop.f32.mrb[38].mxu1  ;;  %v6912_v29 = vadd.f32 %v3367_v9, %v3216_v6  ;;  %v3369_v14 = vpop.f32.mrb[34].mxu0  ;;  %v5503_v6 = vld [vmem:[%s7341_s17 + $0x180] ss:$8 sps:$4 sm:$0xff]   ;;  %v5511_v9 = vld [vmem:[%s7341_s17 + $0x194] ss:$8 sps:$4 sm:$0xff]  }
 0xac0   :  { %v3219_v4 = vpop.f32.mrb[39].mxu1  ;;  %v5500_v45 = vld [vmem:[%s7341_s17 + $0x70] ss:$8 sps:$4 sm:$0xff]   ;;  %v5508_v14 = vld [vmem:[%s7341_s17 + $0x84] ss:$8 sps:$4 sm:$0xff]  }
 0xac1   :  { %v5509_v4 = vld [vmem:[%s7341_s17 + $0x190] ss:$8 sps:$4 sm:$0xff]  }
 0xac5   :  { %v3324_v15 = vpop.f32.mrb[40].mxu1 }
 0xac6   :  { %v6914_v44 = vadd.f32 %v3324_v15, %v3173_v25  ;;  %v3326_v30 = vpop.f32.mrb[41].mxu1  ;;  %v5482_v25 = vld [vmem:[%s7341_s17 + $0x40] ss:$8 sps:$4 sm:$0xff]   ;;  %v5514_v15 = vld [vmem:[%s7341_s17 + $0x94] ss:$8 sps:$4 sm:$0xff]  }
 0xac7   :  { %v6916_v7 = vadd.f32 %v3326_v30, %v3175_v26  ;;  %v3328_v17 = vpop.f32.mrb[42].mxu1  ;;  %v5491_v26 = vld [vmem:[%s7341_s17 + $0x160] ss:$8 sps:$4 sm:$0xff]   ;;  %v5512_v30 = vld [vmem:[%s7341_s17 + $0x90] ss:$8 sps:$4 sm:$0xff]  }
 0xac8   :  { %v3329_v18 = vpop.f32.mrb[43].mxu1  ;;  %v5517_v17 = vld [vmem:[%s7341_s17 + $0x1a4] ss:$8 sps:$4 sm:$0xff]  }
 0xac9   :  { %v5515_v18 = vld [vmem:[%s7341_s17 + $0x1a0] ss:$8 sps:$4 sm:$0xff]  }
 0xacd   :  { %v3406_v50 = vpop.f32.mrb[44].mxu1 }
 0xace   :  { %v6918_v59 = vadd.f32 %v3406_v50, %v3255_v48  ;;  %v5147_v8 = vpop.f32.mrb[45].mxu1  ;;  %v5490_v48 = vld [vmem:[%s7341_s17 + $0x54] ss:$8 sps:$4 sm:$0xff]   ;;  %v5520_v50 = vld [vmem:[%s7341_s17 + $0xa4] ss:$8 sps:$4 sm:$0xff]  }
 0xacf   :  { %v3409_v37 = vpop.f32.mrb[46].mxu1  ;;  %v5518_v8 = vld [vmem:[%s7341_s17 + $0xa0] ss:$8 sps:$4 sm:$0xff]  }
 0xad0   :  { %v5148_v52 = vpop.f32.mrb[47].mxu1  ;;  %v5523_v37 = vld [vmem:[%s7341_s17 + $0x1b4] ss:$8 sps:$4 sm:$0xff]  }
 0xad1   :  { %v5521_v52 = vld [vmem:[%s7341_s17 + $0x1b0] ss:$8 sps:$4 sm:$0xff]  }
 0xae4   :  { %5433 = vset.pattern.permute.xlu0 %v5959_v19  ;;  %v3370_v19 = vpop.f32.mrb[35].mxu0 }
 0xae5   :  { %v5506_v19 = vld [vmem:[%s7341_s17 + $0x80] ss:$8 sps:$4 sm:$0xff]  }
 0xb37   :  { %v5428_v58 = vpop.trf.xlu0 }
 0xb38   :  { %v5429_v41 = vunpack.i.l.bf16 %v5428_v58  ;;  %v5432_v32 = vunpack.i.h.bf16 %v5428_v58  ;;  %v5526_v58 = vld [vmem:[%s7341_s17 + $0xb4] ss:$8 sps:$4 sm:$0xff]  }
 0xb3a   :  { %v3087_v31 = vrot.slane %v5429_v41, 7  ;;  %v5524_v41 = vld [vmem:[%s7341_s17 + $0xb0] ss:$8 sps:$4 sm:$0xff]  }
 0xb3c   :  { %v3089_v49 = vsel %vm3020_vm10, %v5432_v32, %v3087_v31  ;;  %v5529_v32 = vld [vmem:[%s7341_s17 + $0x1c4] ss:$8 sps:$4 sm:$0xff]   ;;  %v5527_v31 = vld [vmem:[%s7341_s17 + $0x1c0] ss:$8 sps:$4 sm:$0xff]  }
 0xb3d   :  { %v3412_v11 = vpack.c.bf16 %v3089_v49, %v3089_v49  ;;  %v5532_v49 = vld [vmem:[%s7341_s17 + $0xc4] ss:$8 sps:$4 sm:$0xff]  }
 0xb3f   :  { %4661 = vmatmul.mubr.msk.bf16.vlgmr.msra.gmra.mrb[36].mxu0 %vm478_vm8, %v3412_v11  ;;  %4662 = vmatmul.mubr.msk.bf16.vlgmr.msra.gmra.mrb[48].mxu1 %vm478_vm8, %v3412_v11 }
 0xb40   :  { %5150 = vmatpush3.bf16.msra.mxu0 %v5454_v12  ;;  %5151 = vmatprep.mubr.msk.bf16.mxu0 %vm5964_vm14, %v5963_v10  ;;  %v5530_v12 = vld [vmem:[%s7341_s17 + $0xc0] ss:$8 sps:$4 sm:$0xff]  }
 0xb41   :  { %4104 = vmatprep.subr.bf16.mxu0 %v5460_v34  ;;  %4146 = vmatpush1.bf16.msra.mxu1 %v5455_v33  ;;  %v5533_v33 = vld [vmem:[%s7341_s17 + $0x1d0] ss:$8 sps:$4 sm:$0xff]   ;;  %v5538_v34 = vld [vmem:[%s7341_s17 + $0xd4] ss:$8 sps:$4 sm:$0xff]  }
 0xb42   :  { %4147 = vmatprep.subr.bf16.mxu1 %v5463_v38  ;;  %v5536_v38 = vld [vmem:[%s7341_s17 + $0xd0] ss:$8 sps:$4 sm:$0xff]  }
 0xb45   :  { %4148 = vmatpush1.bf16.msra.mxu1 %v5461_v40  ;;  %v5541_v40 = vld [vmem:[%s7341_s17 + $0x1e4] ss:$8 sps:$4 sm:$0xff]  }
 0xb46   :  { %4149 = vmatprep.subr.bf16.mxu1 %v5469_v43  ;;  %v5539_v43 = vld [vmem:[%s7341_s17 + $0x1e0] ss:$8 sps:$4 sm:$0xff]  }
 0xb47   :  { %5152 = vmatmul.mubr.msk.bf16.vlgmr.msra.gmra.mrb[40].mxu0 %vm478_vm8, %v3412_v11  ;;  %v5535_v11 = vld [vmem:[%s7341_s17 + $0x1d4] ss:$8 sps:$4 sm:$0xff]  }
 0xb48   :  { %4105 = vmatpush1.bf16.msra.mxu0 %v5458_v20  ;;  %v5544_v20 = vld [vmem:[%s7341_s17 + $0xe4] ss:$8 sps:$4 sm:$0xff]  }
 0xb49   :  { %4106 = vmatprep.subr.bf16.mxu0 %v5466_v21  ;;  %4150 = vmatpush1.bf16.msra.mxu1 %v5467_v47  ;;  %v5542_v21 = vld [vmem:[%s7341_s17 + $0xe0] ss:$8 sps:$4 sm:$0xff]   ;;  %v5547_v47 = vld [vmem:[%s7341_s17 + $0x1f4] ss:$8 sps:$4 sm:$0xff]  }
 0xb4a   :  { %4151 = vmatprep.subr.bf16.mxu1 %v5475_v53  ;;  %v5545_v53 = vld [vmem:[%s7341_s17 + $0x1f0] ss:$8 sps:$4 sm:$0xff]  }
 0xb4c   :  { %4107 = vmatpush1.bf16.msra.mxu0 %v5464_v42  ;;  %v5550_v42 = vld [vmem:[%s7341_s17 + $0xf4] ss:$8 sps:$4 sm:$0xff]  }
 0xb4d   :  { %4108 = vmatprep.subr.bf16.mxu0 %v5472_v54  ;;  %4152 = vmatpush1.bf16.msra.mxu1 %v5473_v55  ;;  %v5548_v54 = vld [vmem:[%s7341_s17 + $0xf0] ss:$8 sps:$4 sm:$0xff]   ;;  %v5553_v55 = vld [vmem:[%s7341_s17 + $0x204] ss:$8 sps:$4 sm:$0xff]  }
 0xb4e   :  { %4153 = vmatprep.subr.bf16.mxu1 %v5481_v60  ;;  %v3569_v60 = vld [vmem:[#allocation10] sm:$0x1f] }
 0xb50   :  { %4109 = vmatpush1.bf16.msra.mxu0 %v5470_v16  ;;  %v3574_v16 = vrot.slane %v3569_v60, %v6302_v61 }
 0xb51   :  { %4110 = vmatprep.subr.bf16.mxu0 %v5478_v28  ;;  %4154 = vmatpush1.bf16.msra.mxu1 %v5479_v23  ;;  %v3582_v28 = vrot.slane %v3569_v60, %v6308_v63 }
 0xb52   :  { %4155 = vmatprep.subr.bf16.mxu1 %v5487_v36 }
 0xb54   :  { %4111 = vmatpush1.bf16.msra.mxu0 %v5476_v39  ;;  %v3578_v39 = vrot.slane %v3569_v60, %v6305_v62 }
 0xb55   :  { %4112 = vmatprep.subr.bf16.mxu0 %v5484_v1  ;;  %4156 = vmatpush1.bf16.msra.mxu1 %v5485_v35  ;;  %v3586_v1 = vrot.slane %v3569_v60, %v6311_v0 }
 0xb56   :  { %4157 = vmatprep.subr.bf16.mxu1 %v5493_v3 }
 0xb58   :  { %4113 = vmatpush1.bf16.msra.mxu0 %v5482_v25 }
 0xb59   :  { %4114 = vmatprep.subr.bf16.mxu0 %v5490_v48  ;;  %4158 = vmatpush1.bf16.msra.mxu1 %v5491_v26 }
 0xb5a   :  { %4159 = vmatprep.subr.bf16.mxu1 %v5499_v27 }
 0xb5c   :  { %4115 = vmatpush1.bf16.msra.mxu0 %v5488_v22 }
 0xb5d   :  { %4116 = vmatprep.subr.bf16.mxu0 %v5496_v57  ;;  %4160 = vmatpush1.bf16.msra.mxu1 %v5497_v51 }
 0xb5e   :  { %4161 = vmatprep.subr.bf16.mxu1 %v5505_v24 }
 0xb60   :  { %4117 = vmatpush1.bf16.msra.mxu0 %v5494_v5 }
 0xb61   :  { %4118 = vmatprep.subr.bf16.mxu0 %v5502_v13  ;;  %4162 = vmatpush1.bf16.msra.mxu1 %v5503_v6 }
 0xb62   :  { %4163 = vmatprep.subr.bf16.mxu1 %v5511_v9 }
 0xb64   :  { %4119 = vmatpush1.bf16.msra.mxu0 %v5500_v45 }
 0xb65   :  { %4120 = vmatprep.subr.bf16.mxu0 %v5508_v14  ;;  %4164 = vmatpush1.bf16.msra.mxu1 %v5509_v4 }
 0xb66   :  { %4165 = vmatprep.subr.bf16.mxu1 %v5517_v17 }
 0xb68   :  { %4121 = vmatpush1.bf16.msra.mxu0 %v5506_v19  ;;  %v3589_v19 = vsub.s32 4, %v6289_v56 }
 0xb69   :  { %4122 = vmatprep.subr.bf16.mxu0 %v5514_v15  ;;  %4166 = vmatpush1.bf16.msra.mxu1 %v5515_v18 }
 0xb6a   :  { %4167 = vmatprep.subr.bf16.mxu1 %v5523_v37 }
 0xb6c   :  { %4123 = vmatpush1.bf16.msra.mxu0 %v5512_v30  ;;  %v3590_v30 = vrot.slane %v3569_v60, %v3589_v19  ;;  %v4261_v19 = vld [vmem:[%s7343_s19 + $0xc0] sm:$0xff] }
 0xb6d   :  { %4124 = vmatprep.subr.bf16.mxu0 %v5520_v50  ;;  %4168 = vmatpush1.bf16.msra.mxu1 %v5521_v52 }
 0xb6e   :  { %4169 = vmatprep.subr.bf16.mxu1 %v5529_v32 }
 0xb70   :  { %4125 = vmatpush1.bf16.msra.mxu0 %v5518_v8 }
 0xb71   :  { %4126 = vmatprep.subr.bf16.mxu0 %v5526_v58  ;;  %4170 = vmatpush1.bf16.msra.mxu1 %v5527_v31 }
 0xb72   :  { %4171 = vmatprep.subr.bf16.mxu1 %v5535_v11 }
 0xb74   :  { %4127 = vmatpush1.bf16.msra.mxu0 %v5524_v41 }
 0xb75   :  { %4128 = vmatprep.subr.bf16.mxu0 %v5532_v49  ;;  %4172 = vmatpush1.bf16.msra.mxu1 %v5533_v33  ;;  %v5551_v33 = vld [vmem:[%s7341_s17 + $0x200] ss:$8 sps:$4 sm:$0xff]  }
 0xb76   :  { %4173 = vmatprep.subr.bf16.mxu1 %v5541_v40  ;;  %v5556_v40 = vld [vmem:[%s7341_s17 + $0x214] ss:$8 sps:$4 sm:$0xff]  }
 0xb78   :  { %4129 = vmatpush1.bf16.msra.mxu0 %v5530_v12 }
 0xb79   :  { %4130 = vmatprep.subr.bf16.mxu0 %v5538_v34  ;;  %4174 = vmatpush1.bf16.msra.mxu1 %v5539_v43  ;;  %v5554_v43 = vld [vmem:[%s7341_s17 + $0x210] ss:$8 sps:$4 sm:$0xff]  }
 0xb7a   :  { %4175 = vmatprep.subr.bf16.mxu1 %v5547_v47  ;;  %v5562_v47 = vld [vmem:[%s7341_s17 + $0x234] ss:$8 sps:$4 sm:$0xff]  }
 0xb7c   :  { %4131 = vmatpush1.bf16.msra.mxu0 %v5536_v38 }
 0xb7d   :  { %4132 = vmatprep.subr.bf16.mxu0 %v5544_v20  ;;  %4176 = vmatpush1.bf16.msra.mxu1 %v5545_v53  ;;  %v5559_v20 = vld [vmem:[%s7341_s17 + $0x224] ss:$8 sps:$4 sm:$0xff]  }
 0xb7e   :  { %4186 = vmatprep.subr.bf16.mxu1 %v5553_v55  ;;  %v5565_v53 = vld [vmem:[%s7341_s17 + $0x244] ss:$8 sps:$4 sm:$0xff]   ;;  %v5563_v55 = vld [vmem:[%s7341_s17 + $0x240] ss:$8 sps:$4 sm:$0xff]  }
 0xb80   :  { %4133 = vmatpush1.bf16.msra.mxu0 %v5542_v21  ;;  %v5557_v21 = vld [vmem:[%s7341_s17 + $0x220] ss:$8 sps:$4 sm:$0xff]  }
 0xb81   :  { %4134 = vmatprep.subr.bf16.mxu0 %v5550_v42  ;;  %v3705_v42 = vld [vmem:[%s7341_s17 + $0x250] sm:$0xff] }
 0xb82   :  { %v4744_v60 = vcombine.high %v3705_v42, %v3705_v42 }
 0xb84   :  { %4135 = vmatpush1.bf16.msra.mxu0 %v5548_v54 }
 0xc12   :  { %v3476_v23 = vpop.f32.mrb[36].mxu0  ;;  %v3517_v36 = vpop.f32.mrb[48].mxu1 }
 0xc13   :  { %v3564_v35 = vadd.f32 %v3476_v23, %v6914_v44  ;;  %v3566_v3 = vadd.f32 %v3517_v36, %v6910_v46  ;;  %v3478_v25 = vpop.f32.mrb[37].mxu0  ;;  %v3519_v48 = vpop.f32.mrb[49].mxu1 }
 0xc14   :  { %v3565_v26 = vadd.f32 %v3478_v25, %v6916_v7  ;;  %v3567_v27 = vadd.f32 %v3519_v48, %v6912_v29  ;;  %v3480_v22 = vpop.f32.mrb[38].mxu0  ;;  %v3521_v57 = vpop.f32.mrb[50].mxu1  ;;  %v4238_v48 = vld [vmem:[%s7343_s19 + $0x8] sm:$0xff] }
 0xc15   :  { %v3596_v51 = vadd.f32 %v3574_v16, %v3564_v35  ;;  %v3598_v63 = vadd.f32 %v3582_v28, %v3566_v3  ;;  %v3481_v24 = vpop.f32.mrb[39].mxu0  ;;  %v3522_v5 = vpop.f32.mrb[51].mxu1  ;;  %v4743_v16 = vcombine.low %v3705_v42, %v3705_v42  ;;  %v4254_v35 = vld [vmem:[%s7343_s19 + $0x88] sm:$0xff]  ;;  %v4237_v3 = vld [vmem:[%s7343_s19] sm:$0xff]  ;;  %v3706_v42 = vld [vmem:[#allocation12] sm:$0x3] }
 0xc16   :  { %v3597_v13 = vadd.f32 %v3578_v39, %v3565_v26  ;;  %v3599_v6 = vadd.f32 %v3586_v1, %v3567_v27  ;;  %v4253_v1 = vld [vmem:[%s7343_s19 + $0x80] sm:$0xff]  ;;  %v4255_v26 = vld [vmem:[%s7343_s19 + $0x90] sm:$0xff]  ;;  %v4256_v27 = vld [vmem:[%s7343_s19 + $0x98] sm:$0xff]  ;;  %v5311_v22 = vpack.c.bf16 %v4238_v48, %v4237_v3 }
 0xc17   :  { %v3606_v9 = vmul.f32 1.442695, %v3596_v51  ;;  %v3610_v0 = vmul.f32 1.442695, %v3598_v63  ;;  %vm3601_vm8 = vcmp.gt.f32.partialorder %v3596_v51, 0.0  ;;  %vm3603_vm15 = vcmp.gt.f32.partialorder %v3598_v63, 0.0 }
 0xc18   :  { %v3608_v45 = vmul.f32 1.442695, %v3597_v13  ;;  %v3612_v44 = vmul.f32 1.442695, %v3599_v6  ;;  %vm3602_vm1 = vcmp.gt.f32.partialorder %v3597_v13, 0.0  ;;  %vm3604_vm2 = vcmp.gt.f32.partialorder %v3599_v6, 0.0 }
 0xc19   :  { %5696 = vpow2.f32 %v3606_v9  ;;  %v4099_v23 = vsel %vm4097_vm3, %v4743_v16, 0  ;;  %v5309_v25 = vpack.c.bf16 %v4254_v35, %v4253_v1  ;;  %v5313_v57 = vpack.c.bf16 %v4256_v27, %v4255_v26  ;;  %v4257_v24 = vld [vmem:[%s7343_s19 + $0xa0] sm:$0xff]  ;;  %v4258_v5 = vld [vmem:[%s7343_s19 + $0xa8] sm:$0xff] }
 0xc1a   :  { %5698 = vpow2.f32 %v3610_v0  ;;  %v3558_v46 = vpop.f32.mrb[40].mxu0  ;;  %v4241_v9 = vld [vmem:[%s7343_s19 + $0x20] sm:$0xff]  ;;  %v4242_v0 = vld [vmem:[%s7343_s19 + $0x28] sm:$0xff] }
 0xc1b   :  { %5700 = vpow2.f32 %v3608_v45  ;;  %v3568_v7 = vadd.f32 %v3558_v46, %v6918_v59  ;;  %v5153_v14 = vpop.f32.mrb[41].mxu0  ;;  %5310 = vmatprep.subr.bf16.mxu0 %v5309_v25  ;;  %v5319_v45 = vpack.c.bf16 %v4242_v0, %v4241_v9  ;;  %v4260_v46 = vld [vmem:[%s7343_s19 + $0xb8] sm:$0xff]  ;;  %v4355_v9 = vld [vmem:[%s7345_s21 + $0x20] sm:$0xff]  ;;  %v4356_v0 = vld [vmem:[%s7345_s21 + $0x28] sm:$0xff] }
 0xc1c   :  { %5702 = vpow2.f32 %v3612_v44  ;;  %v3561_v29 = vpop.f32.mrb[42].mxu0  ;;  %v4259_v44 = vld [vmem:[%s7343_s19 + $0xb0] sm:$0xff] }
 0xc1d   :  { %v5154_v4 = vpop.f32.mrb[43].mxu0  ;;  %v3600_v41 = vadd.f32 %v3590_v30, %v3568_v7  ;;  %v5321_v7 = vpack.c.bf16 %v4260_v46, %v4259_v44  ;;  %v4243_v14 = vld [vmem:[%s7343_s19 + $0x30] sm:$0xff]  ;;  %v4244_v29 = vld [vmem:[%s7343_s19 + $0x38] sm:$0xff] }
 0xc1e   :  { %v5323_v4 = vpack.c.bf16 %v4244_v29, %v4243_v14  ;;  %v4357_v44 = vld [vmem:[%s7345_s21 + $0x30] sm:$0xff]  ;;  %v4358_v46 = vld [vmem:[%s7345_s21 + $0x38] sm:$0xff] }
 0xc1f   :  { %v3614_v38 = vmul.f32 1.442695, %v3600_v41  ;;  %vm3605_vm4 = vcmp.gt.f32.partialorder %v3600_v41, 0.0  ;;  %v4749_v29 = vld [vmem:[#allocation13] ss:$0 sm:$0xff] }
 0xc21   :  { %5704 = vpow2.f32 %v3614_v38 }
 0xc23   :  { %v5697_v15 = vpop.eup %5696 }
 0xc24   :  { %v5699_v17 = vpop.eup %5698  ;;  %v4664_v18 = vadd.f32 -1.0, %v5697_v15  ;;  %v4262_v15 = vld [vmem:[%s7343_s19 + $0xc8] sm:$0xff] }
 0xc25   :  { %v5701_v50 = vpop.eup %5700  ;;  %v4666_v8 = vadd.f32 -1.0, %v5699_v17  ;;  %v5325_v30 = vpack.c.bf16 %v4262_v15, %v4261_v19  ;;  %v4245_v17 = vld [vmem:[%s7343_s19 + $0x40] sm:$0xff] }
 0xc26   :  { %v5703_v37 = vpop.eup %5702  ;;  %v4665_v52 = vadd.f32 -1.0, %v5701_v50  ;;  %v3621_v58 = vsel %vm3601_vm8, %v3596_v51, %v4664_v18  ;;  %v4239_v51 = vld [vmem:[%s7343_s19 + $0x10] sm:$0xff]  ;;  %v4246_v18 = vld [vmem:[%s7343_s19 + $0x48] sm:$0xff] }
 0xc27   :  { %v4667_v59 = vadd.f32 -1.0, %v5703_v37  ;;  %v3623_v32 = vsel %vm3603_vm15, %v3598_v63, %v4666_v8  ;;  %v3626_v56 = vpack.c.bf16 %v3621_v58, %v3621_v58  ;;  %v4240_v63 = vld [vmem:[%s7343_s19 + $0x18] sm:$0xff]  ;;  %v5327_v50 = vpack.c.bf16 %v4246_v18, %v4245_v17  ;;  %v4263_v8 = vld [vmem:[%s7343_s19 + $0xd0] sm:$0xff] }
 0xc28   :  { %v3622_v31 = vsel %vm3602_vm1, %v3597_v13, %v4665_v52  ;;  %v3628_v34 = vpack.c.bf16 %v3623_v32, %v3623_v32  ;;  %v5315_v13 = vpack.c.bf16 %v4240_v63, %v4239_v51  ;;  %v4264_v37 = vld [vmem:[%s7343_s19 + $0xd8] sm:$0xff]  ;;  %v4247_v52 = vld [vmem:[%s7343_s19 + $0x50] sm:$0xff]  ;;  %v4266_v32 = vld [vmem:[%s7343_s19 + $0xe8] sm:$0xff] }
 0xc29   :  { %v3627_v49 = vpack.c.bf16 %v3622_v31, %v3622_v31  ;;  %v3624_v12 = vsel %vm3604_vm2, %v3599_v6, %v4667_v59  ;;  %v5317_v6 = vpack.c.bf16 %v4258_v5, %v4257_v24  ;;  %v5329_v58 = vpack.c.bf16 %v4264_v37, %v4263_v8  ;;  %v4265_v59 = vld [vmem:[%s7343_s19 + $0xe0] sm:$0xff]  ;;  %v4352_v51 = vld [vmem:[%s7345_s21 + $0x8] sm:$0xff]  ;;  %v4353_v5 = vld [vmem:[%s7345_s21 + $0x10] sm:$0xff] }
 0xc2a   :  { %v3629_v11 = vpack.c.bf16 %v3624_v12, %v3624_v12  ;;  %v4249_v12 = vld [vmem:[%s7343_s19 + $0x60] sm:$0xff]  ;;  %v5965_v24 = vmov 0.0|0.0   ;;  %v4446_v37 = vld [vmem:[%s7347_s23 + $0x8] sm:$0xff] }
 0xc2b   :  { %4136 = vmatprep.mubr.bf16.mxu0 %v3627_v49  ;;  %v5705_v54 = vpop.eup %5704  ;;  %v5333_v49 = vpack.c.bf16 %v4266_v32, %v4265_v59  ;;  %v4445_v8 = vld [vmem:[%s7347_s23] sm:$0xff]  ;;  %v4751_v59 = vld [vmem:[#allocation15] ss:$0 sm:$0xff] }
 0xc2c   :  { %4177 = vmatprep.mubr.bf16.mxu1 %v3629_v11  ;;  %4137 = vmatmul.mubr.bf16.vlgmr.msra.gmra.mrb[44].mxu0 %v3626_v56  ;;  %v4668_v28 = vadd.f32 -1.0, %v5705_v54  ;;  %v4250_v56 = vld [vmem:[%s7343_s19 + $0x68] sm:$0xff]  ;;  %v4267_v11 = vld [vmem:[%s7343_s19 + $0xf0] sm:$0xff]  ;;  %v3711_v54 = vrot.slane %v3706_v42, %v6302_v61 }
 0xc2d   :  { %4178 = vmatmul.mubr.bf16.vlgmr.msra.gmra.mrb[52].mxu1 %v3628_v34  ;;  %5312 = vmatpush3.bf16.msra.mxu0 %v5311_v22  ;;  %v5335_v34 = vpack.c.bf16 %v4250_v56, %v4249_v12 }
 0xc2e   :  { %4187 = vmatpush1.bf16.msra.mxu1 %v5551_v33  ;;  %4218 = vmatprep.mubr.bf16.mxu1 %v5958_v2  ;;  %v5560_v2 = vld [vmem:[%s7341_s17 + $0x230] ss:$8 sps:$4 sm:$0xff]   ;;  %v3625_v36 = vsel %vm3605_vm4, %v3600_v41, %v4668_v28 }
 0xc2f   :  { %4188 = vmatprep.subr.bf16.mxu1 %v5556_v40  ;;  %v3630_v39 = vpack.c.bf16 %v3625_v36, %v3625_v36  ;;  %5314 = vmatprep.subr.bf16.mxu0 %v5313_v57  ;;  %v4248_v41 = vld [vmem:[%s7343_s19 + $0x58] sm:$0xff]  ;;  %v4251_v40 = vld [vmem:[%s7343_s19 + $0x70] sm:$0xff]  ;;  %v4351_v57 = vld [vmem:[%s7345_s21] sm:$0xff] }
 0xc30   :  { %v5331_v31 = vpack.c.bf16 %v4248_v41, %v4247_v52  ;;  %v4268_v33 = vld [vmem:[%s7343_s19 + $0xf8] sm:$0xff]  ;;  %v5342_v63 = vpack.c.bf16 %v4352_v51, %v4351_v57  ;;  %v5354_v52 = vpack.c.bf16 %v4446_v37, %v4445_v8 }
 0xc31   :  { %5316 = vmatpush3.bf16.msra.mxu0 %v5315_v13  ;;  %v5337_v38 = vpack.c.bf16 %v4268_v33, %v4267_v11  ;;  %v4354_v13 = vld [vmem:[%s7345_s21 + $0x18] sm:$0xff] }
 0xc32   :  { %4189 = vmatpush1.bf16.msra.mxu1 %v5554_v43  ;;  %5318 = vmatprep.subr.bf16.mxu0 %v5317_v6  ;;  %v4252_v43 = vld [vmem:[%s7343_s19 + $0x78] sm:$0xff]  ;;  %v5345_v6 = vpack.c.bf16 %v4354_v13, %v4353_v5 }
 0xc33   :  { %4190 = vmatprep.subr.bf16.mxu1 %v5559_v20  ;;  %v5339_v20 = vpack.c.bf16 %v4252_v43, %v4251_v40  ;;  %v4448_v41 = vld [vmem:[%s7347_s23 + $0x18] sm:$0xff] }
 0xc35   :  { %5320 = vmatpush3.bf16.msra.mxu0 %v5319_v45  ;;  %v5348_v45 = vpack.c.bf16 %v4356_v0, %v4355_v9 }
 0xc36   :  { %4191 = vmatpush1.bf16.msra.mxu1 %v5557_v21  ;;  %5322 = vmatprep.subr.bf16.mxu0 %v5321_v7  ;;  %v5351_v7 = vpack.c.bf16 %v4358_v46, %v4357_v44 }
 0xc37   :  { %4192 = vmatprep.subr.bf16.mxu1 %v5562_v47 }
 0xc39   :  { %5324 = vmatpush3.bf16.msra.mxu0 %v5323_v4 }
 0xc3a   :  { %4193 = vmatpush1.bf16.msra.mxu1 %v5560_v2  ;;  %5326 = vmatprep.subr.bf16.mxu0 %v5325_v30 }
 0xc3b   :  { %4194 = vmatprep.subr.bf16.mxu1 %v5565_v53 }
 0xc3d   :  { %5328 = vmatpush3.bf16.msra.mxu0 %v5327_v50 }
 0xc3e   :  { %4195 = vmatpush1.bf16.msra.mxu1 %v5563_v55  ;;  %5330 = vmatprep.subr.bf16.mxu0 %v5329_v58  ;;  %v3715_v55 = vrot.slane %v3706_v42, %v6305_v62  ;;  %v4447_v58 = vld [vmem:[%s7347_s23 + $0x10] sm:$0xff] }
 0xc3f   :  { %4745 = vmatprep.subr.msk.bf16.mxu1 %vm4097_vm3, %v4744_v60 }
 0xc41   :  { %5332 = vmatpush3.bf16.msra.mxu0 %v5331_v31 }
 0xc42   :  { %4197 = vmatpush1.bf16.msra.mxu1 %v4099_v23  ;;  %5334 = vmatprep.subr.bf16.mxu0 %v5333_v49 }
 0xc45   :  { %4746 = vmatmul.mubr.msk.bf16.vlgmr.msra.gmra.mrb[52].mxu1 %vm4093_vm5, %v3630_v39  ;;  %5336 = vmatpush3.bf16.msra.mxu0 %v5335_v34 }
 0xc46   :  { %5338 = vmatprep.subr.bf16.mxu0 %v5337_v38 }
 0xc49   :  { %5340 = vmatpush3.bf16.msra.mxu0 %v5339_v20 }
 0xc4a   :  { %5341 = vmatprep.subr.bf16.mxu0 %v5965_v24 }
 0xcff   :  { %v4138_v21 = vpop.f32.mrb[44].mxu0 }
 0xd00   :  { %v4140_v47 = vpop.f32.mrb[45].mxu0  ;;  %v4139_v60 = vadd.f32 %v4138_v21, %v3711_v54 }
 0xd01   :  { %v4142_v2 = vpop.f32.mrb[46].mxu0  ;;  %v4141_v16 = vadd.f32 %v4140_v47, %v3715_v55 }
 0xd02   :  { %v4143_v53 = vpop.f32.mrb[47].mxu0 }
 0xd18   :  { %v4220_v28 = vpop.f32.mrb[52].mxu1 }
 0xd19   :  { %v5360_v23 = vadd.f32 %v4220_v28, %v4139_v60  ;;  %v4222_v36 = vpop.f32.mrb[53].mxu1 }
 0xd1a   :  { %v5362_v39 = vadd.f32 %v4222_v36, %v4141_v16  ;;  %v4224_v1 = vpop.f32.mrb[54].mxu1 }
 0xd1b   :  { %v4229_v35 = vmul.f32 1.442695, %v5360_v23  ;;  %v4225_v3 = vpop.f32.mrb[55].mxu1  ;;  %vm4227_vm7 = vcmp.gt.f32.partialorder %v5360_v23, 0.0 }
 0xd1c   :  { %v4231_v25 = vmul.f32 1.442695, %v5362_v39  ;;  %vm4228_vm6 = vcmp.gt.f32.partialorder %v5362_v39, 0.0 }
 0xd1d   :  { %5706 = vpow2.f32 %v4229_v35 }
 0xd1e   :  { %5708 = vpow2.f32 %v4231_v25 }
 0xd27   :  { %v5707_v48 = vpop.eup %5706 }
 0xd28   :  { %v5709_v26 = vpop.eup %5708  ;;  %v4747_v27 = vadd.f32 -1.0, %v5707_v48 }
 0xd29   :  { %v4748_v22 = vadd.f32 -1.0, %v5709_v26 }
 0xd2a   :  { %v4235_v62 = vsel %vm4227_vm7, %v5360_v23, %v4747_v27 }
 0xd2b   :  { %v4236_v61 = vsel %vm4228_vm6, %v5362_v39, %v4748_v22 }
 0xd2c   :  { %4340 = vmatprep.mubr.f32.mxu0 %v4236_v61 }
 0xd2d   :  { %4341 = vmatmul.mubr.f32.vlgmr.msra.gmra.mrb[26].mxu0 %v4235_v62 }
 0xd2e   :  { %5171 = vmatprep.mubr.msk.f32.mxu0 %vm5964_vm14, %v5963_v10  ;;  %5343 = vmatpush3.bf16.msra.mxu0 %v5342_v63 }
 0xd2f   :  { %5344 = vmatprep.subr.bf16.mxu0 %v5965_v24 }
 0xd32   :  { %5346 = vmatpush3.bf16.msra.mxu0 %v5345_v6 }
 0xd33   :  { %5347 = vmatprep.subr.bf16.mxu0 %v5965_v24 }
 0xd36   :  { %5349 = vmatpush3.bf16.msra.mxu0 %v5348_v45 }
 0xd37   :  { %5350 = vmatprep.subr.bf16.mxu0 %v5965_v24 }
 0xd3a   :  { %5352 = vmatpush3.bf16.msra.mxu0 %v5351_v7 }
 0xd3b   :  { %5353 = vmatprep.subr.bf16.mxu0 %v5965_v24 }
 0xe00   :  { %v4912_v14 = vpop.f32.mrb[26].mxu0 }
 0xe01   :  { %v4913_v4 = vpop.f32.mrb[27].mxu0 }
 0xe02   :  { %v4914_v19 = vadd.f32 %v4913_v4, %v4912_v14 }
 0xe04   :  { %v4343_v15 = vadd.f32 %v4914_v19, %v4749_v29 }
 0xe06   :  { %v4347_v30 = vmul.f32 1.442695, %v4343_v15  ;;  %vm4346_vm12 = vcmp.gt.f32.partialorder %v4343_v15, 0.0 }
 0xe08   :  { %5710 = vpow2.f32 %v4347_v30 }
 0xe12   :  { %v5711_v17 = vpop.eup %5710 }
 0xe13   :  { %v4750_v18 = vadd.f32 -1.0, %v5711_v17 }
 0xe15   :  { %v4350_v50 = vsel %vm4346_vm12, %v4343_v15, %v4750_v18 }
 0xe16   :  { %5172 = vmatmul.mubr.msk.f32.vlgmr.msra.gmra.mrb[48].mxu0 %vm4366_vm9, %v4350_v50  ;;  %4530 = vst.msk [vmem:[#allocation18] sm:$0x3] %vm4529_vm11, %v4350_v50 }
 0xe17   :  { %5182 = vmatprep.mubr.msk.f32.mxu0 %vm5964_vm14, %v5963_v10  ;;  %5355 = vmatpush3.bf16.msra.mxu0 %v5354_v52  ;;  %v5357_v10 = vpack.c.bf16 %v4448_v41, %v4447_v58 }
 0xe18   :  { %5356 = vmatprep.subr.bf16.mxu0 %v5965_v24 }
 0xe1b   :  { %5358 = vmatpush3.bf16.msra.mxu0 %v5357_v10 }
 0xee9   :  { %v4436_v32 = vpop.f32.mrb[48].mxu0 }
 0xeea   :  { %v4437_v31 = vadd.f32 %v4751_v59, %v4436_v32  ;;  %v5173_v49 = vpop.f32.mrb[49].mxu0 }
 0xeec   :  { %v4441_v12 = vmul.f32 1.442695, %v4437_v31  ;;  %vm4440_vm13 = vcmp.gt.f32.partialorder %v4437_v31, 0.0 }
 0xeee   :  { %5712 = vpow2.f32 %v4441_v12 }
 0xef8   :  { %v5713_v56 = vpop.eup %5712 }
 0xef9   :  { %v4753_v11 = vadd.f32 -1.0, %v5713_v56 }
 0xefb   :  { %v4444_v33 = vsel %vm4440_vm13, %v4437_v31, %v4753_v11 }
 0xefc   :  { %5183 = vmatmul.mubr.msk.f32.vlgmr.msra.gmra.mrb[50].mxu0 %vm235_vm0, %v4444_v33 }
 0xefd   :  { %5901 = shalt.err (!%p5898_p12)
}
 0xefe   :  { %s5902_s19 = scalar_lea.hbm %s7349_s25, 32 }
 0xeff   :  { %p5903_p13 = scmp.ne.s32.totalorder %s7349_s25, %s5902_s19  ;;  %p5906_p0 = scmp.lt.u32.totalorder %s5902_s19, %s7349_s25 }
 0xf01   :  { %p5908_p1 = pnand %p5906_p0, %p5903_p13 }
 0xf03   :  { %5911 = shalt.err (!%p5908_p1)
}
 0xf04   :  { %4542 = dma.vmem_to_hbm [thread:$0]  %s4540_s15, 32, %s7349_s25, [#allocation6]   ;;  %v4754_v34 = vld [vmem:[#allocation16] ss:$0 sm:$0xff]  ;;  %vm4531_vm0 = vcmask 9216  }
 0xf05   :  { %s5967_s22 = smov [#allocation19]  }
 0xf06   :  { %s4549_s16 = sshll.u32 %s5967_s22, 4  ;;  %s4550_s16 = int_to_ptr.vmem [resolvable:$true] %s4549_s16 }
 0xf07   :  { %s5912_s5 = scalar_lea.vmem %s4550_s16, 32  ;;  %p5917_p3 = scmp.lt.s32.totalorder %s4550_s16, %s4550_s16 }
 0xf08   :  { %p5913_p2 = scmp.ne.s32.totalorder %s4550_s16, %s5912_s5  ;;  %p5918_p4 = scmp.lt.s32.totalorder %s5912_s5, %s5912_s5 }
 0xf0a   :  { %p5919_p5 = por %p5918_p4, %p5917_p3 }
 0xf0c   :  { %p5920_p6 = pnand %p5919_p5, %p5913_p2 }
 0xfcf   :  { %v4525_v38 = vpop.f32.mrb[50].mxu0 }
 0xfd0   :  { %v4526_v40 = vadd.f32 %v4754_v34, %v4525_v38  ;;  %v5184_v43 = vpop.f32.mrb[51].mxu0 }
 0xfd2   :  { %4532 = vst.msk [vmem:[#allocation19] sm:$0x3] %vm4531_vm0, %v4526_v40 }
 0xfd3   :  { %5923 = shalt.err (!%p5920_p6)
}
 0xfd4   :  { %s5924_s25 = scalar_lea.hbm %s7350_s26, 32 }
 0xfd5   :  { %p5925_p7 = scmp.ne.s32.totalorder %s7350_s26, %s5924_s25  ;;  %p5928_p8 = scmp.lt.u32.totalorder %s5924_s25, %s7350_s26 }
 0xfd7   :  { %p5930_p9 = pnand %p5928_p8, %p5925_p7 }
 0xfd9   :  { %5933 = shalt.err (!%p5930_p9)
}
 0xfda   :  { %4552 = dma.vmem_to_hbm [thread:$0]  %s4550_s16, 32, %s7350_s26, [#allocation20]  }
 0xfdb   :  { %5944 = dma.done.wait [#allocation6], 32  }
 0xfdc   :  { %5945 = vsyncadd [#allocation6], 4294967264 }
 0xfdd   :  { %5946 = dma.done.wait [#allocation20], 32  }
 0xfde   :  { %5947 = vsyncadd [#allocation20], 4294967264 }
 0xfdf   :  { %4559 = vsyncpa [#allocation5], 1 }
 0xfe0   :  { %4560 = vsyncpa [#allocation8], 1 }
 0xfe1   :  { %4561 = vsyncpa [#allocation11], 1 }
 0xfe2   :  { %4562 = vsyncpa [#allocation14], 1 }
 0xfe3   :  { %4563 = vsyncpa [#allocation17], 1 }
 0xfe4   :  { %4564 = vsyncpa [#allocation6], 1 }
 0xfe5   :  { %4565 = vsyncpa [#allocation20], 1 }

</bundles_post_ra>
